<compile_context>
chip_gen: v6e
topology: v6e:2x2x1
jax: 0.10.0
libtpu: 0.0.40
codegen_flags: <defaults>
</compile_context>

<pallas_src>
import functools

import jax
import jax.numpy as jnp
from jax import lax
from jax.experimental import pallas as pl
from jax.experimental.pallas import tpu as pltpu  # noqa: F401  (TPU backend)

HIGH = jax.lax.Precision.HIGHEST  # reference only


# ----------------------------- Pallas kernels ------------------------------

def dense_kernel(x_ref, w_ref, b_ref, o_ref):
    """o = x @ w + b  on whole-array VMEM blocks (batched projections / fc)."""
    o_ref[...] = (
        jnp.dot(x_ref[...], w_ref[...], preferred_element_type=jnp.float32)
        + b_ref[...])


def _lstm_step(gates, c, hidden):
    """Gate order [i, f, o, g]: one contiguous sigmoid over 3H, tanh over last H."""
    sig = jax.nn.sigmoid(gates[:, :3 * hidden])
    g = jnp.tanh(gates[:, 3 * hidden:])
    i = sig[:, 0 * hidden:1 * hidden]
    f = sig[:, 1 * hidden:2 * hidden]
    o = sig[:, 2 * hidden:3 * hidden]
    c_new = f * c + i * g
    h_new = o * jnp.tanh(c_new)
    return h_new, c_new


def lstm_encoder_kernel(xg_ref, w_hh_ref, h_out_ref, c_out_ref, *, hidden, seq_len):
    """xg_ref: (T, B, 4H) precomputed x@W_ih + b.  Outputs final (h, c)."""
    b = h_out_ref.shape[0]

    def step(t, carry):
        h, c = carry
        gates = xg_ref[t] + jnp.dot(h, w_hh_ref[...],
                                    preferred_element_type=jnp.float32)
        return _lstm_step(gates, c, hidden)

    h0 = jnp.zeros((b, hidden), jnp.float32)
    c0 = jnp.zeros((b, hidden), jnp.float32)
    h, c = lax.fori_loop(0, seq_len, step, (h0, c0), unroll=True)
    h_out_ref[...] = h
    c_out_ref[...] = c


def lstm_decoder_kernel(xg_ref, h0_ref, c0_ref, w_hh_ref, hs_ref, *, hidden, seq_len):
    """Same recurrence, initial state from the encoder; emits h_t for every step."""

    def step(t, carry):
        h, c = carry
        gates = xg_ref[t] + jnp.dot(h, w_hh_ref[...],
                                    preferred_element_type=jnp.float32)
        h_new, c_new = _lstm_step(gates, c, hidden)
        hs_ref[t] = h_new
        return h_new, c_new

    lax.fori_loop(0, seq_len, step, (h0_ref[...], c0_ref[...]), unroll=True)


# ------------------------------ pallas_call wrappers ------------------------

def run_dense(x, w, b):
    n = x.shape[0]
    m = w.shape[1]
    return pl.pallas_call(
        dense_kernel,
        out_shape=jax.ShapeDtypeStruct((n, m), jnp.float32),
    )(x, w, b)


def run_encoder(xg_tbg, w_hh, hidden):
    t, b, _ = xg_tbg.shape
    kernel = functools.partial(lstm_encoder_kernel, hidden=hidden, seq_len=t)
    return pl.pallas_call(
        kernel,
        out_shape=(jax.ShapeDtypeStruct((b, hidden), jnp.float32),
                   jax.ShapeDtypeStruct((b, hidden), jnp.float32)),
    )(xg_tbg, w_hh)


def run_decoder(xg_tbg, h0, c0, w_hh, hidden):
    t, b, _ = xg_tbg.shape
    kernel = functools.partial(lstm_decoder_kernel, hidden=hidden, seq_len=t)
    return pl.pallas_call(
        kernel,
        out_shape=jax.ShapeDtypeStruct((t, b, hidden), jnp.float32),
    )(xg_tbg, h0, c0, w_hh)


# ------------------------------ params & forward ----------------------------

def init_params(key, src_vocab, tgt_vocab, embed_dim, hidden):
    ks = jax.random.split(key, 9)
    k_lstm = 1.0 / jnp.sqrt(hidden)
    v_pad = ((tgt_vocab + 127) // 128) * 128

    def u(k, shape, scale):
        return jax.random.uniform(k, shape, jnp.float32, -scale, scale)

    fc_w = u(ks[7], (hidden, tgt_vocab), k_lstm)
    fc_b = u(ks[8], (1, tgt_vocab), k_lstm)

    return {
        "embedding": jax.random.normal(ks[0], (src_vocab, embed_dim), jnp.float32),
        # encoder LSTM: weights (in_dim, 4H), gate order [i, f, o, g],
        # bias = b_ih + b_hh (folded into the batched input projection).
        "enc_w_ih": u(ks[1], (embed_dim, 4 * hidden), k_lstm),
        "enc_w_hh": u(ks[2], (hidden, 4 * hidden), k_lstm),
        "enc_b":    u(ks[3], (1, 4 * hidden), k_lstm),
        # decoder LSTM
        "dec_w_ih": u(ks[4], (embed_dim, 4 * hidden), k_lstm),
        "dec_w_hh": u(ks[5], (hidden, 4 * hidden), k_lstm),
        "dec_b":    u(ks[6], (1, 4 * hidden), k_lstm),
        # fc, padded to a lane-dense vocab (zeros in the padded tail)
        "fc_w": jnp.pad(fc_w, ((0, 0), (0, v_pad - tgt_vocab))),
        "fc_b": jnp.pad(fc_b, ((0, 0), (0, v_pad - tgt_vocab))),
    }


def seq2seq_forward(params, x_enc_ids, x_dec_ids, hidden, tgt_vocab):
    emb = params["embedding"]
    b, t_enc = x_enc_ids.shape
    _, t_dec = x_dec_ids.shape
    e = emb.shape[1]

    # Gather embeddings straight into time-major (T, B, E) (gather is glue).
    x_enc_t = jnp.take(emb, x_enc_ids.T, axis=0)
    x_dec_t = jnp.take(emb, x_dec_ids.T, axis=0)

    # Batched gate projections (+ folded bias), off the recurrent critical path.
    xg_enc = run_dense(x_enc_t.reshape(t_enc * b, e), params["enc_w_ih"],
                       params["enc_b"]).reshape(t_enc, b, 4 * hidden)
    xg_dec = run_dense(x_dec_t.reshape(t_dec * b, e), params["dec_w_ih"],
                       params["dec_b"]).reshape(t_dec, b, 4 * hidden)

    h_enc, c_enc = run_encoder(xg_enc, params["enc_w_hh"], hidden)
    hs = run_decoder(xg_dec, h_enc, c_enc, params["dec_w_hh"], hidden)  # (T, B, H)

    # fc as one batched (B*T, H)@(H, V_pad) matmul; rows fed batch-major so the
    # logits come out directly as (B, T, V_pad) (no transpose of the largest tensor).
    hs_bt = jnp.transpose(hs, (1, 0, 2)).reshape(b * t_dec, hidden)
    logits = run_dense(hs_bt, params["fc_w"], params["fc_b"])
    return logits.reshape(b, t_dec, -1)[:, :, :tgt_vocab]


# ---------------- pure-JAX reference for correctness check ----------------

def _lstm_ref(xg_tbg, h0, c0, w_hh, hidden):
    def step(carry, xg_t):
        h, c = carry
        gates = xg_t + jnp.dot(h, w_hh, precision=HIGH)
        sig = jax.nn.sigmoid(gates[:, :3 * hidden])
        g = jnp.tanh(gates[:, 3 * hidden:])
        i = sig[:, :hidden]
        f = sig[:, hidden:2 * hidden]
        o = sig[:, 2 * hidden:3 * hidden]
        c = f * c + i * g
        h = o * jnp.tanh(c)
        return (h, c), h

    (h, c), hs = jax.lax.scan(step, (h0, c0), xg_tbg)
    return hs, h, c


def seq2seq_ref(params, x_enc_ids, x_dec_ids, hidden, tgt_vocab):
    emb = params["embedding"]
    b = x_enc_ids.shape[0]
    x_enc_t = jnp.take(emb, x_enc_ids.T, axis=0)
    x_dec_t = jnp.take(emb, x_dec_ids.T, axis=0)
    xg_enc = jnp.einsum("tbe,eg->tbg", x_enc_t, params["enc_w_ih"],
                        precision=HIGH) + params["enc_b"][None]
    xg_dec = jnp.einsum("tbe,eg->tbg", x_dec_t, params["dec_w_ih"],
                        precision=HIGH) + params["dec_b"][None]
    zeros = jnp.zeros((b, hidden), jnp.float32)
    _, h_enc, c_enc = _lstm_ref(xg_enc, zeros, zeros, params["enc_w_hh"], hidden)
    hs, _, _ = _lstm_ref(xg_dec, h_enc, c_enc, params["dec_w_hh"], hidden)
    logits = jnp.einsum("tbh,hv->btv", hs, params["fc_w"],
                        precision=HIGH) + params["fc_b"][None]
    return logits[:, :, :tgt_vocab]


if __name__ == "__main__":
    SRC_VOCAB, TGT_VOCAB = 50, 40
    EMBED_DIM, HIDDEN = 32, 128     # H=128 -> all gate slices lane-aligned
    B, T_ENC, T_DEC = 8, 8, 8       # B=8 -> full sublane utilization

    key = jax.random.PRNGKey(0)
    k_par, k_enc, k_dec = jax.random.split(key, 3)
    params = init_params(k_par, SRC_VOCAB, TGT_VOCAB, EMBED_DIM, HIDDEN)

    x_enc = jax.random.randint(k_enc, (B, T_ENC), 0, SRC_VOCAB, dtype=jnp.int32)
    x_dec = jax.random.randint(k_dec, (B, T_DEC), 0, SRC_VOCAB, dtype=jnp.int32)

    fwd = jax.jit(seq2seq_forward, static_argnums=(3, 4))
    out = jax.block_until_ready(fwd(params, x_enc, x_dec, HIDDEN, TGT_VOCAB))
    assert out.shape == (B, T_DEC, TGT_VOCAB), out.shape

    # Kernels use default (bf16-input, f32-accumulate) MXU precision; the reference
    # is full-f32 HIGHEST, so compare with a correspondingly loose tolerance.
    ref = jax.block_until_ready(
        seq2seq_ref(params, x_enc, x_dec, HIDDEN, TGT_VOCAB))
    assert jnp.allclose(out, ref, rtol=5e-2, atol=5e-2), \
        f"max abs err {jnp.max(jnp.abs(out - ref))}"

    print("KERNEL_OK")
</pallas_src>

<mosaic_0001>
module attributes {stable_mosaic.version = 11 : i64} {
  func.func @dense_kernel(%arg0: memref<64x32xf32, #tpu.memory_space<vmem>>, %arg1: memref<32x512xf32, #tpu.memory_space<vmem>>, %arg2: memref<1x512xf32, #tpu.memory_space<vmem>>, %arg3: memref<64x512xf32, #tpu.memory_space<vmem>>) attributes {dimension_semantics = [], scalar_prefetch = 0 : i64, scratch_operands = 0 : i64, tpu.core_type = #tpu.core_type<tc>} {
    %c0 = arith.constant 0 : index
    %c0_0 = arith.constant 0 : index
    %0 = vector.load %arg0[%c0, %c0_0] : memref<64x32xf32, #tpu.memory_space<vmem>>, vector<64x32xf32>
    %c0_1 = arith.constant 0 : index
    %c0_2 = arith.constant 0 : index
    %1 = vector.load %arg1[%c0_1, %c0_2] : memref<32x512xf32, #tpu.memory_space<vmem>>, vector<32x512xf32>
    %cst = arith.constant dense<0.000000e+00> : vector<64x512xf32>
    %2 = tpu.matmul %0, %1, %cst {dimension_numbers = #tpu.dot_dimension_numbers<[1], [0], [0], [1], [0, 0, 1, 1], [], []>} : vector<64x32xf32>, vector<32x512xf32>, vector<64x512xf32> -> vector<64x512xf32>
    %c0_3 = arith.constant 0 : index
    %c0_4 = arith.constant 0 : index
    %3 = vector.load %arg2[%c0_3, %c0_4] : memref<1x512xf32, #tpu.memory_space<vmem>>, vector<1x512xf32>
    %4 = vector.broadcast %3 : vector<1x512xf32> to vector<64x512xf32>
    %5 = arith.addf %2, %4 : vector<64x512xf32>
    %c0_5 = arith.constant 0 : index
    %c0_6 = arith.constant 0 : index
    %6 = vector.load %arg3[%c0_5, %c0_6] : memref<64x512xf32, #tpu.memory_space<vmem>>, vector<64x512xf32>
    tpu.vector_store %arg3[%c0_5, %c0_6], %5 {strides = array<i32>} : memref<64x512xf32, #tpu.memory_space<vmem>>, vector<64x512xf32>,
    return
  }
}

module attributes {stable_mosaic.version = 11 : i64} {
  func.func @lstm_encoder_kernel(%arg0: memref<8x8x512xf32, #tpu.memory_space<vmem>>, %arg1: memref<128x512xf32, #tpu.memory_space<vmem>>, %arg2: memref<8x128xf32, #tpu.memory_space<vmem>>, %arg3: memref<8x128xf32, #tpu.memory_space<vmem>>) attributes {dimension_semantics = [], scalar_prefetch = 0 : i64, scratch_operands = 0 : i64, tpu.core_type = #tpu.core_type<tc>} {
    %cst = arith.constant 0.000000e+00 : f32
    %0 = vector.broadcast %cst : f32 to vector<8x128xf32>
    %cst_0 = arith.constant 0.000000e+00 : f32
    %1 = vector.broadcast %cst_0 : f32 to vector<8x128xf32>
    %c0_i32 = arith.constant 0 : i32
    %2 = arith.index_cast %c0_i32 : i32 to index
    %c0 = arith.constant 0 : index
    %c0_1 = arith.constant 0 : index
    %3 = vector.load %arg0[%2, %c0, %c0_1] : memref<8x8x512xf32, #tpu.memory_space<vmem>>, vector<1x8x512xf32>
    %4 = vector.shape_cast %3 : vector<1x8x512xf32> to vector<8x512xf32>
    %c0_2 = arith.constant 0 : index
    %c0_3 = arith.constant 0 : index
    %5 = vector.load %arg1[%c0_2, %c0_3] : memref<128x512xf32, #tpu.memory_space<vmem>>, vector<128x512xf32>
    %cst_4 = arith.constant dense<0.000000e+00> : vector<8x512xf32>
    %6 = tpu.matmul %0, %5, %cst_4 {dimension_numbers = #tpu.dot_dimension_numbers<[1], [0], [0], [1], [0, 0, 1, 1], [], []>} : vector<8x128xf32>, vector<128x512xf32>, vector<8x512xf32> -> vector<8x512xf32>
    %7 = arith.addf %4, %6 : vector<8x512xf32>
    %8 = vector.extract_strided_slice %7 {offsets = [0, 0], sizes = [8, 384], strides = [1, 1]} : vector<8x512xf32> to vector<8x384xf32>
    %9 = arith.negf %8 : vector<8x384xf32>
    %10 = math.exp %9 : vector<8x384xf32>
    %cst_5 = arith.constant 1.000000e+00 : f32
    %11 = vector.broadcast %cst_5 : f32 to vector<8x384xf32>
    %12 = arith.addf %11, %10 : vector<8x384xf32>
    %13 = arith.divf %11, %12 : vector<8x384xf32>
    %14 = vector.extract_strided_slice %7 {offsets = [0, 384], sizes = [8, 128], strides = [1, 1]} : vector<8x512xf32> to vector<8x128xf32>
    %15 = math.tanh %14 : vector<8x128xf32>
    %16 = vector.extract_strided_slice %13 {offsets = [0, 0], sizes = [8, 128], strides = [1, 1]} : vector<8x384xf32> to vector<8x128xf32>
    %17 = vector.extract_strided_slice %13 {offsets = [0, 128], sizes = [8, 128], strides = [1, 1]} : vector<8x384xf32> to vector<8x128xf32>
    %18 = vector.extract_strided_slice %13 {offsets = [0, 256], sizes = [8, 128], strides = [1, 1]} : vector<8x384xf32> to vector<8x128xf32>
    %19 = arith.mulf %17, %1 : vector<8x128xf32>
    %20 = arith.mulf %16, %15 : vector<8x128xf32>
    %21 = arith.addf %19, %20 : vector<8x128xf32>
    %22 = math.tanh %21 : vector<8x128xf32>
    %23 = arith.mulf %18, %22 : vector<8x128xf32>
    %c1_i32 = arith.constant 1 : i32
    %24 = arith.index_cast %c1_i32 : i32 to index
    %c0_6 = arith.constant 0 : index
    %c0_7 = arith.constant 0 : index
    %25 = vector.load %arg0[%24, %c0_6, %c0_7] : memref<8x8x512xf32, #tpu.memory_space<vmem>>, vector<1x8x512xf32>
    %26 = vector.shape_cast %25 : vector<1x8x512xf32> to vector<8x512xf32>
    %c0_8 = arith.constant 0 : index
    %c0_9 = arith.constant 0 : index
    %27 = vector.load %arg1[%c0_8, %c0_9] : memref<128x512xf32, #tpu.memory_space<vmem>>, vector<128x512xf32>
    %cst_10 = arith.constant dense<0.000000e+00> : vector<8x512xf32>
    %28 = tpu.matmul %23, %27, %cst_10 {dimension_numbers = #tpu.dot_dimension_numbers<[1], [0], [0], [1], [0, 0, 1, 1], [], []>} : vector<8x128xf32>, vector<128x512xf32>, vector<8x512xf32> -> vector<8x512xf32>
    %29 = arith.addf %26, %28 : vector<8x512xf32>
    %30 = vector.extract_strided_slice %29 {offsets = [0, 0], sizes = [8, 384], strides = [1, 1]} : vector<8x512xf32> to vector<8x384xf32>
    %31 = arith.negf %30 : vector<8x384xf32>
    %32 = math.exp %31 : vector<8x384xf32>
    %cst_11 = arith.constant 1.000000e+00 : f32
    %33 = vector.broadcast %cst_11 : f32 to vector<8x384xf32>
    %34 = arith.addf %33, %32 : vector<8x384xf32>
    %35 = arith.divf %33, %34 : vector<8x384xf32>
    %36 = vector.extract_strided_slice %29 {offsets = [0, 384], sizes = [8, 128], strides = [1, 1]} : vector<8x512xf32> to vector<8x128xf32>
    %37 = math.tanh %36 : vector<8x128xf32>
    %38 = vector.extract_strided_slice %35 {offsets = [0, 0], sizes = [8, 128], strides = [1, 1]} : vector<8x384xf32> to vector<8x128xf32>
    %39 = vector.extract_strided_slice %35 {offsets = [0, 128], sizes = [8, 128], strides = [1, 1]} : vector<8x384xf32> to vector<8x128xf32>
    %40 = vector.extract_strided_slice %35 {offsets = [0, 256], sizes = [8, 128], strides = [1, 1]} : vector<8x384xf32> to vector<8x128xf32>
    %41 = arith.mulf %39, %21 : vector<8x128xf32>
    %42 = arith.mulf %38, %37 : vector<8x128xf32>
    %43 = arith.addf %41, %42 : vector<8x128xf32>
    %44 = math.tanh %43 : vector<8x128xf32>
    %45 = arith.mulf %40, %44 : vector<8x128xf32>
    %c2_i32 = arith.constant 2 : i32
    %46 = arith.index_cast %c2_i32 : i32 to index
    %c0_12 = arith.constant 0 : index
    %c0_13 = arith.constant 0 : index
    %47 = vector.load %arg0[%46, %c0_12, %c0_13] : memref<8x8x512xf32, #tpu.memory_space<vmem>>, vector<1x8x512xf32>
    %48 = vector.shape_cast %47 : vector<1x8x512xf32> to vector<8x512xf32>
    %c0_14 = arith.constant 0 : index
    %c0_15 = arith.constant 0 : index
    %49 = vector.load %arg1[%c0_14, %c0_15] : memref<128x512xf32, #tpu.memory_space<vmem>>, vector<128x512xf32>
    %cst_16 = arith.constant dense<0.000000e+00> : vector<8x512xf32>
    %50 = tpu.matmul %45, %49, %cst_16 {dimension_numbers = #tpu.dot_dimension_numbers<[1], [0], [0], [1], [0, 0, 1, 1], [], []>} : vector<8x128xf32>, vector<128x512xf32>, vector<8x512xf32> -> vector<8x512xf32>
    %51 = arith.addf %48, %50 : vector<8x512xf32>
    %52 = vector.extract_strided_slice %51 {offsets = [0, 0], sizes = [8, 384], strides = [1, 1]} : vector<8x512xf32> to vector<8x384xf32>
    %53 = arith.negf %52 : vector<8x384xf32>
    %54 = math.exp %53 : vector<8x384xf32>
    %cst_17 = arith.constant 1.000000e+00 : f32
    %55 = vector.broadcast %cst_17 : f32 to vector<8x384xf32>
    %56 = arith.addf %55, %54 : vector<8x384xf32>
    %57 = arith.divf %55, %56 : vector<8x384xf32>
    %58 = vector.extract_strided_slice %51 {offsets = [0, 384], sizes = [8, 128], strides = [1, 1]} : vector<8x512xf32> to vector<8x128xf32>
    %59 = math.tanh %58 : vector<8x128xf32>
    %60 = vector.extract_strided_slice %57 {offsets = [0, 0], sizes = [8, 128], strides = [1, 1]} : vector<8x384xf32> to vector<8x128xf32>
    %61 = vector.extract_strided_slice %57 {offsets = [0, 128], sizes = [8, 128], strides = [1, 1]} : vector<8x384xf32> to vector<8x128xf32>
    %62 = vector.extract_strided_slice %57 {offsets = [0, 256], sizes = [8, 128], strides = [1, 1]} : vector<8x384xf32> to vector<8x128xf32>
    %63 = arith.mulf %61, %43 : vector<8x128xf32>
    %64 = arith.mulf %60, %59 : vector<8x128xf32>
    %65 = arith.addf %63, %64 : vector<8x128xf32>
    %66 = math.tanh %65 : vector<8x128xf32>
    %67 = arith.mulf %62, %66 : vector<8x128xf32>
    %c3_i32 = arith.constant 3 : i32
    %68 = arith.index_cast %c3_i32 : i32 to index
    %c0_18 = arith.constant 0 : index
    %c0_19 = arith.constant 0 : index
    %69 = vector.load %arg0[%68, %c0_18, %c0_19] : memref<8x8x512xf32, #tpu.memory_space<vmem>>, vector<1x8x512xf32>
    %70 = vector.shape_cast %69 : vector<1x8x512xf32> to vector<8x512xf32>
    %c0_20 = arith.constant 0 : index
    %c0_21 = arith.constant 0 : index
    %71 = vector.load %arg1[%c0_20, %c0_21] : memref<128x512xf32, #tpu.memory_space<vmem>>, vector<128x512xf32>
    %cst_22 = arith.constant dense<0.000000e+00> : vector<8x512xf32>
    %72 = tpu.matmul %67, %71, %cst_22 {dimension_numbers = #tpu.dot_dimension_numbers<[1], [0], [0], [1], [0, 0, 1, 1], [], []>} : vector<8x128xf32>, vector<128x512xf32>, vector<8x512xf32> -> vector<8x512xf32>
    %73 = arith.addf %70, %72 : vector<8x512xf32>
    %74 = vector.extract_strided_slice %73 {offsets = [0, 0], sizes = [8, 384], strides = [1, 1]} : vector<8x512xf32> to vector<8x384xf32>
    %75 = arith.negf %74 : vector<8x384xf32>
    %76 = math.exp %75 : vector<8x384xf32>
    %cst_23 = arith.constant 1.000000e+00 : f32
    %77 = vector.broadcast %cst_23 : f32 to vector<8x384xf32>
    %78 = arith.addf %77, %76 : vector<8x384xf32>
    %79 = arith.divf %77, %78 : vector<8x384xf32>
    %80 = vector.extract_strided_slice %73 {offsets = [0, 384], sizes = [8, 128], strides = [1, 1]} : vector<8x512xf32> to vector<8x128xf32>
    %81 = math.tanh %80 : vector<8x128xf32>
    %82 = vector.extract_strided_slice %79 {offsets = [0, 0], sizes = [8, 128], strides = [1, 1]} : vector<8x384xf32> to vector<8x128xf32>
    %83 = vector.extract_strided_slice %79 {offsets = [0, 128], sizes = [8, 128], strides = [1, 1]} : vector<8x384xf32> to vector<8x128xf32>
    %84 = vector.extract_strided_slice %79 {offsets = [0, 256], sizes = [8, 128], strides = [1, 1]} : vector<8x384xf32> to vector<8x128xf32>
    %85 = arith.mulf %83, %65 : vector<8x128xf32>
    %86 = arith.mulf %82, %81 : vector<8x128xf32>
    %87 = arith.addf %85, %86 : vector<8x128xf32>
    %88 = math.tanh %87 : vector<8x128xf32>
    %89 = arith.mulf %84, %88 : vector<8x128xf32>
    %c4_i32 = arith.constant 4 : i32
    %90 = arith.index_cast %c4_i32 : i32 to index
    %c0_24 = arith.constant 0 : index
    %c0_25 = arith.constant 0 : index
    %91 = vector.load %arg0[%90, %c0_24, %c0_25] : memref<8x8x512xf32, #tpu.memory_space<vmem>>, vector<1x8x512xf32>
    %92 = vector.shape_cast %91 : vector<1x8x512xf32> to vector<8x512xf32>
    %c0_26 = arith.constant 0 : index
    %c0_27 = arith.constant 0 : index
    %93 = vector.load %arg1[%c0_26, %c0_27] : memref<128x512xf32, #tpu.memory_space<vmem>>, vector<128x512xf32>
    %cst_28 = arith.constant dense<0.000000e+00> : vector<8x512xf32>
    %94 = tpu.matmul %89, %93, %cst_28 {dimension_numbers = #tpu.dot_dimension_numbers<[1], [0], [0], [1], [0, 0, 1, 1], [], []>} : vector<8x128xf32>, vector<128x512xf32>, vector<8x512xf32> -> vector<8x512xf32>
    %95 = arith.addf %92, %94 : vector<8x512xf32>
    %96 = vector.extract_strided_slice %95 {offsets = [0, 0], sizes = [8, 384], strides = [1, 1]} : vector<8x512xf32> to vector<8x384xf32>
    %97 = arith.negf %96 : vector<8x384xf32>
    %98 = math.exp %97 : vector<8x384xf32>
    %cst_29 = arith.constant 1.000000e+00 : f32
    %99 = vector.broadcast %cst_29 : f32 to vector<8x384xf32>
    %100 = arith.addf %99, %98 : vector<8x384xf32>
    %101 = arith.divf %99, %100 : vector<8x384xf32>
    %102 = vector.extract_strided_slice %95 {offsets = [0, 384], sizes = [8, 128], strides = [1, 1]} : vector<8x512xf32> to vector<8x128xf32>
    %103 = math.tanh %102 : vector<8x128xf32>
    %104 = vector.extract_strided_slice %101 {offsets = [0, 0], sizes = [8, 128], strides = [1, 1]} : vector<8x384xf32> to vector<8x128xf32>
    %105 = vector.extract_strided_slice %101 {offsets = [0, 128], sizes = [8, 128], strides = [1, 1]} : vector<8x384xf32> to vector<8x128xf32>
    %106 = vector.extract_strided_slice %101 {offsets = [0, 256], sizes = [8, 128], strides = [1, 1]} : vector<8x384xf32> to vector<8x128xf32>
    %107 = arith.mulf %105, %87 : vector<8x128xf32>
    %108 = arith.mulf %104, %103 : vector<8x128xf32>
    %109 = arith.addf %107, %108 : vector<8x128xf32>
    %110 = math.tanh %109 : vector<8x128xf32>
    %111 = arith.mulf %106, %110 : vector<8x128xf32>
    %c5_i32 = arith.constant 5 : i32
    %112 = arith.index_cast %c5_i32 : i32 to index
    %c0_30 = arith.constant 0 : index
    %c0_31 = arith.constant 0 : index
    %113 = vector.load %arg0[%112, %c0_30, %c0_31] : memref<8x8x512xf32, #tpu.memory_space<vmem>>, vector<1x8x512xf32>
    %114 = vector.shape_cast %113 : vector<1x8x512xf32> to vector<8x512xf32>
    %c0_32 = arith.constant 0 : index
    %c0_33 = arith.constant 0 : index
    %115 = vector.load %arg1[%c0_32, %c0_33] : memref<128x512xf32, #tpu.memory_space<vmem>>, vector<128x512xf32>
    %cst_34 = arith.constant dense<0.000000e+00> : vector<8x512xf32>
    %116 = tpu.matmul %111, %115, %cst_34 {dimension_numbers = #tpu.dot_dimension_numbers<[1], [0], [0], [1], [0, 0, 1, 1], [], []>} : vector<8x128xf32>, vector<128x512xf32>, vector<8x512xf32> -> vector<8x512xf32>
    %117 = arith.addf %114, %116 : vector<8x512xf32>
    %118 = vector.extract_strided_slice %117 {offsets = [0, 0], sizes = [8, 384], strides = [1, 1]} : vector<8x512xf32> to vector<8x384xf32>
    %119 = arith.negf %118 : vector<8x384xf32>
    %120 = math.exp %119 : vector<8x384xf32>
    %cst_35 = arith.constant 1.000000e+00 : f32
    %121 = vector.broadcast %cst_35 : f32 to vector<8x384xf32>
    %122 = arith.addf %121, %120 : vector<8x384xf32>
    %123 = arith.divf %121, %122 : vector<8x384xf32>
    %124 = vector.extract_strided_slice %117 {offsets = [0, 384], sizes = [8, 128], strides = [1, 1]} : vector<8x512xf32> to vector<8x128xf32>
    %125 = math.tanh %124 : vector<8x128xf32>
    %126 = vector.extract_strided_slice %123 {offsets = [0, 0], sizes = [8, 128], strides = [1, 1]} : vector<8x384xf32> to vector<8x128xf32>
    %127 = vector.extract_strided_slice %123 {offsets = [0, 128], sizes = [8, 128], strides = [1, 1]} : vector<8x384xf32> to vector<8x128xf32>
    %128 = vector.extract_strided_slice %123 {offsets = [0, 256], sizes = [8, 128], strides = [1, 1]} : vector<8x384xf32> to vector<8x128xf32>
    %129 = arith.mulf %127, %109 : vector<8x128xf32>
    %130 = arith.mulf %126, %125 : vector<8x128xf32>
    %131 = arith.addf %129, %130 : vector<8x128xf32>
    %132 = math.tanh %131 : vector<8x128xf32>
    %133 = arith.mulf %128, %132 : vector<8x128xf32>
    %c6_i32 = arith.constant 6 : i32
    %134 = arith.index_cast %c6_i32 : i32 to index
    %c0_36 = arith.constant 0 : index
    %c0_37 = arith.constant 0 : index
    %135 = vector.load %arg0[%134, %c0_36, %c0_37] : memref<8x8x512xf32, #tpu.memory_space<vmem>>, vector<1x8x512xf32>
    %136 = vector.shape_cast %135 : vector<1x8x512xf32> to vector<8x512xf32>
    %c0_38 = arith.constant 0 : index
    %c0_39 = arith.constant 0 : index
    %137 = vector.load %arg1[%c0_38, %c0_39] : memref<128x512xf32, #tpu.memory_space<vmem>>, vector<128x512xf32>
    %cst_40 = arith.constant dense<0.000000e+00> : vector<8x512xf32>
    %138 = tpu.matmul %133, %137, %cst_40 {dimension_numbers = #tpu.dot_dimension_numbers<[1], [0], [0], [1], [0, 0, 1, 1], [], []>} : vector<8x128xf32>, vector<128x512xf32>, vector<8x512xf32> -> vector<8x512xf32>
    %139 = arith.addf %136, %138 : vector<8x512xf32>
    %140 = vector.extract_strided_slice %139 {offsets = [0, 0], sizes = [8, 384], strides = [1, 1]} : vector<8x512xf32> to vector<8x384xf32>
    %141 = arith.negf %140 : vector<8x384xf32>
    %142 = math.exp %141 : vector<8x384xf32>
    %cst_41 = arith.constant 1.000000e+00 : f32
    %143 = vector.broadcast %cst_41 : f32 to vector<8x384xf32>
    %144 = arith.addf %143, %142 : vector<8x384xf32>
    %145 = arith.divf %143, %144 : vector<8x384xf32>
    %146 = vector.extract_strided_slice %139 {offsets = [0, 384], sizes = [8, 128], strides = [1, 1]} : vector<8x512xf32> to vector<8x128xf32>
    %147 = math.tanh %146 : vector<8x128xf32>
    %148 = vector.extract_strided_slice %145 {offsets = [0, 0], sizes = [8, 128], strides = [1, 1]} : vector<8x384xf32> to vector<8x128xf32>
    %149 = vector.extract_strided_slice %145 {offsets = [0, 128], sizes = [8, 128], strides = [1, 1]} : vector<8x384xf32> to vector<8x128xf32>
    %150 = vector.extract_strided_slice %145 {offsets = [0, 256], sizes = [8, 128], strides = [1, 1]} : vector<8x384xf32> to vector<8x128xf32>
    %151 = arith.mulf %149, %131 : vector<8x128xf32>
    %152 = arith.mulf %148, %147 : vector<8x128xf32>
    %153 = arith.addf %151, %152 : vector<8x128xf32>
    %154 = math.tanh %153 : vector<8x128xf32>
    %155 = arith.mulf %150, %154 : vector<8x128xf32>
    %c7_i32 = arith.constant 7 : i32
    %156 = arith.index_cast %c7_i32 : i32 to index
    %c0_42 = arith.constant 0 : index
    %c0_43 = arith.constant 0 : index
    %157 = vector.load %arg0[%156, %c0_42, %c0_43] : memref<8x8x512xf32, #tpu.memory_space<vmem>>, vector<1x8x512xf32>
    %158 = vector.shape_cast %157 : vector<1x8x512xf32> to vector<8x512xf32>
    %c0_44 = arith.constant 0 : index
    %c0_45 = arith.constant 0 : index
    %159 = vector.load %arg1[%c0_44, %c0_45] : memref<128x512xf32, #tpu.memory_space<vmem>>, vector<128x512xf32>
    %cst_46 = arith.constant dense<0.000000e+00> : vector<8x512xf32>
    %160 = tpu.matmul %155, %159, %cst_46 {dimension_numbers = #tpu.dot_dimension_numbers<[1], [0], [0], [1], [0, 0, 1, 1], [], []>} : vector<8x128xf32>, vector<128x512xf32>, vector<8x512xf32> -> vector<8x512xf32>
    %161 = arith.addf %158, %160 : vector<8x512xf32>
    %162 = vector.extract_strided_slice %161 {offsets = [0, 0], sizes = [8, 384], strides = [1, 1]} : vector<8x512xf32> to vector<8x384xf32>
    %163 = arith.negf %162 : vector<8x384xf32>
    %164 = math.exp %163 : vector<8x384xf32>
    %cst_47 = arith.constant 1.000000e+00 : f32
    %165 = vector.broadcast %cst_47 : f32 to vector<8x384xf32>
    %166 = arith.addf %165, %164 : vector<8x384xf32>
    %167 = arith.divf %165, %166 : vector<8x384xf32>
    %168 = vector.extract_strided_slice %161 {offsets = [0, 384], sizes = [8, 128], strides = [1, 1]} : vector<8x512xf32> to vector<8x128xf32>
    %169 = math.tanh %168 : vector<8x128xf32>
    %170 = vector.extract_strided_slice %167 {offsets = [0, 0], sizes = [8, 128], strides = [1, 1]} : vector<8x384xf32> to vector<8x128xf32>
    %171 = vector.extract_strided_slice %167 {offsets = [0, 128], sizes = [8, 128], strides = [1, 1]} : vector<8x384xf32> to vector<8x128xf32>
    %172 = vector.extract_strided_slice %167 {offsets = [0, 256], sizes = [8, 128], strides = [1, 1]} : vector<8x384xf32> to vector<8x128xf32>
    %173 = arith.mulf %171, %153 : vector<8x128xf32>
    %174 = arith.mulf %170, %169 : vector<8x128xf32>
    %175 = arith.addf %173, %174 : vector<8x128xf32>
    %176 = math.tanh %175 : vector<8x128xf32>
    %177 = arith.mulf %172, %176 : vector<8x128xf32>
    %c8_i32 = arith.constant 8 : i32
    %c0_48 = arith.constant 0 : index
    %c0_49 = arith.constant 0 : index
    %178 = vector.load %arg2[%c0_48, %c0_49] : memref<8x128xf32, #tpu.memory_space<vmem>>, vector<8x128xf32>
    tpu.vector_store %arg2[%c0_48, %c0_49], %177 {strides = array<i32>} : memref<8x128xf32, #tpu.memory_space<vmem>>, vector<8x128xf32>,
    %c0_50 = arith.constant 0 : index
    %c0_51 = arith.constant 0 : index
    %179 = vector.load %arg3[%c0_50, %c0_51] : memref<8x128xf32, #tpu.memory_space<vmem>>, vector<8x128xf32>
    tpu.vector_store %arg3[%c0_50, %c0_51], %175 {strides = array<i32>} : memref<8x128xf32, #tpu.memory_space<vmem>>, vector<8x128xf32>,
    return
  }
}

module attributes {stable_mosaic.version = 11 : i64} {
  func.func @lstm_decoder_kernel(%arg0: memref<8x8x512xf32, #tpu.memory_space<vmem>>, %arg1: memref<8x128xf32, #tpu.memory_space<vmem>>, %arg2: memref<8x128xf32, #tpu.memory_space<vmem>>, %arg3: memref<128x512xf32, #tpu.memory_space<vmem>>, %arg4: memref<8x8x128xf32, #tpu.memory_space<vmem>>) attributes {dimension_semantics = [], scalar_prefetch = 0 : i64, scratch_operands = 0 : i64, tpu.core_type = #tpu.core_type<tc>} {
    %c0 = arith.constant 0 : index
    %c0_0 = arith.constant 0 : index
    %0 = vector.load %arg1[%c0, %c0_0] : memref<8x128xf32, #tpu.memory_space<vmem>>, vector<8x128xf32>
    %c0_1 = arith.constant 0 : index
    %c0_2 = arith.constant 0 : index
    %1 = vector.load %arg2[%c0_1, %c0_2] : memref<8x128xf32, #tpu.memory_space<vmem>>, vector<8x128xf32>
    %c0_i32 = arith.constant 0 : i32
    %2 = arith.index_cast %c0_i32 : i32 to index
    %c0_3 = arith.constant 0 : index
    %c0_4 = arith.constant 0 : index
    %3 = vector.load %arg0[%2, %c0_3, %c0_4] : memref<8x8x512xf32, #tpu.memory_space<vmem>>, vector<1x8x512xf32>
    %4 = vector.shape_cast %3 : vector<1x8x512xf32> to vector<8x512xf32>
    %c0_5 = arith.constant 0 : index
    %c0_6 = arith.constant 0 : index
    %5 = vector.load %arg3[%c0_5, %c0_6] : memref<128x512xf32, #tpu.memory_space<vmem>>, vector<128x512xf32>
    %cst = arith.constant dense<0.000000e+00> : vector<8x512xf32>
    %6 = tpu.matmul %0, %5, %cst {dimension_numbers = #tpu.dot_dimension_numbers<[1], [0], [0], [1], [0, 0, 1, 1], [], []>} : vector<8x128xf32>, vector<128x512xf32>, vector<8x512xf32> -> vector<8x512xf32>
    %7 = arith.addf %4, %6 : vector<8x512xf32>
    %8 = vector.extract_strided_slice %7 {offsets = [0, 0], sizes = [8, 384], strides = [1, 1]} : vector<8x512xf32> to vector<8x384xf32>
    %9 = arith.negf %8 : vector<8x384xf32>
    %10 = math.exp %9 : vector<8x384xf32>
    %cst_7 = arith.constant 1.000000e+00 : f32
    %11 = vector.broadcast %cst_7 : f32 to vector<8x384xf32>
    %12 = arith.addf %11, %10 : vector<8x384xf32>
    %13 = arith.divf %11, %12 : vector<8x384xf32>
    %14 = vector.extract_strided_slice %7 {offsets = [0, 384], sizes = [8, 128], strides = [1, 1]} : vector<8x512xf32> to vector<8x128xf32>
    %15 = math.tanh %14 : vector<8x128xf32>
    %16 = vector.extract_strided_slice %13 {offsets = [0, 0], sizes = [8, 128], strides = [1, 1]} : vector<8x384xf32> to vector<8x128xf32>
    %17 = vector.extract_strided_slice %13 {offsets = [0, 128], sizes = [8, 128], strides = [1, 1]} : vector<8x384xf32> to vector<8x128xf32>
    %18 = vector.extract_strided_slice %13 {offsets = [0, 256], sizes = [8, 128], strides = [1, 1]} : vector<8x384xf32> to vector<8x128xf32>
    %19 = arith.mulf %17, %1 : vector<8x128xf32>
    %20 = arith.mulf %16, %15 : vector<8x128xf32>
    %21 = arith.addf %19, %20 : vector<8x128xf32>
    %22 = math.tanh %21 : vector<8x128xf32>
    %23 = arith.mulf %18, %22 : vector<8x128xf32>
    %24 = arith.index_cast %c0_i32 : i32 to index
    %c0_8 = arith.constant 0 : index
    %c0_9 = arith.constant 0 : index
    %25 = vector.load %arg4[%24, %c0_8, %c0_9] : memref<8x8x128xf32, #tpu.memory_space<vmem>>, vector<1x8x128xf32>
    %26 = vector.shape_cast %25 : vector<1x8x128xf32> to vector<8x128xf32>
    %27 = vector.shape_cast %23 : vector<8x128xf32> to vector<1x8x128xf32>
    tpu.vector_store %arg4[%24, %c0_8, %c0_9], %27 {strides = array<i32>} : memref<8x8x128xf32, #tpu.memory_space<vmem>>, vector<1x8x128xf32>,
    %c1_i32 = arith.constant 1 : i32
    %28 = arith.index_cast %c1_i32 : i32 to index
    %c0_10 = arith.constant 0 : index
    %c0_11 = arith.constant 0 : index
    %29 = vector.load %arg0[%28, %c0_10, %c0_11] : memref<8x8x512xf32, #tpu.memory_space<vmem>>, vector<1x8x512xf32>
    %30 = vector.shape_cast %29 : vector<1x8x512xf32> to vector<8x512xf32>
    %c0_12 = arith.constant 0 : index
    %c0_13 = arith.constant 0 : index
    %31 = vector.load %arg3[%c0_12, %c0_13] : memref<128x512xf32, #tpu.memory_space<vmem>>, vector<128x512xf32>
    %cst_14 = arith.constant dense<0.000000e+00> : vector<8x512xf32>
    %32 = tpu.matmul %23, %31, %cst_14 {dimension_numbers = #tpu.dot_dimension_numbers<[1], [0], [0], [1], [0, 0, 1, 1], [], []>} : vector<8x128xf32>, vector<128x512xf32>, vector<8x512xf32> -> vector<8x512xf32>
    %33 = arith.addf %30, %32 : vector<8x512xf32>
    %34 = vector.extract_strided_slice %33 {offsets = [0, 0], sizes = [8, 384], strides = [1, 1]} : vector<8x512xf32> to vector<8x384xf32>
    %35 = arith.negf %34 : vector<8x384xf32>
    %36 = math.exp %35 : vector<8x384xf32>
    %cst_15 = arith.constant 1.000000e+00 : f32
    %37 = vector.broadcast %cst_15 : f32 to vector<8x384xf32>
    %38 = arith.addf %37, %36 : vector<8x384xf32>
    %39 = arith.divf %37, %38 : vector<8x384xf32>
    %40 = vector.extract_strided_slice %33 {offsets = [0, 384], sizes = [8, 128], strides = [1, 1]} : vector<8x512xf32> to vector<8x128xf32>
    %41 = math.tanh %40 : vector<8x128xf32>
    %42 = vector.extract_strided_slice %39 {offsets = [0, 0], sizes = [8, 128], strides = [1, 1]} : vector<8x384xf32> to vector<8x128xf32>
    %43 = vector.extract_strided_slice %39 {offsets = [0, 128], sizes = [8, 128], strides = [1, 1]} : vector<8x384xf32> to vector<8x128xf32>
    %44 = vector.extract_strided_slice %39 {offsets = [0, 256], sizes = [8, 128], strides = [1, 1]} : vector<8x384xf32> to vector<8x128xf32>
    %45 = arith.mulf %43, %21 : vector<8x128xf32>
    %46 = arith.mulf %42, %41 : vector<8x128xf32>
    %47 = arith.addf %45, %46 : vector<8x128xf32>
    %48 = math.tanh %47 : vector<8x128xf32>
    %49 = arith.mulf %44, %48 : vector<8x128xf32>
    %50 = arith.index_cast %c1_i32 : i32 to index
    %c0_16 = arith.constant 0 : index
    %c0_17 = arith.constant 0 : index
    %51 = vector.load %arg4[%50, %c0_16, %c0_17] : memref<8x8x128xf32, #tpu.memory_space<vmem>>, vector<1x8x128xf32>
    %52 = vector.shape_cast %51 : vector<1x8x128xf32> to vector<8x128xf32>
    %53 = vector.shape_cast %49 : vector<8x128xf32> to vector<1x8x128xf32>
    tpu.vector_store %arg4[%50, %c0_16, %c0_17], %53 {strides = array<i32>} : memref<8x8x128xf32, #tpu.memory_space<vmem>>, vector<1x8x128xf32>,
    %c2_i32 = arith.constant 2 : i32
    %54 = arith.index_cast %c2_i32 : i32 to index
    %c0_18 = arith.constant 0 : index
    %c0_19 = arith.constant 0 : index
    %55 = vector.load %arg0[%54, %c0_18, %c0_19] : memref<8x8x512xf32, #tpu.memory_space<vmem>>, vector<1x8x512xf32>
    %56 = vector.shape_cast %55 : vector<1x8x512xf32> to vector<8x512xf32>
    %c0_20 = arith.constant 0 : index
    %c0_21 = arith.constant 0 : index
    %57 = vector.load %arg3[%c0_20, %c0_21] : memref<128x512xf32, #tpu.memory_space<vmem>>, vector<128x512xf32>
    %cst_22 = arith.constant dense<0.000000e+00> : vector<8x512xf32>
    %58 = tpu.matmul %49, %57, %cst_22 {dimension_numbers = #tpu.dot_dimension_numbers<[1], [0], [0], [1], [0, 0, 1, 1], [], []>} : vector<8x128xf32>, vector<128x512xf32>, vector<8x512xf32> -> vector<8x512xf32>
    %59 = arith.addf %56, %58 : vector<8x512xf32>
    %60 = vector.extract_strided_slice %59 {offsets = [0, 0], sizes = [8, 384], strides = [1, 1]} : vector<8x512xf32> to vector<8x384xf32>
    %61 = arith.negf %60 : vector<8x384xf32>
    %62 = math.exp %61 : vector<8x384xf32>
    %cst_23 = arith.constant 1.000000e+00 : f32
    %63 = vector.broadcast %cst_23 : f32 to vector<8x384xf32>
    %64 = arith.addf %63, %62 : vector<8x384xf32>
    %65 = arith.divf %63, %64 : vector<8x384xf32>
    %66 = vector.extract_strided_slice %59 {offsets = [0, 384], sizes = [8, 128], strides = [1, 1]} : vector<8x512xf32> to vector<8x128xf32>
    %67 = math.tanh %66 : vector<8x128xf32>
    %68 = vector.extract_strided_slice %65 {offsets = [0, 0], sizes = [8, 128], strides = [1, 1]} : vector<8x384xf32> to vector<8x128xf32>
    %69 = vector.extract_strided_slice %65 {offsets = [0, 128], sizes = [8, 128], strides = [1, 1]} : vector<8x384xf32> to vector<8x128xf32>
    %70 = vector.extract_strided_slice %65 {offsets = [0, 256], sizes = [8, 128], strides = [1, 1]} : vector<8x384xf32> to vector<8x128xf32>
    %71 = arith.mulf %69, %47 : vector<8x128xf32>
    %72 = arith.mulf %68, %67 : vector<8x128xf32>
    %73 = arith.addf %71, %72 : vector<8x128xf32>
    %74 = math.tanh %73 : vector<8x128xf32>
    %75 = arith.mulf %70, %74 : vector<8x128xf32>
    %76 = arith.index_cast %c2_i32 : i32 to index
    %c0_24 = arith.constant 0 : index
    %c0_25 = arith.constant 0 : index
    %77 = vector.load %arg4[%76, %c0_24, %c0_25] : memref<8x8x128xf32, #tpu.memory_space<vmem>>, vector<1x8x128xf32>
    %78 = vector.shape_cast %77 : vector<1x8x128xf32> to vector<8x128xf32>
    %79 = vector.shape_cast %75 : vector<8x128xf32> to vector<1x8x128xf32>
    tpu.vector_store %arg4[%76, %c0_24, %c0_25], %79 {strides = array<i32>} : memref<8x8x128xf32, #tpu.memory_space<vmem>>, vector<1x8x128xf32>,
    %c3_i32 = arith.constant 3 : i32
    %80 = arith.index_cast %c3_i32 : i32 to index
    %c0_26 = arith.constant 0 : index
    %c0_27 = arith.constant 0 : index
    %81 = vector.load %arg0[%80, %c0_26, %c0_27] : memref<8x8x512xf32, #tpu.memory_space<vmem>>, vector<1x8x512xf32>
    %82 = vector.shape_cast %81 : vector<1x8x512xf32> to vector<8x512xf32>
    %c0_28 = arith.constant 0 : index
    %c0_29 = arith.constant 0 : index
    %83 = vector.load %arg3[%c0_28, %c0_29] : memref<128x512xf32, #tpu.memory_space<vmem>>, vector<128x512xf32>
    %cst_30 = arith.constant dense<0.000000e+00> : vector<8x512xf32>
    %84 = tpu.matmul %75, %83, %cst_30 {dimension_numbers = #tpu.dot_dimension_numbers<[1], [0], [0], [1], [0, 0, 1, 1], [], []>} : vector<8x128xf32>, vector<128x512xf32>, vector<8x512xf32> -> vector<8x512xf32>
    %85 = arith.addf %82, %84 : vector<8x512xf32>
    %86 = vector.extract_strided_slice %85 {offsets = [0, 0], sizes = [8, 384], strides = [1, 1]} : vector<8x512xf32> to vector<8x384xf32>
    %87 = arith.negf %86 : vector<8x384xf32>
    %88 = math.exp %87 : vector<8x384xf32>
    %cst_31 = arith.constant 1.000000e+00 : f32
    %89 = vector.broadcast %cst_31 : f32 to vector<8x384xf32>
    %90 = arith.addf %89, %88 : vector<8x384xf32>
    %91 = arith.divf %89, %90 : vector<8x384xf32>
    %92 = vector.extract_strided_slice %85 {offsets = [0, 384], sizes = [8, 128], strides = [1, 1]} : vector<8x512xf32> to vector<8x128xf32>
    %93 = math.tanh %92 : vector<8x128xf32>
    %94 = vector.extract_strided_slice %91 {offsets = [0, 0], sizes = [8, 128], strides = [1, 1]} : vector<8x384xf32> to vector<8x128xf32>
    %95 = vector.extract_strided_slice %91 {offsets = [0, 128], sizes = [8, 128], strides = [1, 1]} : vector<8x384xf32> to vector<8x128xf32>
    %96 = vector.extract_strided_slice %91 {offsets = [0, 256], sizes = [8, 128], strides = [1, 1]} : vector<8x384xf32> to vector<8x128xf32>
    %97 = arith.mulf %95, %73 : vector<8x128xf32>
    %98 = arith.mulf %94, %93 : vector<8x128xf32>
    %99 = arith.addf %97, %98 : vector<8x128xf32>
    %100 = math.tanh %99 : vector<8x128xf32>
    %101 = arith.mulf %96, %100 : vector<8x128xf32>
    %102 = arith.index_cast %c3_i32 : i32 to index
    %c0_32 = arith.constant 0 : index
    %c0_33 = arith.constant 0 : index
    %103 = vector.load %arg4[%102, %c0_32, %c0_33] : memref<8x8x128xf32, #tpu.memory_space<vmem>>, vector<1x8x128xf32>
    %104 = vector.shape_cast %103 : vector<1x8x128xf32> to vector<8x128xf32>
    %105 = vector.shape_cast %101 : vector<8x128xf32> to vector<1x8x128xf32>
    tpu.vector_store %arg4[%102, %c0_32, %c0_33], %105 {strides = array<i32>} : memref<8x8x128xf32, #tpu.memory_space<vmem>>, vector<1x8x128xf32>,
    %c4_i32 = arith.constant 4 : i32
    %106 = arith.index_cast %c4_i32 : i32 to index
    %c0_34 = arith.constant 0 : index
    %c0_35 = arith.constant 0 : index
    %107 = vector.load %arg0[%106, %c0_34, %c0_35] : memref<8x8x512xf32, #tpu.memory_space<vmem>>, vector<1x8x512xf32>
    %108 = vector.shape_cast %107 : vector<1x8x512xf32> to vector<8x512xf32>
    %c0_36 = arith.constant 0 : index
    %c0_37 = arith.constant 0 : index
    %109 = vector.load %arg3[%c0_36, %c0_37] : memref<128x512xf32, #tpu.memory_space<vmem>>, vector<128x512xf32>
    %cst_38 = arith.constant dense<0.000000e+00> : vector<8x512xf32>
    %110 = tpu.matmul %101, %109, %cst_38 {dimension_numbers = #tpu.dot_dimension_numbers<[1], [0], [0], [1], [0, 0, 1, 1], [], []>} : vector<8x128xf32>, vector<128x512xf32>, vector<8x512xf32> -> vector<8x512xf32>
    %111 = arith.addf %108, %110 : vector<8x512xf32>
    %112 = vector.extract_strided_slice %111 {offsets = [0, 0], sizes = [8, 384], strides = [1, 1]} : vector<8x512xf32> to vector<8x384xf32>
    %113 = arith.negf %112 : vector<8x384xf32>
    %114 = math.exp %113 : vector<8x384xf32>
    %cst_39 = arith.constant 1.000000e+00 : f32
    %115 = vector.broadcast %cst_39 : f32 to vector<8x384xf32>
    %116 = arith.addf %115, %114 : vector<8x384xf32>
    %117 = arith.divf %115, %116 : vector<8x384xf32>
    %118 = vector.extract_strided_slice %111 {offsets = [0, 384], sizes = [8, 128], strides = [1, 1]} : vector<8x512xf32> to vector<8x128xf32>
    %119 = math.tanh %118 : vector<8x128xf32>
    %120 = vector.extract_strided_slice %117 {offsets = [0, 0], sizes = [8, 128], strides = [1, 1]} : vector<8x384xf32> to vector<8x128xf32>
    %121 = vector.extract_strided_slice %117 {offsets = [0, 128], sizes = [8, 128], strides = [1, 1]} : vector<8x384xf32> to vector<8x128xf32>
    %122 = vector.extract_strided_slice %117 {offsets = [0, 256], sizes = [8, 128], strides = [1, 1]} : vector<8x384xf32> to vector<8x128xf32>
    %123 = arith.mulf %121, %99 : vector<8x128xf32>
    %124 = arith.mulf %120, %119 : vector<8x128xf32>
    %125 = arith.addf %123, %124 : vector<8x128xf32>
    %126 = math.tanh %125 : vector<8x128xf32>
    %127 = arith.mulf %122, %126 : vector<8x128xf32>
    %128 = arith.index_cast %c4_i32 : i32 to index
    %c0_40 = arith.constant 0 : index
    %c0_41 = arith.constant 0 : index
    %129 = vector.load %arg4[%128, %c0_40, %c0_41] : memref<8x8x128xf32, #tpu.memory_space<vmem>>, vector<1x8x128xf32>
    %130 = vector.shape_cast %129 : vector<1x8x128xf32> to vector<8x128xf32>
    %131 = vector.shape_cast %127 : vector<8x128xf32> to vector<1x8x128xf32>
    tpu.vector_store %arg4[%128, %c0_40, %c0_41], %131 {strides = array<i32>} : memref<8x8x128xf32, #tpu.memory_space<vmem>>, vector<1x8x128xf32>,
    %c5_i32 = arith.constant 5 : i32
    %132 = arith.index_cast %c5_i32 : i32 to index
    %c0_42 = arith.constant 0 : index
    %c0_43 = arith.constant 0 : index
    %133 = vector.load %arg0[%132, %c0_42, %c0_43] : memref<8x8x512xf32, #tpu.memory_space<vmem>>, vector<1x8x512xf32>
    %134 = vector.shape_cast %133 : vector<1x8x512xf32> to vector<8x512xf32>
    %c0_44 = arith.constant 0 : index
    %c0_45 = arith.constant 0 : index
    %135 = vector.load %arg3[%c0_44, %c0_45] : memref<128x512xf32, #tpu.memory_space<vmem>>, vector<128x512xf32>
    %cst_46 = arith.constant dense<0.000000e+00> : vector<8x512xf32>
    %136 = tpu.matmul %127, %135, %cst_46 {dimension_numbers = #tpu.dot_dimension_numbers<[1], [0], [0], [1], [0, 0, 1, 1], [], []>} : vector<8x128xf32>, vector<128x512xf32>, vector<8x512xf32> -> vector<8x512xf32>
    %137 = arith.addf %134, %136 : vector<8x512xf32>
    %138 = vector.extract_strided_slice %137 {offsets = [0, 0], sizes = [8, 384], strides = [1, 1]} : vector<8x512xf32> to vector<8x384xf32>
    %139 = arith.negf %138 : vector<8x384xf32>
    %140 = math.exp %139 : vector<8x384xf32>
    %cst_47 = arith.constant 1.000000e+00 : f32
    %141 = vector.broadcast %cst_47 : f32 to vector<8x384xf32>
    %142 = arith.addf %141, %140 : vector<8x384xf32>
    %143 = arith.divf %141, %142 : vector<8x384xf32>
    %144 = vector.extract_strided_slice %137 {offsets = [0, 384], sizes = [8, 128], strides = [1, 1]} : vector<8x512xf32> to vector<8x128xf32>
    %145 = math.tanh %144 : vector<8x128xf32>
    %146 = vector.extract_strided_slice %143 {offsets = [0, 0], sizes = [8, 128], strides = [1, 1]} : vector<8x384xf32> to vector<8x128xf32>
    %147 = vector.extract_strided_slice %143 {offsets = [0, 128], sizes = [8, 128], strides = [1, 1]} : vector<8x384xf32> to vector<8x128xf32>
    %148 = vector.extract_strided_slice %143 {offsets = [0, 256], sizes = [8, 128], strides = [1, 1]} : vector<8x384xf32> to vector<8x128xf32>
    %149 = arith.mulf %147, %125 : vector<8x128xf32>
    %150 = arith.mulf %146, %145 : vector<8x128xf32>
    %151 = arith.addf %149, %150 : vector<8x128xf32>
    %152 = math.tanh %151 : vector<8x128xf32>
    %153 = arith.mulf %148, %152 : vector<8x128xf32>
    %154 = arith.index_cast %c5_i32 : i32 to index
    %c0_48 = arith.constant 0 : index
    %c0_49 = arith.constant 0 : index
    %155 = vector.load %arg4[%154, %c0_48, %c0_49] : memref<8x8x128xf32, #tpu.memory_space<vmem>>, vector<1x8x128xf32>
    %156 = vector.shape_cast %155 : vector<1x8x128xf32> to vector<8x128xf32>
    %157 = vector.shape_cast %153 : vector<8x128xf32> to vector<1x8x128xf32>
    tpu.vector_store %arg4[%154, %c0_48, %c0_49], %157 {strides = array<i32>} : memref<8x8x128xf32, #tpu.memory_space<vmem>>, vector<1x8x128xf32>,
    %c6_i32 = arith.constant 6 : i32
    %158 = arith.index_cast %c6_i32 : i32 to index
    %c0_50 = arith.constant 0 : index
    %c0_51 = arith.constant 0 : index
    %159 = vector.load %arg0[%158, %c0_50, %c0_51] : memref<8x8x512xf32, #tpu.memory_space<vmem>>, vector<1x8x512xf32>
    %160 = vector.shape_cast %159 : vector<1x8x512xf32> to vector<8x512xf32>
    %c0_52 = arith.constant 0 : index
    %c0_53 = arith.constant 0 : index
    %161 = vector.load %arg3[%c0_52, %c0_53] : memref<128x512xf32, #tpu.memory_space<vmem>>, vector<128x512xf32>
    %cst_54 = arith.constant dense<0.000000e+00> : vector<8x512xf32>
    %162 = tpu.matmul %153, %161, %cst_54 {dimension_numbers = #tpu.dot_dimension_numbers<[1], [0], [0], [1], [0, 0, 1, 1], [], []>} : vector<8x128xf32>, vector<128x512xf32>, vector<8x512xf32> -> vector<8x512xf32>
    %163 = arith.addf %160, %162 : vector<8x512xf32>
    %164 = vector.extract_strided_slice %163 {offsets = [0, 0], sizes = [8, 384], strides = [1, 1]} : vector<8x512xf32> to vector<8x384xf32>
    %165 = arith.negf %164 : vector<8x384xf32>
    %166 = math.exp %165 : vector<8x384xf32>
    %cst_55 = arith.constant 1.000000e+00 : f32
    %167 = vector.broadcast %cst_55 : f32 to vector<8x384xf32>
    %168 = arith.addf %167, %166 : vector<8x384xf32>
    %169 = arith.divf %167, %168 : vector<8x384xf32>
    %170 = vector.extract_strided_slice %163 {offsets = [0, 384], sizes = [8, 128], strides = [1, 1]} : vector<8x512xf32> to vector<8x128xf32>
    %171 = math.tanh %170 : vector<8x128xf32>
    %172 = vector.extract_strided_slice %169 {offsets = [0, 0], sizes = [8, 128], strides = [1, 1]} : vector<8x384xf32> to vector<8x128xf32>
    %173 = vector.extract_strided_slice %169 {offsets = [0, 128], sizes = [8, 128], strides = [1, 1]} : vector<8x384xf32> to vector<8x128xf32>
    %174 = vector.extract_strided_slice %169 {offsets = [0, 256], sizes = [8, 128], strides = [1, 1]} : vector<8x384xf32> to vector<8x128xf32>
    %175 = arith.mulf %173, %151 : vector<8x128xf32>
    %176 = arith.mulf %172, %171 : vector<8x128xf32>
    %177 = arith.addf %175, %176 : vector<8x128xf32>
    %178 = math.tanh %177 : vector<8x128xf32>
    %179 = arith.mulf %174, %178 : vector<8x128xf32>
    %180 = arith.index_cast %c6_i32 : i32 to index
    %c0_56 = arith.constant 0 : index
    %c0_57 = arith.constant 0 : index
    %181 = vector.load %arg4[%180, %c0_56, %c0_57] : memref<8x8x128xf32, #tpu.memory_space<vmem>>, vector<1x8x128xf32>
    %182 = vector.shape_cast %181 : vector<1x8x128xf32> to vector<8x128xf32>
    %183 = vector.shape_cast %179 : vector<8x128xf32> to vector<1x8x128xf32>
    tpu.vector_store %arg4[%180, %c0_56, %c0_57], %183 {strides = array<i32>} : memref<8x8x128xf32, #tpu.memory_space<vmem>>, vector<1x8x128xf32>,
    %c7_i32 = arith.constant 7 : i32
    %184 = arith.index_cast %c7_i32 : i32 to index
    %c0_58 = arith.constant 0 : index
    %c0_59 = arith.constant 0 : index
    %185 = vector.load %arg0[%184, %c0_58, %c0_59] : memref<8x8x512xf32, #tpu.memory_space<vmem>>, vector<1x8x512xf32>
    %186 = vector.shape_cast %185 : vector<1x8x512xf32> to vector<8x512xf32>
    %c0_60 = arith.constant 0 : index
    %c0_61 = arith.constant 0 : index
    %187 = vector.load %arg3[%c0_60, %c0_61] : memref<128x512xf32, #tpu.memory_space<vmem>>, vector<128x512xf32>
    %cst_62 = arith.constant dense<0.000000e+00> : vector<8x512xf32>
    %188 = tpu.matmul %179, %187, %cst_62 {dimension_numbers = #tpu.dot_dimension_numbers<[1], [0], [0], [1], [0, 0, 1, 1], [], []>} : vector<8x128xf32>, vector<128x512xf32>, vector<8x512xf32> -> vector<8x512xf32>
    %189 = arith.addf %186, %188 : vector<8x512xf32>
    %190 = vector.extract_strided_slice %189 {offsets = [0, 0], sizes = [8, 384], strides = [1, 1]} : vector<8x512xf32> to vector<8x384xf32>
    %191 = arith.negf %190 : vector<8x384xf32>
    %192 = math.exp %191 : vector<8x384xf32>
    %cst_63 = arith.constant 1.000000e+00 : f32
    %193 = vector.broadcast %cst_63 : f32 to vector<8x384xf32>
    %194 = arith.addf %193, %192 : vector<8x384xf32>
    %195 = arith.divf %193, %194 : vector<8x384xf32>
    %196 = vector.extract_strided_slice %189 {offsets = [0, 384], sizes = [8, 128], strides = [1, 1]} : vector<8x512xf32> to vector<8x128xf32>
    %197 = math.tanh %196 : vector<8x128xf32>
    %198 = vector.extract_strided_slice %195 {offsets = [0, 0], sizes = [8, 128], strides = [1, 1]} : vector<8x384xf32> to vector<8x128xf32>
    %199 = vector.extract_strided_slice %195 {offsets = [0, 128], sizes = [8, 128], strides = [1, 1]} : vector<8x384xf32> to vector<8x128xf32>
    %200 = vector.extract_strided_slice %195 {offsets = [0, 256], sizes = [8, 128], strides = [1, 1]} : vector<8x384xf32> to vector<8x128xf32>
    %201 = arith.mulf %199, %177 : vector<8x128xf32>
    %202 = arith.mulf %198, %197 : vector<8x128xf32>
    %203 = arith.addf %201, %202 : vector<8x128xf32>
    %204 = math.tanh %203 : vector<8x128xf32>
    %205 = arith.mulf %200, %204 : vector<8x128xf32>
    %206 = arith.index_cast %c7_i32 : i32 to index
    %c0_64 = arith.constant 0 : index
    %c0_65 = arith.constant 0 : index
    %207 = vector.load %arg4[%206, %c0_64, %c0_65] : memref<8x8x128xf32, #tpu.memory_space<vmem>>, vector<1x8x128xf32>
    %208 = vector.shape_cast %207 : vector<1x8x128xf32> to vector<8x128xf32>
    %209 = vector.shape_cast %205 : vector<8x128xf32> to vector<1x8x128xf32>
    tpu.vector_store %arg4[%206, %c0_64, %c0_65], %209 {strides = array<i32>} : memref<8x8x128xf32, #tpu.memory_space<vmem>>, vector<1x8x128xf32>,
    %c8_i32 = arith.constant 8 : i32
    return
  }
}

module attributes {stable_mosaic.version = 11 : i64} {
  func.func @dense_kernel(%arg0: memref<64x128xf32, #tpu.memory_space<vmem>>, %arg1: memref<128x128xf32, #tpu.memory_space<vmem>>, %arg2: memref<1x128xf32, #tpu.memory_space<vmem>>, %arg3: memref<64x128xf32, #tpu.memory_space<vmem>>) attributes {dimension_semantics = [], scalar_prefetch = 0 : i64, scratch_operands = 0 : i64, tpu.core_type = #tpu.core_type<tc>} {
    %c0 = arith.constant 0 : index
    %c0_0 = arith.constant 0 : index
    %0 = vector.load %arg0[%c0, %c0_0] : memref<64x128xf32, #tpu.memory_space<vmem>>, vector<64x128xf32>
    %c0_1 = arith.constant 0 : index
    %c0_2 = arith.constant 0 : index
    %1 = vector.load %arg1[%c0_1, %c0_2] : memref<128x128xf32, #tpu.memory_space<vmem>>, vector<128x128xf32>
    %cst = arith.constant dense<0.000000e+00> : vector<64x128xf32>
    %2 = tpu.matmul %0, %1, %cst {dimension_numbers = #tpu.dot_dimension_numbers<[1], [0], [0], [1], [0, 0, 1, 1], [], []>} : vector<64x128xf32>, vector<128x128xf32>, vector<64x128xf32> -> vector<64x128xf32>
    %c0_3 = arith.constant 0 : index
    %c0_4 = arith.constant 0 : index
    %3 = vector.load %arg2[%c0_3, %c0_4] : memref<1x128xf32, #tpu.memory_space<vmem>>, vector<1x128xf32>
    %4 = vector.broadcast %3 : vector<1x128xf32> to vector<64x128xf32>
    %5 = arith.addf %2, %4 : vector<64x128xf32>
    %c0_5 = arith.constant 0 : index
    %c0_6 = arith.constant 0 : index
    %6 = vector.load %arg3[%c0_5, %c0_6] : memref<64x128xf32, #tpu.memory_space<vmem>>, vector<64x128xf32>
    tpu.vector_store %arg3[%c0_5, %c0_6], %5 {strides = array<i32>} : memref<64x128xf32, #tpu.memory_space<vmem>>, vector<64x128xf32>,
    return
  }
}

</mosaic_0001>

<bundles_post_ra>
// kernel: seq2seq_forward.5
= control target key start
LH: loop header
LB: loop body
LE: loop exit
PB: predicated region body
PF: predicated region fallthrough
CT: control target
= control target key end

     0   :  { %v364_v3 = vmov 0.0   ;;  %vm60_vm0 = vcmask 261120   ;;  %v40_v25 = vlaneseq  ;;  %s628_s1 = inlined_call_operand.vmem [shape: f32[32,512], index: 1, kind: input, shape index: {}]   ;;  %s629_s0 = inlined_call_operand.vmem [shape: f32[64,32], index: 0, kind: input, shape index: {}]   ;;  %s630_s2 = inlined_call_operand.vmem [shape: f32[1,512], index: 2, kind: input, shape index: {}]   ;;  %s631_s3 = inlined_call_operand.vmem [shape: f32[64,512], index: 3, kind: output, shape index: {}]  }
   0x1   :  { %v35_v0 = vld [vmem:[%s628_s1 + $0x68] sm:$0xff]  ;;  %v37_v1 = vld [vmem:[%s628_s1 + $0x78] sm:$0xff]  ;;  %v34_v2 = vld [vmem:[%s628_s1 + $0x60] sm:$0xff]  ;;  %149 = vmatprep.mubr.f32.mxu0 %v364_v3  ;;  %262 = vmatprep.mubr.f32.mxu1 %v364_v3 }
   0x2   :  { %109 = vmatprep.subr.mxu0 %v35_v0  ;;  %222 = vmatprep.subr.mxu1 %v37_v1  ;;  %v36_v4 = vld [vmem:[%s628_s1 + $0x70] sm:$0xff]  ;;  %v31_v5 = vld [vmem:[%s628_s1 + $0x48] sm:$0xff]  ;;  %v33_v6 = vld [vmem:[%s628_s1 + $0x58] sm:$0xff]  ;;  %v41_v26 = vshrl.u32 %v40_v25, 7 }
   0x3   :  { %110 = vmatpush1.msra.mxu0 %v34_v2  ;;  %223 = vmatpush1.msra.mxu1 %v36_v4  ;;  %v30_v7 = vld [vmem:[%s628_s1 + $0x40] sm:$0xff]  ;;  %v32_v8 = vld [vmem:[%s628_s1 + $0x50] sm:$0xff]  ;;  %v27_v9 = vld [vmem:[%s628_s1 + $0x28] sm:$0xff] }
   0x4   :  { %111 = vmatprep.subr.mxu0 %v31_v5  ;;  %224 = vmatprep.subr.mxu1 %v33_v6  ;;  %v29_v10 = vld [vmem:[%s628_s1 + $0x38] sm:$0xff]  ;;  %v26_v11 = vld [vmem:[%s628_s1 + $0x20] sm:$0xff]  ;;  %v28_v12 = vld [vmem:[%s628_s1 + $0x30] sm:$0xff]  ;;  %v42_v27 = vsub.s32 0, %v41_v26  ;;  %v50_v28 = vsub.s32 2, %v41_v26  ;;  %v46_v30 = vsub.s32 1, %v41_v26 }
   0x5   :  { %112 = vmatpush1.msra.mxu0 %v30_v7  ;;  %225 = vmatpush1.msra.mxu1 %v32_v8  ;;  %v23_v13 = vld [vmem:[%s628_s1 + $0x8] sm:$0xff]  ;;  %v25_v14 = vld [vmem:[%s628_s1 + $0x18] sm:$0xff]  ;;  %v22_v15 = vld [vmem:[%s628_s1] sm:$0xff]  ;;  %v54_v31 = vsub.s32 3, %v41_v26 }
   0x6   :  { %113 = vmatprep.subr.mxu0 %v27_v9  ;;  %226 = vmatprep.subr.mxu1 %v29_v10  ;;  %v24_v16 = vld [vmem:[%s628_s1 + $0x10] sm:$0xff]  ;;  %v14_v17 = vld [vmem:[%s629_s0] sm:$0xff]  ;;  %v15_v18 = vld [vmem:[%s629_s0 + $0x8] sm:$0xff] }
   0x7   :  { %114 = vmatpush1.msra.mxu0 %v26_v11  ;;  %227 = vmatpush1.msra.mxu1 %v28_v12  ;;  %v16_v19 = vld [vmem:[%s629_s0 + $0x10] sm:$0xff]  ;;  %v17_v20 = vld [vmem:[%s629_s0 + $0x18] sm:$0xff]  ;;  %v18_v21 = vld [vmem:[%s629_s0 + $0x20] sm:$0xff] }
   0x8   :  { %115 = vmatprep.subr.mxu0 %v23_v13  ;;  %228 = vmatprep.subr.mxu1 %v25_v14  ;;  %v19_v22 = vld [vmem:[%s629_s0 + $0x28] sm:$0xff]  ;;  %v20_v23 = vld [vmem:[%s629_s0 + $0x30] sm:$0xff]  ;;  %v21_v24 = vld [vmem:[%s629_s0 + $0x38] sm:$0xff] }
   0x9   :  { %116 = vmatpush1.msra.mxu0 %v22_v15  ;;  %229 = vmatpush1.msra.mxu1 %v24_v16  ;;  %v38_v29 = vld [vmem:[%s630_s2] sm:$0xf] }
   0xa   :  { %347 = vmatmul.mubr.msk.f32.vlgmr.msra.gmra.mxu0 %vm60_vm0, %v14_v17  ;;  %355 = vmatmul.mubr.msk.f32.vlgmr.msra.gmra.mxu1 %vm60_vm0, %v14_v17  ;;  %v492_v32 = vrot.slane %v38_v29, %v42_v27  ;;  %v494_v33 = vrot.slane %v38_v29, %v50_v28  ;;  %v496_v34 = vrot.slane %v38_v29, %v46_v30 }
   0xb   :  { %155 = vmatprep.mubr.f32.mxu0 %v364_v3  ;;  %268 = vmatprep.mubr.f32.mxu1 %v364_v3  ;;  %v498_v35 = vrot.slane %v38_v29, %v54_v31 }
   0xe   :  { %348 = vmatmul.mubr.msk.f32.gmra.mxu0 %vm60_vm0, %v15_v18  ;;  %356 = vmatmul.mubr.msk.f32.gmra.mxu1 %vm60_vm0, %v15_v18 }
   0xf   :  { %161 = vmatprep.mubr.f32.mxu0 %v364_v3  ;;  %274 = vmatprep.mubr.f32.mxu1 %v364_v3 }
  0x12   :  { %349 = vmatmul.mubr.msk.f32.gmra.mxu0 %vm60_vm0, %v16_v19  ;;  %357 = vmatmul.mubr.msk.f32.gmra.mxu1 %vm60_vm0, %v16_v19 }
  0x13   :  { %167 = vmatprep.mubr.f32.mxu0 %v364_v3  ;;  %280 = vmatprep.mubr.f32.mxu1 %v364_v3 }
  0x16   :  { %350 = vmatmul.mubr.msk.f32.gmra.mxu0 %vm60_vm0, %v17_v20  ;;  %358 = vmatmul.mubr.msk.f32.gmra.mxu1 %vm60_vm0, %v17_v20 }
  0x17   :  { %173 = vmatprep.mubr.f32.mxu0 %v364_v3  ;;  %286 = vmatprep.mubr.f32.mxu1 %v364_v3 }
  0x1a   :  { %351 = vmatmul.mubr.msk.f32.gmra.mxu0 %vm60_vm0, %v18_v21  ;;  %359 = vmatmul.mubr.msk.f32.gmra.mxu1 %vm60_vm0, %v18_v21 }
  0x1b   :  { %179 = vmatprep.mubr.f32.mxu0 %v364_v3  ;;  %292 = vmatprep.mubr.f32.mxu1 %v364_v3 }
  0x1e   :  { %352 = vmatmul.mubr.msk.f32.gmra.mxu0 %vm60_vm0, %v19_v22  ;;  %360 = vmatmul.mubr.msk.f32.gmra.mxu1 %vm60_vm0, %v19_v22 }
  0x1f   :  { %185 = vmatprep.mubr.f32.mxu0 %v364_v3  ;;  %298 = vmatprep.mubr.f32.mxu1 %v364_v3 }
  0x22   :  { %353 = vmatmul.mubr.msk.f32.gmra.mxu0 %vm60_vm0, %v20_v23  ;;  %361 = vmatmul.mubr.msk.f32.gmra.mxu1 %vm60_vm0, %v20_v23 }
  0x23   :  { %191 = vmatprep.mubr.f32.mxu0 %v364_v3  ;;  %304 = vmatprep.mubr.f32.mxu1 %v364_v3 }
  0x26   :  { %354 = vmatmul.mubr.msk.f32.gmra.mxu0 %vm60_vm0, %v21_v24  ;;  %362 = vmatmul.mubr.msk.f32.gmra.mxu1 %vm60_vm0, %v21_v24 }
  0xca   :  { %v151_v36 = vpop.f32.mrf.mxu0  ;;  %v264_v37 = vpop.f32.mrf.mxu1 }
  0xcb   :  { %v152_v38 = vadd.f32 %v151_v36, %v492_v32  ;;  %v265_v39 = vadd.f32 %v264_v37, %v494_v33 }
  0xcc   :  { %v153_v40 = vpop.f32.mrf.mxu0  ;;  %v266_v41 = vpop.f32.mrf.mxu1 }
  0xcd   :  { %311 = vst [vmem:[%s631_s3] sm:$0xff] %v152_v38  ;;  %313 = vst [vmem:[%s631_s3 + $0x10] sm:$0xff] %v265_v39  ;;  %v154_v42 = vadd.f32 %v153_v40, %v496_v34  ;;  %v267_v43 = vadd.f32 %v266_v41, %v498_v35 }
  0xce   :  { %v157_v44 = vpop.f32.mrf.mxu0  ;;  %v270_v45 = vpop.f32.mrf.mxu1 }
  0xcf   :  { %312 = vst [vmem:[%s631_s3 + $0x8] sm:$0xff] %v154_v42  ;;  %314 = vst [vmem:[%s631_s3 + $0x18] sm:$0xff] %v267_v43  ;;  %v158_v46 = vadd.f32 %v157_v44, %v492_v32  ;;  %v271_v47 = vadd.f32 %v270_v45, %v494_v33 }
  0xd0   :  { %v159_v48 = vpop.f32.mrf.mxu0  ;;  %v272_v49 = vpop.f32.mrf.mxu1 }
  0xd1   :  { %315 = vst [vmem:[%s631_s3 + $0x20] sm:$0xff] %v158_v46  ;;  %317 = vst [vmem:[%s631_s3 + $0x30] sm:$0xff] %v271_v47  ;;  %v160_v50 = vadd.f32 %v159_v48, %v496_v34  ;;  %v273_v51 = vadd.f32 %v272_v49, %v498_v35 }
  0xd2   :  { %v163_v52 = vpop.f32.mrf.mxu0  ;;  %v276_v53 = vpop.f32.mrf.mxu1 }
  0xd3   :  { %316 = vst [vmem:[%s631_s3 + $0x28] sm:$0xff] %v160_v50  ;;  %318 = vst [vmem:[%s631_s3 + $0x38] sm:$0xff] %v273_v51  ;;  %v164_v54 = vadd.f32 %v163_v52, %v492_v32  ;;  %v277_v55 = vadd.f32 %v276_v53, %v494_v33 }
  0xd4   :  { %v165_v56 = vpop.f32.mrf.mxu0  ;;  %v278_v57 = vpop.f32.mrf.mxu1 }
  0xd5   :  { %319 = vst [vmem:[%s631_s3 + $0x40] sm:$0xff] %v164_v54  ;;  %321 = vst [vmem:[%s631_s3 + $0x50] sm:$0xff] %v277_v55  ;;  %v166_v58 = vadd.f32 %v165_v56, %v496_v34  ;;  %v279_v59 = vadd.f32 %v278_v57, %v498_v35 }
  0xd6   :  { %v169_v60 = vpop.f32.mrf.mxu0  ;;  %v282_v61 = vpop.f32.mrf.mxu1 }
  0xd7   :  { %320 = vst [vmem:[%s631_s3 + $0x48] sm:$0xff] %v166_v58  ;;  %322 = vst [vmem:[%s631_s3 + $0x58] sm:$0xff] %v279_v59  ;;  %v170_v62 = vadd.f32 %v169_v60, %v492_v32  ;;  %v283_v63 = vadd.f32 %v282_v61, %v494_v33 }
  0xd8   :  { %v171_v0 = vpop.f32.mrf.mxu0  ;;  %v284_v1 = vpop.f32.mrf.mxu1 }
  0xd9   :  { %323 = vst [vmem:[%s631_s3 + $0x60] sm:$0xff] %v170_v62  ;;  %325 = vst [vmem:[%s631_s3 + $0x70] sm:$0xff] %v283_v63  ;;  %v172_v2 = vadd.f32 %v171_v0, %v496_v34  ;;  %v285_v3 = vadd.f32 %v284_v1, %v498_v35 }
  0xda   :  { %v175_v4 = vpop.f32.mrf.mxu0  ;;  %v288_v5 = vpop.f32.mrf.mxu1 }
  0xdb   :  { %324 = vst [vmem:[%s631_s3 + $0x68] sm:$0xff] %v172_v2  ;;  %326 = vst [vmem:[%s631_s3 + $0x78] sm:$0xff] %v285_v3  ;;  %v176_v6 = vadd.f32 %v175_v4, %v492_v32  ;;  %v289_v7 = vadd.f32 %v288_v5, %v494_v33 }
  0xdc   :  { %v177_v8 = vpop.f32.mrf.mxu0  ;;  %v290_v9 = vpop.f32.mrf.mxu1 }
  0xdd   :  { %327 = vst [vmem:[%s631_s3 + $0x80] sm:$0xff] %v176_v6  ;;  %329 = vst [vmem:[%s631_s3 + $0x90] sm:$0xff] %v289_v7  ;;  %v178_v10 = vadd.f32 %v177_v8, %v496_v34  ;;  %v291_v11 = vadd.f32 %v290_v9, %v498_v35 }
  0xde   :  { %v181_v12 = vpop.f32.mrf.mxu0  ;;  %v294_v13 = vpop.f32.mrf.mxu1 }
  0xdf   :  { %328 = vst [vmem:[%s631_s3 + $0x88] sm:$0xff] %v178_v10  ;;  %330 = vst [vmem:[%s631_s3 + $0x98] sm:$0xff] %v291_v11  ;;  %v182_v14 = vadd.f32 %v181_v12, %v492_v32  ;;  %v295_v15 = vadd.f32 %v294_v13, %v494_v33 }
  0xe0   :  { %v183_v16 = vpop.f32.mrf.mxu0  ;;  %v296_v17 = vpop.f32.mrf.mxu1 }
  0xe1   :  { %331 = vst [vmem:[%s631_s3 + $0xa0] sm:$0xff] %v182_v14  ;;  %333 = vst [vmem:[%s631_s3 + $0xb0] sm:$0xff] %v295_v15  ;;  %v184_v18 = vadd.f32 %v183_v16, %v496_v34  ;;  %v297_v19 = vadd.f32 %v296_v17, %v498_v35 }
  0xe2   :  { %v187_v20 = vpop.f32.mrf.mxu0  ;;  %v300_v21 = vpop.f32.mrf.mxu1 }
  0xe3   :  { %332 = vst [vmem:[%s631_s3 + $0xa8] sm:$0xff] %v184_v18  ;;  %334 = vst [vmem:[%s631_s3 + $0xb8] sm:$0xff] %v297_v19  ;;  %v188_v22 = vadd.f32 %v187_v20, %v492_v32  ;;  %v301_v23 = vadd.f32 %v300_v21, %v494_v33 }
  0xe4   :  { %v189_v24 = vpop.f32.mrf.mxu0  ;;  %v302_v25 = vpop.f32.mrf.mxu1 }
  0xe5   :  { %335 = vst [vmem:[%s631_s3 + $0xc0] sm:$0xff] %v188_v22  ;;  %337 = vst [vmem:[%s631_s3 + $0xd0] sm:$0xff] %v301_v23  ;;  %v190_v26 = vadd.f32 %v189_v24, %v496_v34  ;;  %v303_v27 = vadd.f32 %v302_v25, %v498_v35 }
  0xe6   :  { %v193_v28 = vpop.f32.mrf.mxu0  ;;  %v306_v29 = vpop.f32.mrf.mxu1 }
  0xe7   :  { %336 = vst [vmem:[%s631_s3 + $0xc8] sm:$0xff] %v190_v26  ;;  %338 = vst [vmem:[%s631_s3 + $0xd8] sm:$0xff] %v303_v27  ;;  %v194_v30 = vadd.f32 %v193_v28, %v492_v32  ;;  %v307_v31 = vadd.f32 %v306_v29, %v494_v33 }
  0xe8   :  { %v195_v36 = vpop.f32.mrf.mxu0  ;;  %v308_v37 = vpop.f32.mrf.mxu1 }
  0xe9   :  { %339 = vst [vmem:[%s631_s3 + $0xe0] sm:$0xff] %v194_v30  ;;  %341 = vst [vmem:[%s631_s3 + $0xf0] sm:$0xff] %v307_v31  ;;  %v196_v38 = vadd.f32 %v195_v36, %v496_v34  ;;  %v309_v39 = vadd.f32 %v308_v37, %v498_v35 }
  0xeb   :  { %340 = vst [vmem:[%s631_s3 + $0xe8] sm:$0xff] %v196_v38  ;;  %342 = vst [vmem:[%s631_s3 + $0xf8] sm:$0xff] %v309_v39 }

// kernel: seq2seq_forward.9
= control target key start
LH: loop header
LB: loop body
LE: loop exit
PB: predicated region body
PF: predicated region fallthrough
CT: control target
= control target key end

     0   :  { %s402_s0 = inlined_call_operand.vmem [shape: f32[64,128], index: 0, kind: input, shape index: {}]   ;;  %s403_s1 = inlined_call_operand.vmem [shape: f32[128,128], index: 1, kind: input, shape index: {}]   ;;  %s404_s2 = inlined_call_operand.vmem [shape: f32[1,128], index: 2, kind: input, shape index: {}]   ;;  %s405_s3 = inlined_call_operand.hbm [shape: f32[64,128], index: 3, kind: output, shape index: {}]  }
   0x1   :  { %v38_v0 = vld [vmem:[%s403_s1 + $0x78] sm:$0xff]  ;;  %v37_v1 = vld [vmem:[%s403_s1 + $0x70] sm:$0xff]  ;;  %v36_v2 = vld [vmem:[%s403_s1 + $0x68] sm:$0xff] }
   0x2   :  { %200 = vmatprep.subr.mxu0 %v38_v0  ;;  %244 = vmatprep.subr.mxu1 %v38_v0  ;;  %v35_v3 = vld [vmem:[%s403_s1 + $0x60] sm:$0xff]  ;;  %v34_v4 = vld [vmem:[%s403_s1 + $0x58] sm:$0xff]  ;;  %v33_v5 = vld [vmem:[%s403_s1 + $0x50] sm:$0xff] }
   0x3   :  { %201 = vmatpush3.msra.mxu0 %v38_v0  ;;  %260 = vmatpush3.msra.mxu1 %v38_v0 }
   0x4   :  { %202 = vmatprep.subr.mxu0 %v37_v1  ;;  %245 = vmatprep.subr.mxu1 %v37_v1 }
   0x5   :  { %203 = vmatpush3.msra.mxu0 %v37_v1  ;;  %261 = vmatpush3.msra.mxu1 %v37_v1 }
   0x6   :  { %204 = vmatprep.subr.mxu0 %v36_v2  ;;  %246 = vmatprep.subr.mxu1 %v36_v2 }
   0x7   :  { %205 = vmatpush3.msra.mxu0 %v36_v2  ;;  %262 = vmatpush3.msra.mxu1 %v36_v2 }
   0x8   :  { %206 = vmatprep.subr.mxu0 %v35_v3  ;;  %247 = vmatprep.subr.mxu1 %v35_v3 }
   0x9   :  { %207 = vmatpush3.msra.mxu0 %v35_v3  ;;  %263 = vmatpush3.msra.mxu1 %v35_v3 }
   0xa   :  { %8 = vsyncpa [#allocation3], 0  ;;  %208 = vmatprep.subr.mxu0 %v34_v4  ;;  %248 = vmatprep.subr.mxu1 %v34_v4  ;;  %v32_v6 = vld [vmem:[%s403_s1 + $0x48] sm:$0xff]  ;;  %v31_v7 = vld [vmem:[%s403_s1 + $0x40] sm:$0xff]  ;;  %s301_s7 = smov [#allocation2]  }
   0xb   :  { %209 = vmatpush3.msra.mxu0 %v34_v4  ;;  %264 = vmatpush3.msra.mxu1 %v34_v4  ;;  %v30_v8 = vld [vmem:[%s403_s1 + $0x38] sm:$0xff]  ;;  %v29_v9 = vld [vmem:[%s403_s1 + $0x30] sm:$0xff]  ;;  %v28_v10 = vld [vmem:[%s403_s1 + $0x28] sm:$0xff]  ;;  %s164_s8 = sshll.u32 %s301_s7, 4  ;;  %s165_s8 = int_to_ptr.vmem [resolvable:$true] %s164_s8 }
   0xc   :  { %210 = vmatprep.subr.mxu0 %v33_v5  ;;  %249 = vmatprep.subr.mxu1 %v33_v5  ;;  %v27_v11 = vld [vmem:[%s403_s1 + $0x20] sm:$0xff]  ;;  %v26_v12 = vld [vmem:[%s403_s1 + $0x18] sm:$0xff]  ;;  %v25_v13 = vld [vmem:[%s403_s1 + $0x10] sm:$0xff]  ;;  %p284_p1 = scmp.lt.s32.totalorder %s165_s8, %s165_s8 }
   0xd   :  { %211 = vmatpush3.msra.mxu0 %v33_v5  ;;  %265 = vmatpush3.msra.mxu1 %v33_v5  ;;  %v24_v14 = vld [vmem:[%s403_s1 + $0x8] sm:$0xff]  ;;  %v23_v15 = vld [vmem:[%s403_s1] sm:$0xff]  ;;  %v17_v20 = vld [vmem:[%s402_s0 + $0x10] sm:$0xff] }
   0xe   :  { %212 = vmatprep.subr.mxu0 %v32_v6  ;;  %250 = vmatprep.subr.mxu1 %v32_v6  ;;  %v15_v16 = vld [vmem:[%s402_s0] sm:$0xff]  ;;  %v16_v18 = vld [vmem:[%s402_s0 + $0x8] sm:$0xff]  ;;  %v21_v21 = vld [vmem:[%s402_s0 + $0x30] sm:$0xff] }
   0xf   :  { %213 = vmatpush3.msra.mxu0 %v32_v6  ;;  %266 = vmatpush3.msra.mxu1 %v32_v6  ;;  %v19_v17 = vld [vmem:[%s402_s0 + $0x20] sm:$0xff]  ;;  %v20_v19 = vld [vmem:[%s402_s0 + $0x28] sm:$0xff]  ;;  %v18_v22 = vld [vmem:[%s402_s0 + $0x18] sm:$0xff] }
  0x10   :  { %214 = vmatprep.subr.mxu0 %v31_v7  ;;  %251 = vmatprep.subr.mxu1 %v31_v7  ;;  %v22_v23 = vld [vmem:[%s402_s0 + $0x38] sm:$0xff]  ;;  %v175_v24 = vld [vmem:[%s404_s2] ss:$0 sm:$0xff]  ;;  %s279_s0 = scalar_lea.vmem %s165_s8, 1024 }
  0x11   :  { %215 = vmatpush3.msra.mxu0 %v31_v7  ;;  %267 = vmatpush3.msra.mxu1 %v31_v7  ;;  %p280_p0 = scmp.ne.s32.totalorder %s165_s8, %s279_s0  ;;  %p285_p2 = scmp.lt.s32.totalorder %s279_s0, %s279_s0 }
  0x12   :  { %216 = vmatprep.subr.mxu0 %v30_v8  ;;  %252 = vmatprep.subr.mxu1 %v30_v8 }
  0x13   :  { %217 = vmatpush3.msra.mxu0 %v30_v8  ;;  %268 = vmatpush3.msra.mxu1 %v30_v8  ;;  %p286_p3 = por %p285_p2, %p284_p1 }
  0x14   :  { %218 = vmatprep.subr.mxu0 %v29_v9  ;;  %253 = vmatprep.subr.mxu1 %v29_v9 }
  0x15   :  { %219 = vmatpush3.msra.mxu0 %v29_v9  ;;  %269 = vmatpush3.msra.mxu1 %v29_v9  ;;  %p287_p4 = pnand %p286_p3, %p280_p0 }
  0x16   :  { %220 = vmatprep.subr.mxu0 %v28_v10  ;;  %254 = vmatprep.subr.mxu1 %v28_v10 }
  0x17   :  { %221 = vmatpush3.msra.mxu0 %v28_v10  ;;  %270 = vmatpush3.msra.mxu1 %v28_v10 }
  0x18   :  { %222 = vmatprep.subr.mxu0 %v27_v11  ;;  %255 = vmatprep.subr.mxu1 %v27_v11 }
  0x19   :  { %223 = vmatpush3.msra.mxu0 %v27_v11  ;;  %271 = vmatpush3.msra.mxu1 %v27_v11 }
  0x1a   :  { %224 = vmatprep.subr.mxu0 %v26_v12  ;;  %256 = vmatprep.subr.mxu1 %v26_v12 }
  0x1b   :  { %225 = vmatpush3.msra.mxu0 %v26_v12  ;;  %272 = vmatpush3.msra.mxu1 %v26_v12 }
  0x1c   :  { %226 = vmatprep.subr.mxu0 %v25_v13  ;;  %257 = vmatprep.subr.mxu1 %v25_v13 }
  0x1d   :  { %227 = vmatpush3.msra.mxu0 %v25_v13  ;;  %273 = vmatpush3.msra.mxu1 %v25_v13 }
  0x1e   :  { %228 = vmatprep.subr.mxu0 %v24_v14  ;;  %258 = vmatprep.subr.mxu1 %v24_v14 }
  0x1f   :  { %229 = vmatpush3.msra.mxu0 %v24_v14  ;;  %274 = vmatpush3.msra.mxu1 %v24_v14 }
  0x20   :  { %230 = vmatprep.subr.mxu0 %v23_v15  ;;  %259 = vmatprep.subr.mxu1 %v23_v15 }
  0x21   :  { %231 = vmatpush3.msra.mxu0 %v23_v15  ;;  %275 = vmatpush3.msra.mxu1 %v23_v15 }
  0x22   :  { %232 = vmatprep.mubr.f32.mxu0 %v15_v16  ;;  %238 = vmatprep.mubr.f32.mxu1 %v19_v17 }
  0x23   :  { %233 = vmatmul.mubr.f32.vlgmr.msra.gmra.mxu0 %v16_v18  ;;  %239 = vmatmul.mubr.f32.vlgmr.msra.gmra.mxu1 %v20_v19 }
  0x24   :  { %235 = vmatprep.mubr.f32.mxu0 %v17_v20  ;;  %241 = vmatprep.mubr.f32.mxu1 %v21_v21 }
  0x27   :  { %236 = vmatmul.mubr.f32.gmra.mxu0 %v18_v22  ;;  %242 = vmatmul.mubr.f32.gmra.mxu1 %v22_v23 }
  0xe3   :  { %v234_v25 = vpop.f32.mrf.mxu0  ;;  %v240_v26 = vpop.f32.mrf.mxu1 }
  0xe4   :  { %v118_v27 = vadd.f32 %v234_v25, %v175_v24  ;;  %v138_v28 = vadd.f32 %v240_v26, %v175_v24 }
  0xe5   :  { %v112_v29 = vpop.f32.mrf.mxu0  ;;  %v132_v30 = vpop.f32.mrf.mxu1 }
  0xe6   :  { %152 = vst [vmem:[#allocation2 + $0x8] sm:$0xff] %v118_v27  ;;  %156 = vst [vmem:[#allocation2 + $0x28] sm:$0xff] %v138_v28  ;;  %v113_v31 = vadd.f32 %v175_v24, %v112_v29  ;;  %v133_v32 = vadd.f32 %v175_v24, %v132_v30 }
  0xe7   :  { %v237_v33 = vpop.f32.mrf.mxu0  ;;  %v243_v34 = vpop.f32.mrf.mxu1 }
  0xe8   :  { %151 = vst [vmem:[#allocation2] sm:$0xff] %v113_v31  ;;  %155 = vst [vmem:[#allocation2 + $0x20] sm:$0xff] %v133_v32  ;;  %v128_v35 = vadd.f32 %v237_v33, %v175_v24  ;;  %v148_v36 = vadd.f32 %v243_v34, %v175_v24 }
  0xe9   :  { %v122_v37 = vpop.f32.mrf.mxu0  ;;  %v142_v38 = vpop.f32.mrf.mxu1 }
  0xea   :  { %154 = vst [vmem:[#allocation2 + $0x18] sm:$0xff] %v128_v35  ;;  %158 = vst [vmem:[#allocation2 + $0x38] sm:$0xff] %v148_v36  ;;  %v123_v39 = vadd.f32 %v175_v24, %v122_v37  ;;  %v143_v40 = vadd.f32 %v175_v24, %v142_v38 }
  0xec   :  { %153 = vst [vmem:[#allocation2 + $0x10] sm:$0xff] %v123_v39  ;;  %157 = vst [vmem:[#allocation2 + $0x30] sm:$0xff] %v143_v40 }
  0xed   :  { %290 = shalt.err (!%p287_p4)
}
  0xee   :  { %s302_s2 = smov 128   ;;  %s303_s9 = smov 8  }
  0xef   :  { %170 = dma.vmem_to_hbm [thread:$0]  %s165_s8, 1024, %s405_s3, [#allocation3], %s302_s2, %s302_s2, %s303_s9  }
  0xf0   :  { %299 = dma.done.wait [#allocation3], 1024  }
  0xf1   :  { %300 = vsyncadd [#allocation3], 4294966272 }
  0xf2   :  { %174 = vsyncpa [#allocation3], 1 }

// kernel: seq2seq_forward.7
= control target key start
LH: loop header
LB: loop body
LE: loop exit
PB: predicated region body
PF: predicated region fallthrough
CT: control target
= control target key end

     0   :  { %v3054_v3 = vmov 0.0   ;;  %s3048_s1 = inlined_call_operand.vmem [shape: f32[128,512], index: 1, kind: input, shape index: {}]   ;;  %s3049_s0 = inlined_call_operand.vmem [shape: f32[8,8,512], index: 0, kind: input, shape index: {}]   ;;  %s3050_s3 = inlined_call_operand.vmem [shape: f32[8,128], index: 3, kind: output, shape index: {1}]   ;;  %s3051_s2 = inlined_call_operand.vmem [shape: f32[8,128], index: 2, kind: output, shape index: {0}]  }
   0x1   :  { %v1755_v0 = vld [vmem:[%s3048_s1 + $0x1e8] sm:$0xff]  ;;  %v1760_v1 = vld [vmem:[%s3048_s1 + $0x1e0] sm:$0xff]  ;;  %145 = vmatprep.mubr.f32.mxu0 %v3054_v3  ;;  %216 = vmatprep.mubr.f32.mxu1 %v3054_v3  ;;  %v1802_v9 = vld [vmem:[%s3048_s1 + $0x1f8] sm:$0xff] }
   0x2   :  { %3114 = vst [vmem:[#allocation2_spill] sm:$0xff] %v1755_v0  ;;  %v1765_v2 = vld [vmem:[%s3048_s1 + $0x1c8] sm:$0xff]  ;;  %81 = vmatprep.subr.mxu0 %v1755_v0  ;;  %v1773_v4 = vld [vmem:[%s3048_s1 + $0x1c0] sm:$0xff]  ;;  %3115 = vst [vmem:[#allocation3_spill] sm:$0xff] %v1802_v9  ;;  %152 = vmatprep.subr.mxu1 %v1802_v9 }
   0x3   :  { %82 = vmatpush1.msra.mxu0 %v1760_v1  ;;  %v1779_v5 = vld [vmem:[%s3048_s1 + $0x1a8] sm:$0xff]  ;;  %v1785_v6 = vld [vmem:[%s3048_s1 + $0x1a0] sm:$0xff]  ;;  %v1814_v11 = vld [vmem:[%s3048_s1 + $0x1f0] sm:$0xff] }
   0x4   :  { %83 = vmatprep.subr.mxu0 %v1765_v2  ;;  %v1791_v7 = vld [vmem:[%s3048_s1 + $0x188] sm:$0xff]  ;;  %v1797_v8 = vld [vmem:[%s3048_s1 + $0x180] sm:$0xff]  ;;  %153 = vmatpush1.msra.mxu1 %v1814_v11  ;;  %v1826_v13 = vld [vmem:[%s3048_s1 + $0x1d8] sm:$0xff] }
   0x5   :  { %84 = vmatpush1.msra.mxu0 %v1773_v4  ;;  %v1808_v10 = vld [vmem:[%s3048_s1 + $0x168] sm:$0xff]  ;;  %v1820_v12 = vld [vmem:[%s3048_s1 + $0x160] sm:$0xff]  ;;  %v1831_v14 = vld [vmem:[%s3048_s1 + $0x1d0] sm:$0xff]  ;;  %154 = vmatprep.subr.mxu1 %v1826_v13 }
   0x6   :  { %85 = vmatprep.subr.mxu0 %v1779_v5  ;;  %v1837_v15 = vld [vmem:[%s3048_s1 + $0x148] sm:$0xff]  ;;  %v1843_v16 = vld [vmem:[%s3048_s1 + $0x1b8] sm:$0xff]  ;;  %v1849_v17 = vld [vmem:[%s3048_s1 + $0x140] sm:$0xff]  ;;  %155 = vmatpush1.msra.mxu1 %v1831_v14 }
   0x7   :  { %86 = vmatpush1.msra.mxu0 %v1785_v6  ;;  %v1855_v18 = vld [vmem:[%s3048_s1 + $0x1b0] sm:$0xff]  ;;  %v1860_v19 = vld [vmem:[%s3048_s1 + $0x198] sm:$0xff]  ;;  %v1866_v20 = vld [vmem:[%s3048_s1 + $0x128] sm:$0xff]  ;;  %156 = vmatprep.subr.mxu1 %v1843_v16 }
   0x8   :  { %87 = vmatprep.subr.mxu0 %v1791_v7  ;;  %v1872_v21 = vld [vmem:[%s3048_s1 + $0x190] sm:$0xff]  ;;  %v1878_v22 = vld [vmem:[%s3048_s1 + $0x120] sm:$0xff]  ;;  %157 = vmatpush1.msra.mxu1 %v1855_v18  ;;  %v1884_v23 = vld [vmem:[%s3048_s1 + $0x178] sm:$0xff] }
   0x9   :  { %88 = vmatpush1.msra.mxu0 %v1797_v8  ;;  %v1890_v24 = vld [vmem:[%s3048_s1 + $0x108] sm:$0xff]  ;;  %158 = vmatprep.subr.mxu1 %v1860_v19  ;;  %v1896_v25 = vld [vmem:[%s3048_s1 + $0x170] sm:$0xff]  ;;  %v1902_v26 = vld [vmem:[%s3048_s1 + $0x100] sm:$0xff] }
   0xa   :  { %89 = vmatprep.subr.mxu0 %v1808_v10  ;;  %159 = vmatpush1.msra.mxu1 %v1872_v21  ;;  %v1908_v27 = vld [vmem:[%s3048_s1 + $0x158] sm:$0xff]  ;;  %v1914_v28 = vld [vmem:[%s3048_s1 + $0xe8] sm:$0xff]  ;;  %v1920_v29 = vld [vmem:[%s3048_s1 + $0x150] sm:$0xff] }
   0xb   :  { %90 = vmatpush1.msra.mxu0 %v1820_v12  ;;  %160 = vmatprep.subr.mxu1 %v1884_v23  ;;  %v1926_v30 = vld [vmem:[%s3048_s1 + $0xe0] sm:$0xff]  ;;  %v1932_v31 = vld [vmem:[%s3048_s1 + $0x138] sm:$0xff]  ;;  %v1938_v32 = vld [vmem:[%s3048_s1 + $0xc8] sm:$0xff] }
   0xc   :  { %91 = vmatprep.subr.mxu0 %v1837_v15  ;;  %161 = vmatpush1.msra.mxu1 %v1896_v25  ;;  %v1944_v33 = vld [vmem:[%s3048_s1 + $0x130] sm:$0xff]  ;;  %v1950_v34 = vld [vmem:[%s3048_s1 + $0xc0] sm:$0xff]  ;;  %v1956_v35 = vld [vmem:[%s3048_s1 + $0x118] sm:$0xff] }
   0xd   :  { %92 = vmatpush1.msra.mxu0 %v1849_v17  ;;  %162 = vmatprep.subr.mxu1 %v1908_v27  ;;  %v1962_v36 = vld [vmem:[%s3048_s1 + $0xa8] sm:$0xff]  ;;  %v1968_v37 = vld [vmem:[%s3048_s1 + $0x110] sm:$0xff]  ;;  %v1974_v38 = vld [vmem:[%s3048_s1 + $0xa0] sm:$0xff] }
   0xe   :  { %93 = vmatprep.subr.mxu0 %v1866_v20  ;;  %163 = vmatpush1.msra.mxu1 %v1920_v29  ;;  %v1980_v39 = vld [vmem:[%s3048_s1 + $0xf8] sm:$0xff]  ;;  %v1986_v40 = vld [vmem:[%s3048_s1 + $0x88] sm:$0xff]  ;;  %v1992_v41 = vld [vmem:[%s3048_s1 + $0xf0] sm:$0xff] }
   0xf   :  { %94 = vmatpush1.msra.mxu0 %v1878_v22  ;;  %164 = vmatprep.subr.mxu1 %v1932_v31  ;;  %v1998_v42 = vld [vmem:[%s3048_s1 + $0x80] sm:$0xff]  ;;  %v2004_v43 = vld [vmem:[%s3048_s1 + $0xd8] sm:$0xff]  ;;  %v2010_v44 = vld [vmem:[%s3048_s1 + $0x68] sm:$0xff] }
  0x10   :  { %95 = vmatprep.subr.mxu0 %v1890_v24  ;;  %165 = vmatpush1.msra.mxu1 %v1944_v33  ;;  %3116 = vst [vmem:[#allocation4_spill] sm:$0xff] %v2010_v44  ;;  %v2016_v45 = vld [vmem:[%s3048_s1 + $0xd0] sm:$0xff]  ;;  %v2022_v46 = vld [vmem:[%s3048_s1 + $0x60] sm:$0xff]  ;;  %v2028_v47 = vld [vmem:[%s3048_s1 + $0xb8] sm:$0xff] }
  0x11   :  { %96 = vmatpush1.msra.mxu0 %v1902_v26  ;;  %166 = vmatprep.subr.mxu1 %v1956_v35  ;;  %3117 = vst [vmem:[#allocation5_spill] sm:$0xff] %v2022_v46  ;;  %v2034_v48 = vld [vmem:[%s3048_s1 + $0x48] sm:$0xff]  ;;  %v2040_v49 = vld [vmem:[%s3048_s1 + $0xb0] sm:$0xff]  ;;  %v2046_v50 = vld [vmem:[%s3048_s1 + $0x40] sm:$0xff] }
  0x12   :  { %97 = vmatprep.subr.mxu0 %v1914_v28  ;;  %167 = vmatpush1.msra.mxu1 %v1968_v37  ;;  %3118 = vst [vmem:[#allocation6_spill] sm:$0xff] %v2034_v48  ;;  %3119 = vst [vmem:[#allocation7_spill] sm:$0xff] %v2046_v50  ;;  %v2052_v51 = vld [vmem:[%s3048_s1 + $0x98] sm:$0xff]  ;;  %v2058_v52 = vld [vmem:[%s3048_s1 + $0x28] sm:$0xff] }
  0x13   :  { %98 = vmatpush1.msra.mxu0 %v1926_v30  ;;  %168 = vmatprep.subr.mxu1 %v1980_v39  ;;  %3120 = vst [vmem:[#allocation8_spill] sm:$0xff] %v2058_v52  ;;  %v2064_v53 = vld [vmem:[%s3048_s1 + $0x90] sm:$0xff]  ;;  %v2070_v54 = vld [vmem:[%s3048_s1 + $0x20] sm:$0xff]  ;;  %v2076_v55 = vld [vmem:[%s3048_s1 + $0x78] sm:$0xff] }
  0x14   :  { %99 = vmatprep.subr.mxu0 %v1938_v32  ;;  %169 = vmatpush1.msra.mxu1 %v1992_v41  ;;  %3121 = vst [vmem:[#allocation9_spill] sm:$0xff] %v2070_v54  ;;  %3122 = vst [vmem:[#allocation10_spill] sm:$0xff] %v2076_v55  ;;  %v2082_v56 = vld [vmem:[%s3048_s1 + $0x8] sm:$0xff]  ;;  %v2088_v57 = vld [vmem:[%s3048_s1 + $0x70] sm:$0xff] }
  0x15   :  { %100 = vmatpush1.msra.mxu0 %v1950_v34  ;;  %170 = vmatprep.subr.mxu1 %v2004_v43  ;;  %3123 = vst [vmem:[#allocation11_spill] sm:$0xff] %v2082_v56  ;;  %3124 = vst [vmem:[#allocation12_spill] sm:$0xff] %v2088_v57  ;;  %v2094_v58 = vld [vmem:[%s3048_s1] sm:$0xff]  ;;  %v2100_v59 = vld [vmem:[%s3048_s1 + $0x58] sm:$0xff] }
  0x16   :  { %101 = vmatprep.subr.mxu0 %v1962_v36  ;;  %171 = vmatpush1.msra.mxu1 %v2016_v45  ;;  %3125 = vst [vmem:[#allocation13_spill] sm:$0xff] %v2094_v58  ;;  %3126 = vst [vmem:[#allocation14_spill] sm:$0xff] %v2100_v59  ;;  %v2107_v60 = vld [vmem:[%s3048_s1 + $0x50] sm:$0xff]  ;;  %v2114_v61 = vld [vmem:[%s3048_s1 + $0x38] sm:$0xff] }
  0x17   :  { %102 = vmatpush1.msra.mxu0 %v1974_v38  ;;  %172 = vmatprep.subr.mxu1 %v2028_v47  ;;  %3127 = vst [vmem:[#allocation15_spill] sm:$0xff] %v2107_v60  ;;  %3128 = vst [vmem:[#allocation16_spill] sm:$0xff] %v2114_v61  ;;  %v2121_v62 = vld [vmem:[%s3048_s1 + $0x30] sm:$0xff]  ;;  %v2128_v63 = vld [vmem:[%s3048_s1 + $0x18] sm:$0xff] }
  0x18   :  { %103 = vmatprep.subr.mxu0 %v1986_v40  ;;  %173 = vmatpush1.msra.mxu1 %v2040_v49  ;;  %3129 = vst [vmem:[#allocation17_spill] sm:$0xff] %v2121_v62  ;;  %3130 = vst [vmem:[#allocation18_spill] sm:$0xff] %v2128_v63 }
  0x19   :  { %104 = vmatpush1.msra.mxu0 %v1998_v42  ;;  %174 = vmatprep.subr.mxu1 %v2052_v51 }
  0x1a   :  { %105 = vmatprep.subr.mxu0 %v2010_v44  ;;  %175 = vmatpush1.msra.mxu1 %v2064_v53 }
  0x1b   :  { %106 = vmatpush1.msra.mxu0 %v2022_v46  ;;  %176 = vmatprep.subr.mxu1 %v2076_v55 }
  0x1c   :  { %107 = vmatprep.subr.mxu0 %v2034_v48  ;;  %177 = vmatpush1.msra.mxu1 %v2088_v57 }
  0x1d   :  { %108 = vmatpush1.msra.mxu0 %v2046_v50  ;;  %178 = vmatprep.subr.mxu1 %v2100_v59 }
  0x1e   :  { %109 = vmatprep.subr.mxu0 %v2058_v52  ;;  %179 = vmatpush1.msra.mxu1 %v2107_v60 }
  0x1f   :  { %110 = vmatpush1.msra.mxu0 %v2070_v54  ;;  %180 = vmatprep.subr.mxu1 %v2114_v61 }
  0x20   :  { %111 = vmatprep.subr.mxu0 %v2082_v56  ;;  %181 = vmatpush1.msra.mxu1 %v2121_v62 }
  0x21   :  { %112 = vmatpush1.msra.mxu0 %v2094_v58  ;;  %v2134_v58 = vld [vmem:[%s3048_s1 + $0x10] sm:$0xff]  ;;  %182 = vmatprep.subr.mxu1 %v2128_v63 }
  0x22   :  { %146 = vmatmul.mubr.f32.vlgmr.msra.gmra.mxu0 %v3054_v3  ;;  %3131 = vst [vmem:[#allocation19_spill] sm:$0xff] %v2134_v58  ;;  %256 = vmatprep.subr.mxu0 %v1755_v0 }
  0x23   :  { %257 = vmatpush1.msra.mxu0 %v1760_v1  ;;  %183 = vmatpush1.msra.mxu1 %v2134_v58 }
  0x24   :  { %258 = vmatprep.subr.mxu0 %v1765_v2  ;;  %217 = vmatmul.mubr.f32.vlgmr.msra.gmra.mxu1 %v3054_v3  ;;  %v3132_v3 = vld [vmem:[#allocation13_spill] sm:$0xff] }
  0x25   :  { %259 = vmatpush1.msra.mxu0 %v1773_v4  ;;  %327 = vmatprep.subr.mxu1 %v1802_v9 }
  0x26   :  { %328 = vmatpush1.msra.mxu1 %v1814_v11  ;;  %260 = vmatprep.subr.mxu0 %v1779_v5 }
  0x27   :  { %329 = vmatprep.subr.mxu1 %v1826_v13  ;;  %261 = vmatpush1.msra.mxu0 %v1785_v6 }
  0x28   :  { %330 = vmatpush1.msra.mxu1 %v1831_v14  ;;  %262 = vmatprep.subr.mxu0 %v1791_v7 }
  0x29   :  { %331 = vmatprep.subr.mxu1 %v1843_v16  ;;  %263 = vmatpush1.msra.mxu0 %v1797_v8 }
  0x2a   :  { %332 = vmatpush1.msra.mxu1 %v1855_v18  ;;  %264 = vmatprep.subr.mxu0 %v1808_v10 }
  0x2b   :  { %333 = vmatprep.subr.mxu1 %v1860_v19  ;;  %265 = vmatpush1.msra.mxu0 %v1820_v12 }
  0x2c   :  { %334 = vmatpush1.msra.mxu1 %v1872_v21  ;;  %266 = vmatprep.subr.mxu0 %v1837_v15 }
  0x2d   :  { %335 = vmatprep.subr.mxu1 %v1884_v23  ;;  %267 = vmatpush1.msra.mxu0 %v1849_v17 }
  0x2e   :  { %336 = vmatpush1.msra.mxu1 %v1896_v25  ;;  %268 = vmatprep.subr.mxu0 %v1866_v20 }
  0x2f   :  { %337 = vmatprep.subr.mxu1 %v1908_v27  ;;  %269 = vmatpush1.msra.mxu0 %v1878_v22 }
  0x30   :  { %338 = vmatpush1.msra.mxu1 %v1920_v29  ;;  %270 = vmatprep.subr.mxu0 %v1890_v24 }
  0x31   :  { %339 = vmatprep.subr.mxu1 %v1932_v31  ;;  %271 = vmatpush1.msra.mxu0 %v1902_v26 }
  0x32   :  { %340 = vmatpush1.msra.mxu1 %v1944_v33  ;;  %272 = vmatprep.subr.mxu0 %v1914_v28 }
  0x33   :  { %341 = vmatprep.subr.mxu1 %v1956_v35  ;;  %273 = vmatpush1.msra.mxu0 %v1926_v30 }
  0x34   :  { %342 = vmatpush1.msra.mxu1 %v1968_v37  ;;  %274 = vmatprep.subr.mxu0 %v1938_v32 }
  0x35   :  { %343 = vmatprep.subr.mxu1 %v1980_v39  ;;  %275 = vmatpush1.msra.mxu0 %v1950_v34 }
  0x36   :  { %344 = vmatpush1.msra.mxu1 %v1992_v41  ;;  %276 = vmatprep.subr.mxu0 %v1962_v36 }
  0x37   :  { %345 = vmatprep.subr.mxu1 %v2004_v43  ;;  %277 = vmatpush1.msra.mxu0 %v1974_v38 }
  0x38   :  { %346 = vmatpush1.msra.mxu1 %v2016_v45  ;;  %278 = vmatprep.subr.mxu0 %v1986_v40 }
  0x39   :  { %347 = vmatprep.subr.mxu1 %v2028_v47  ;;  %279 = vmatpush1.msra.mxu0 %v1998_v42 }
  0x3a   :  { %348 = vmatpush1.msra.mxu1 %v2040_v49  ;;  %280 = vmatprep.subr.mxu0 %v2010_v44 }
  0x3b   :  { %349 = vmatprep.subr.mxu1 %v2052_v51  ;;  %281 = vmatpush1.msra.mxu0 %v2022_v46 }
  0x3c   :  { %350 = vmatpush1.msra.mxu1 %v2064_v53  ;;  %282 = vmatprep.subr.mxu0 %v2034_v48  ;;  %v3133_v48 = vmov 0.0  }
  0x3d   :  { %351 = vmatprep.subr.mxu1 %v2076_v55  ;;  %283 = vmatpush1.msra.mxu0 %v2046_v50 }
  0x3e   :  { %352 = vmatpush1.msra.mxu1 %v2088_v57  ;;  %284 = vmatprep.subr.mxu0 %v2058_v52 }
  0x3f   :  { %353 = vmatprep.subr.mxu1 %v2100_v59  ;;  %285 = vmatpush1.msra.mxu0 %v2070_v54 }
  0x40   :  { %354 = vmatpush1.msra.mxu1 %v2107_v60  ;;  %286 = vmatprep.subr.mxu0 %v2082_v56  ;;  %v13_v56 = vld [vmem:[%s3049_s0] sm:$0xff]  ;;  %v16_v60 = vld [vmem:[%s3049_s0 + $0x18] sm:$0xff] }
  0x41   :  { %355 = vmatprep.subr.mxu1 %v2114_v61  ;;  %287 = vmatpush1.msra.mxu0 %v3132_v3  ;;  %v14_v3 = vld [vmem:[%s3049_s0 + $0x8] sm:$0xff] }
  0x42   :  { %356 = vmatpush1.msra.mxu1 %v2121_v62  ;;  %320 = vmatprep.mubr.f32.mxu0 %v3133_v48 }
  0x43   :  { %357 = vmatprep.subr.mxu1 %v2128_v63  ;;  %391 = vmatprep.mubr.f32.mxu1 %v3133_v48 }
  0x44   :  { %358 = vmatpush1.msra.mxu1 %v2134_v58  ;;  %431 = vmatprep.subr.mxu0 %v1755_v0 }
  0x45   :  { %502 = vmatprep.subr.mxu1 %v1802_v9  ;;  %v15_v9 = vld [vmem:[%s3049_s0 + $0x10] sm:$0xff] }
  0xe2   :  { %v147_v54 = vpop.f32.mrf.mxu0 }
  0xe3   :  { %v223_v62 = vadd.f32 %v147_v54, %v13_v56 }
  0xe4   :  { %v149_v61 = vpop.f32.mrf.mxu0  ;;  %v218_v0 = vpop.f32.mrf.mxu1 }
  0xe5   :  { %v1486_v63 = vmul.f32 -1.442695, %v223_v62  ;;  %v224_v52 = vadd.f32 %v149_v61, %v14_v3  ;;  %v225_v58 = vadd.f32 %v218_v0, %v15_v9 }
  0xe6   :  { %v220_v50 = vpop.f32.mrf.mxu1 }
  0xe7   :  { %1539 = vpow2.f32 %v1486_v63  ;;  %v1487_v48 = vmul.f32 -1.442695, %v224_v52  ;;  %v1488_v59 = vmul.f32 -1.442695, %v225_v58  ;;  %v226_v57 = vadd.f32 %v220_v50, %v16_v60  ;;  %v3136_v60 = vld [vmem:[#allocation12_spill] sm:$0xff] }
  0xe9   :  { %1541 = vpow2.f32 %v1487_v48 }
  0xea   :  { %1543 = vpow2.f32 %v1488_v59 }
  0xeb   :  { %1545 = vtanh.f32 %v226_v57  ;;  %v3135_v57 = vld [vmem:[#allocation5_spill] sm:$0xff] }
  0xf4   :  { %v1540_v54 = vpop.eup %1539 }
  0xf5   :  { %v236_v56 = vadd.f32 1.0, %v1540_v54  ;;  %v3137_v54 = vld [vmem:[#allocation6_spill] sm:$0xff] }
  0xf6   :  { %v1542_v3 = vpop.eup %1541 }
  0xf7   :  { %1547 = vrcp.f32 %v236_v56  ;;  %v237_v48 = vadd.f32 1.0, %v1542_v3  ;;  %v1544_v52 = vpop.eup %1543  ;;  %v3138_v56 = vld [vmem:[#allocation14_spill] sm:$0xff]  ;;  %v3139_v3 = vld [vmem:[#allocation7_spill] sm:$0xff] }
  0xf8   :  { %v1546_v61 = vpop.eup %1545  ;;  %v238_v0 = vadd.f32 1.0, %v1544_v52  ;;  %v3141_v52 = vld [vmem:[#allocation8_spill] sm:$0xff] }
  0xf9   :  { %1549 = vrcp.f32 %v237_v48  ;;  %v3140_v48 = vld [vmem:[#allocation15_spill] sm:$0xff] }
  0xfa   :  { %1551 = vrcp.f32 %v238_v0  ;;  %v3145_v0 = vld [vmem:[#allocation11_spill] sm:$0xff] }
 0x104   :  { %v1548_v62 = vpop.eup %1547 }
 0x105   :  { %v247_v46 = vmul.f32 %v1548_v62, %v1546_v61  ;;  %v3142_v61 = vld [vmem:[#allocation16_spill] sm:$0xff]  ;;  %v3143_v62 = vld [vmem:[#allocation9_spill] sm:$0xff] }
 0x106   :  { %v1550_v63 = vpop.eup %1549 }
 0x107   :  { %v246_v9 = vmul.f32 0.0, %v1550_v63  ;;  %v1552_v50 = vpop.eup %1551  ;;  %v3144_v63 = vld [vmem:[#allocation17_spill] sm:$0xff] }
 0x109   :  { %v2220_v55 = vadd.f32 %v247_v46, %v246_v9  ;;  %v3134_v46 = vld [vmem:[#allocation10_spill] sm:$0xff] }
 0x10a   :  { %v3146_v9 = vld [vmem:[#allocation18_spill] sm:$0xff] }
 0x10b   :  { %1553 = vtanh.f32 %v2220_v55 }
 0x118   :  { %v1554_v58 = vpop.eup %1553 }
 0x119   :  { %v250_v59 = vmul.f32 %v1554_v58, %v1552_v50  ;;  %v3147_v50 = vld [vmem:[#allocation13_spill] sm:$0xff]  ;;  %v3148_v58 = vmov 0.0  }
 0x11b   :  { %321 = vmatmul.mubr.f32.vlgmr.msra.gmra.mxu0 %v250_v59  ;;  %392 = vmatmul.mubr.f32.vlgmr.msra.gmra.mxu1 %v250_v59  ;;  %v3149_v59 = vld [vmem:[#allocation19_spill] sm:$0xff] }
 0x11c   :  { %432 = vmatpush1.msra.mxu0 %v1760_v1  ;;  %503 = vmatpush1.msra.mxu1 %v1814_v11 }
 0x11d   :  { %433 = vmatprep.subr.mxu0 %v1765_v2  ;;  %504 = vmatprep.subr.mxu1 %v1826_v13 }
 0x11e   :  { %434 = vmatpush1.msra.mxu0 %v1773_v4  ;;  %505 = vmatpush1.msra.mxu1 %v1831_v14 }
 0x11f   :  { %435 = vmatprep.subr.mxu0 %v1779_v5  ;;  %506 = vmatprep.subr.mxu1 %v1843_v16 }
 0x120   :  { %436 = vmatpush1.msra.mxu0 %v1785_v6  ;;  %507 = vmatpush1.msra.mxu1 %v1855_v18 }
 0x121   :  { %437 = vmatprep.subr.mxu0 %v1791_v7  ;;  %508 = vmatprep.subr.mxu1 %v1860_v19 }
 0x122   :  { %438 = vmatpush1.msra.mxu0 %v1797_v8  ;;  %509 = vmatpush1.msra.mxu1 %v1872_v21 }
 0x123   :  { %439 = vmatprep.subr.mxu0 %v1808_v10  ;;  %510 = vmatprep.subr.mxu1 %v1884_v23 }
 0x124   :  { %440 = vmatpush1.msra.mxu0 %v1820_v12  ;;  %511 = vmatpush1.msra.mxu1 %v1896_v25 }
 0x125   :  { %441 = vmatprep.subr.mxu0 %v1837_v15  ;;  %512 = vmatprep.subr.mxu1 %v1908_v27 }
 0x126   :  { %442 = vmatpush1.msra.mxu0 %v1849_v17  ;;  %513 = vmatpush1.msra.mxu1 %v1920_v29 }
 0x127   :  { %443 = vmatprep.subr.mxu0 %v1866_v20  ;;  %514 = vmatprep.subr.mxu1 %v1932_v31 }
 0x128   :  { %444 = vmatpush1.msra.mxu0 %v1878_v22  ;;  %515 = vmatpush1.msra.mxu1 %v1944_v33 }
 0x129   :  { %445 = vmatprep.subr.mxu0 %v1890_v24  ;;  %516 = vmatprep.subr.mxu1 %v1956_v35 }
 0x12a   :  { %446 = vmatpush1.msra.mxu0 %v1902_v26  ;;  %517 = vmatpush1.msra.mxu1 %v1968_v37 }
 0x12b   :  { %447 = vmatprep.subr.mxu0 %v1914_v28  ;;  %518 = vmatprep.subr.mxu1 %v1980_v39 }
 0x12c   :  { %448 = vmatpush1.msra.mxu0 %v1926_v30  ;;  %519 = vmatpush1.msra.mxu1 %v1992_v41 }
 0x12d   :  { %449 = vmatprep.subr.mxu0 %v1938_v32  ;;  %520 = vmatprep.subr.mxu1 %v2004_v43 }
 0x12e   :  { %450 = vmatpush1.msra.mxu0 %v1950_v34  ;;  %521 = vmatpush1.msra.mxu1 %v2016_v45 }
 0x12f   :  { %451 = vmatprep.subr.mxu0 %v1962_v36  ;;  %522 = vmatprep.subr.mxu1 %v2028_v47 }
 0x130   :  { %452 = vmatpush1.msra.mxu0 %v1974_v38  ;;  %523 = vmatpush1.msra.mxu1 %v2040_v49 }
 0x131   :  { %453 = vmatprep.subr.mxu0 %v1986_v40  ;;  %524 = vmatprep.subr.mxu1 %v2052_v51 }
 0x132   :  { %454 = vmatpush1.msra.mxu0 %v1998_v42  ;;  %525 = vmatpush1.msra.mxu1 %v2064_v53 }
 0x133   :  { %455 = vmatprep.subr.mxu0 %v2010_v44  ;;  %526 = vmatprep.subr.mxu1 %v3134_v46 }
 0x134   :  { %456 = vmatpush1.msra.mxu0 %v3135_v57  ;;  %527 = vmatpush1.msra.mxu1 %v3136_v60 }
 0x135   :  { %457 = vmatprep.subr.mxu0 %v3137_v54  ;;  %528 = vmatprep.subr.mxu1 %v3138_v56  ;;  %v1492_v56 = vld [vmem:[%s3049_s0 + $0x38] sm:$0xff] }
 0x136   :  { %458 = vmatpush1.msra.mxu0 %v3139_v3  ;;  %529 = vmatpush1.msra.mxu1 %v3140_v48  ;;  %v3150_v48 = vld [vmem:[#allocation2_spill] sm:$0xff] }
 0x137   :  { %459 = vmatprep.subr.mxu0 %v3141_v52  ;;  %530 = vmatprep.subr.mxu1 %v3142_v61  ;;  %v3151_v52 = vld [vmem:[#allocation3_spill] sm:$0xff] }
 0x138   :  { %460 = vmatpush1.msra.mxu0 %v3143_v62  ;;  %531 = vmatpush1.msra.mxu1 %v3144_v63  ;;  %v1489_v63 = vld [vmem:[%s3049_s0 + $0x20] sm:$0xff] }
 0x139   :  { %461 = vmatprep.subr.mxu0 %v3145_v0  ;;  %532 = vmatprep.subr.mxu1 %v3146_v9  ;;  %v1490_v9 = vld [vmem:[%s3049_s0 + $0x28] sm:$0xff] }
 0x13a   :  { %462 = vmatpush1.msra.mxu0 %v3147_v50  ;;  %495 = vmatprep.mubr.f32.mxu0 %v3148_v58 }
 0x13b   :  { %533 = vmatpush1.msra.mxu1 %v3149_v59  ;;  %566 = vmatprep.mubr.f32.mxu1 %v3148_v58 }
 0x13c   :  { %606 = vmatprep.subr.mxu0 %v3150_v48  ;;  %677 = vmatprep.subr.mxu1 %v3151_v52  ;;  %v1491_v52 = vld [vmem:[%s3049_s0 + $0x30] sm:$0xff] }
 0x1db   :  { %v322_v62 = vpop.f32.mrf.mxu0  ;;  %v393_v48 = vpop.f32.mrf.mxu1 }
 0x1dc   :  { %v398_v50 = vadd.f32 %v1489_v63, %v322_v62  ;;  %v400_v58 = vadd.f32 %v1491_v52, %v393_v48 }
 0x1dd   :  { %v324_v0 = vpop.f32.mrf.mxu0  ;;  %v395_v54 = vpop.f32.mrf.mxu1 }
 0x1de   :  { %v1493_v61 = vmul.f32 -1.442695, %v398_v50  ;;  %v399_v3 = vadd.f32 %v1490_v9, %v324_v0  ;;  %v1495_v60 = vmul.f32 -1.442695, %v400_v58  ;;  %v401_v62 = vadd.f32 %v1492_v56, %v395_v54  ;;  %v3154_v56 = vld [vmem:[#allocation5_spill] sm:$0xff]  ;;  %v3155_v58 = vld [vmem:[#allocation12_spill] sm:$0xff] }
 0x1e0   :  { %1555 = vpow2.f32 %v1493_v61  ;;  %v1494_v59 = vmul.f32 -1.442695, %v399_v3 }
 0x1e2   :  { %1557 = vpow2.f32 %v1494_v59 }
 0x1e3   :  { %1559 = vpow2.f32 %v1495_v60 }
 0x1ed   :  { %v1556_v57 = vpop.eup %1555 }
 0x1ee   :  { %v411_v63 = vadd.f32 1.0, %v1556_v57 }
 0x1ef   :  { %v1558_v50 = vpop.eup %1557 }
 0x1f0   :  { %1561 = vrcp.f32 %v411_v63  ;;  %v412_v3 = vadd.f32 1.0, %v1558_v50  ;;  %v1560_v61 = vpop.eup %1559  ;;  %v3157_v63 = vld [vmem:[#allocation14_spill] sm:$0xff]  ;;  %v3158_v50 = vld [vmem:[#allocation7_spill] sm:$0xff] }
 0x1f1   :  { %1563 = vtanh.f32 %v401_v62  ;;  %v413_v48 = vadd.f32 1.0, %v1560_v61  ;;  %v3156_v62 = vld [vmem:[#allocation6_spill] sm:$0xff]  ;;  %v3160_v61 = vld [vmem:[#allocation8_spill] sm:$0xff] }
 0x1f2   :  { %1565 = vrcp.f32 %v412_v3  ;;  %v3159_v3 = vld [vmem:[#allocation15_spill] sm:$0xff] }
 0x1f3   :  { %1567 = vrcp.f32 %v413_v48  ;;  %v3164_v48 = vld [vmem:[#allocation11_spill] sm:$0xff] }
 0x1fd   :  { %v1562_v0 = vpop.eup %1561 }
 0x1fe   :  { %v1564_v9 = vpop.eup %1563 }
 0x1ff   :  { %v1566_v59 = vpop.eup %1565  ;;  %v422_v46 = vmul.f32 %v1564_v9, %v1562_v0  ;;  %v3161_v0 = vld [vmem:[#allocation16_spill] sm:$0xff]  ;;  %v3162_v9 = vld [vmem:[#allocation9_spill] sm:$0xff] }
 0x200   :  { %v421_v52 = vmul.f32 %v1566_v59, %v2220_v55  ;;  %v1568_v57 = vpop.eup %1567  ;;  %v3152_v55 = vld [vmem:[#allocation4_spill] sm:$0xff]  ;;  %v3163_v59 = vld [vmem:[#allocation17_spill] sm:$0xff] }
 0x202   :  { %v2302_v44 = vadd.f32 %v422_v46, %v421_v52  ;;  %v3153_v46 = vld [vmem:[#allocation10_spill] sm:$0xff] }
 0x203   :  { %v3165_v52 = vld [vmem:[#allocation18_spill] sm:$0xff] }
 0x204   :  { %1569 = vtanh.f32 %v2302_v44 }
 0x211   :  { %v1570_v54 = vpop.eup %1569 }
 0x212   :  { %v425_v60 = vmul.f32 %v1570_v54, %v1568_v57  ;;  %v3166_v57 = vld [vmem:[#allocation13_spill] sm:$0xff]  ;;  %v3167_v54 = vmov 0.0  }
 0x214   :  { %496 = vmatmul.mubr.f32.vlgmr.msra.gmra.mxu0 %v425_v60  ;;  %567 = vmatmul.mubr.f32.vlgmr.msra.gmra.mxu1 %v425_v60  ;;  %v3168_v60 = vld [vmem:[#allocation19_spill] sm:$0xff] }
 0x215   :  { %607 = vmatpush1.msra.mxu0 %v1760_v1  ;;  %678 = vmatpush1.msra.mxu1 %v1814_v11 }
 0x216   :  { %608 = vmatprep.subr.mxu0 %v1765_v2  ;;  %679 = vmatprep.subr.mxu1 %v1826_v13 }
 0x217   :  { %609 = vmatpush1.msra.mxu0 %v1773_v4  ;;  %680 = vmatpush1.msra.mxu1 %v1831_v14 }
 0x218   :  { %610 = vmatprep.subr.mxu0 %v1779_v5  ;;  %681 = vmatprep.subr.mxu1 %v1843_v16 }
 0x219   :  { %611 = vmatpush1.msra.mxu0 %v1785_v6  ;;  %682 = vmatpush1.msra.mxu1 %v1855_v18 }
 0x21a   :  { %612 = vmatprep.subr.mxu0 %v1791_v7  ;;  %683 = vmatprep.subr.mxu1 %v1860_v19 }
 0x21b   :  { %613 = vmatpush1.msra.mxu0 %v1797_v8  ;;  %684 = vmatpush1.msra.mxu1 %v1872_v21 }
 0x21c   :  { %614 = vmatprep.subr.mxu0 %v1808_v10  ;;  %685 = vmatprep.subr.mxu1 %v1884_v23 }
 0x21d   :  { %615 = vmatpush1.msra.mxu0 %v1820_v12  ;;  %686 = vmatpush1.msra.mxu1 %v1896_v25 }
 0x21e   :  { %616 = vmatprep.subr.mxu0 %v1837_v15  ;;  %687 = vmatprep.subr.mxu1 %v1908_v27 }
 0x21f   :  { %617 = vmatpush1.msra.mxu0 %v1849_v17  ;;  %688 = vmatpush1.msra.mxu1 %v1920_v29 }
 0x220   :  { %618 = vmatprep.subr.mxu0 %v1866_v20  ;;  %689 = vmatprep.subr.mxu1 %v1932_v31 }
 0x221   :  { %619 = vmatpush1.msra.mxu0 %v1878_v22  ;;  %690 = vmatpush1.msra.mxu1 %v1944_v33 }
 0x222   :  { %620 = vmatprep.subr.mxu0 %v1890_v24  ;;  %691 = vmatprep.subr.mxu1 %v1956_v35 }
 0x223   :  { %621 = vmatpush1.msra.mxu0 %v1902_v26  ;;  %692 = vmatpush1.msra.mxu1 %v1968_v37 }
 0x224   :  { %622 = vmatprep.subr.mxu0 %v1914_v28  ;;  %693 = vmatprep.subr.mxu1 %v1980_v39 }
 0x225   :  { %623 = vmatpush1.msra.mxu0 %v1926_v30  ;;  %694 = vmatpush1.msra.mxu1 %v1992_v41 }
 0x226   :  { %624 = vmatprep.subr.mxu0 %v1938_v32  ;;  %695 = vmatprep.subr.mxu1 %v2004_v43 }
 0x227   :  { %625 = vmatpush1.msra.mxu0 %v1950_v34  ;;  %696 = vmatpush1.msra.mxu1 %v2016_v45 }
 0x228   :  { %626 = vmatprep.subr.mxu0 %v1962_v36  ;;  %697 = vmatprep.subr.mxu1 %v2028_v47 }
 0x229   :  { %627 = vmatpush1.msra.mxu0 %v1974_v38  ;;  %698 = vmatpush1.msra.mxu1 %v2040_v49 }
 0x22a   :  { %628 = vmatprep.subr.mxu0 %v1986_v40  ;;  %699 = vmatprep.subr.mxu1 %v2052_v51 }
 0x22b   :  { %629 = vmatpush1.msra.mxu0 %v1998_v42  ;;  %700 = vmatpush1.msra.mxu1 %v2064_v53 }
 0x22c   :  { %630 = vmatprep.subr.mxu0 %v3152_v55  ;;  %701 = vmatprep.subr.mxu1 %v3153_v46 }
 0x22d   :  { %631 = vmatpush1.msra.mxu0 %v3154_v56  ;;  %702 = vmatpush1.msra.mxu1 %v3155_v58 }
 0x22e   :  { %632 = vmatprep.subr.mxu0 %v3156_v62  ;;  %703 = vmatprep.subr.mxu1 %v3157_v63  ;;  %v1499_v63 = vld [vmem:[%s3049_s0 + $0x58] sm:$0xff] }
 0x22f   :  { %633 = vmatpush1.msra.mxu0 %v3158_v50  ;;  %704 = vmatpush1.msra.mxu1 %v3159_v3  ;;  %v3169_v3 = vld [vmem:[#allocation2_spill] sm:$0xff] }
 0x230   :  { %634 = vmatprep.subr.mxu0 %v3160_v61  ;;  %705 = vmatprep.subr.mxu1 %v3161_v0  ;;  %v3170_v61 = vld [vmem:[#allocation3_spill] sm:$0xff] }
 0x231   :  { %635 = vmatpush1.msra.mxu0 %v3162_v9  ;;  %706 = vmatpush1.msra.mxu1 %v3163_v59  ;;  %v1496_v59 = vld [vmem:[%s3049_s0 + $0x40] sm:$0xff] }
 0x232   :  { %636 = vmatprep.subr.mxu0 %v3164_v48  ;;  %707 = vmatprep.subr.mxu1 %v3165_v52  ;;  %v1497_v52 = vld [vmem:[%s3049_s0 + $0x48] sm:$0xff] }
 0x233   :  { %637 = vmatpush1.msra.mxu0 %v3166_v57  ;;  %670 = vmatprep.mubr.f32.mxu0 %v3167_v54 }
 0x234   :  { %708 = vmatpush1.msra.mxu1 %v3168_v60  ;;  %741 = vmatprep.mubr.f32.mxu1 %v3167_v54 }
 0x235   :  { %781 = vmatprep.subr.mxu0 %v3169_v3  ;;  %852 = vmatprep.subr.mxu1 %v3170_v61  ;;  %v1498_v3 = vld [vmem:[%s3049_s0 + $0x50] sm:$0xff] }
 0x2d4   :  { %v497_v9 = vpop.f32.mrf.mxu0  ;;  %v568_v61 = vpop.f32.mrf.mxu1 }
 0x2d5   :  { %v573_v57 = vadd.f32 %v1496_v59, %v497_v9  ;;  %v575_v54 = vadd.f32 %v1498_v3, %v568_v61 }
 0x2d6   :  { %v499_v48 = vpop.f32.mrf.mxu0  ;;  %v570_v62 = vpop.f32.mrf.mxu1 }
 0x2d7   :  { %v1500_v0 = vmul.f32 -1.442695, %v573_v57  ;;  %v574_v50 = vadd.f32 %v1497_v52, %v499_v48  ;;  %v1502_v58 = vmul.f32 -1.442695, %v575_v54  ;;  %v576_v9 = vadd.f32 %v1499_v63, %v570_v62 }
 0x2d9   :  { %1571 = vpow2.f32 %v1500_v0  ;;  %v1501_v60 = vmul.f32 -1.442695, %v574_v50 }
 0x2db   :  { %1573 = vpow2.f32 %v1501_v60 }
 0x2dc   :  { %1575 = vpow2.f32 %v1502_v58 }
 0x2e6   :  { %v1572_v56 = vpop.eup %1571 }
 0x2e7   :  { %v586_v59 = vadd.f32 1.0, %v1572_v56 }
 0x2e8   :  { %v1574_v57 = vpop.eup %1573 }
 0x2e9   :  { %1577 = vrcp.f32 %v586_v59  ;;  %v587_v50 = vadd.f32 1.0, %v1574_v57  ;;  %v1576_v0 = vpop.eup %1575 }
 0x2ea   :  { %1579 = vtanh.f32 %v576_v9  ;;  %v588_v61 = vadd.f32 1.0, %v1576_v0  ;;  %v2477_v0 = vld [vmem:[%s3048_s1 + $0x1e0] sm:$0xff] }
 0x2eb   :  { %1581 = vrcp.f32 %v587_v50 }
 0x2ec   :  { %1583 = vrcp.f32 %v588_v61  ;;  %v2507_v61 = vld [vmem:[%s3048_s1 + $0x1d0] sm:$0xff] }
 0x2f6   :  { %v1578_v48 = vpop.eup %1577 }
 0x2f7   :  { %v1580_v52 = vpop.eup %1579 }
 0x2f8   :  { %v1582_v60 = vpop.eup %1581  ;;  %v597_v46 = vmul.f32 %v1580_v52, %v1578_v48  ;;  %v2489_v48 = vld [vmem:[%s3048_s1 + $0x1c8] sm:$0xff]  ;;  %v2495_v52 = vld [vmem:[%s3048_s1 + $0x1d8] sm:$0xff] }
 0x2f9   :  { %v596_v3 = vmul.f32 %v1582_v60, %v2302_v44  ;;  %v1584_v56 = vpop.eup %1583  ;;  %v2501_v60 = vld [vmem:[%s3048_s1 + $0x1c0] sm:$0xff] }
 0x2fb   :  { %v2384_v55 = vadd.f32 %v597_v46, %v596_v3  ;;  %v2513_v3 = vld [vmem:[%s3048_s1 + $0x1a8] sm:$0xff] }
 0x2fd   :  { %1585 = vtanh.f32 %v2384_v55 }
 0x30a   :  { %v1586_v62 = vpop.eup %1585 }
 0x30b   :  { %v600_v58 = vmul.f32 %v1586_v62, %v1584_v56  ;;  %v2519_v56 = vld [vmem:[%s3048_s1 + $0x1b8] sm:$0xff]  ;;  %v2525_v62 = vld [vmem:[%s3048_s1 + $0x1a0] sm:$0xff] }
 0x30d   :  { %671 = vmatmul.mubr.f32.vlgmr.msra.gmra.mxu0 %v600_v58  ;;  %742 = vmatmul.mubr.f32.vlgmr.msra.gmra.mxu1 %v600_v58  ;;  %v2531_v58 = vld [vmem:[%s3048_s1 + $0x1b0] sm:$0xff] }
 0x30e   :  { %782 = vmatpush1.msra.mxu0 %v1760_v1  ;;  %853 = vmatpush1.msra.mxu1 %v1814_v11  ;;  %v3171_v1 = vld [vmem:[#allocation4_spill] sm:$0xff] }
 0x30f   :  { %783 = vmatprep.subr.mxu0 %v1765_v2  ;;  %854 = vmatprep.subr.mxu1 %v1826_v13  ;;  %v3172_v2 = vld [vmem:[#allocation10_spill] sm:$0xff]  ;;  %v3179_v11 = vld [vmem:[#allocation8_spill] sm:$0xff]  ;;  %v3181_v13 = vld [vmem:[#allocation9_spill] sm:$0xff] }
 0x310   :  { %784 = vmatpush1.msra.mxu0 %v1773_v4  ;;  %855 = vmatpush1.msra.mxu1 %v1831_v14  ;;  %v3173_v4 = vld [vmem:[#allocation5_spill] sm:$0xff] }
 0x311   :  { %785 = vmatprep.subr.mxu0 %v1779_v5  ;;  %856 = vmatprep.subr.mxu1 %v1843_v16  ;;  %v3174_v5 = vld [vmem:[#allocation12_spill] sm:$0xff]  ;;  %v3182_v14 = vld [vmem:[#allocation17_spill] sm:$0xff]  ;;  %v3184_v16 = vld [vmem:[#allocation18_spill] sm:$0xff] }
 0x312   :  { %786 = vmatpush1.msra.mxu0 %v1785_v6  ;;  %857 = vmatpush1.msra.mxu1 %v1855_v18  ;;  %v3175_v6 = vld [vmem:[#allocation6_spill] sm:$0xff]  ;;  %v3186_v18 = vmov 0.0  }
 0x313   :  { %787 = vmatprep.subr.mxu0 %v1791_v7  ;;  %858 = vmatprep.subr.mxu1 %v1860_v19  ;;  %v3176_v7 = vld [vmem:[#allocation14_spill] sm:$0xff]  ;;  %v3187_v19 = vld [vmem:[#allocation19_spill] sm:$0xff] }
 0x314   :  { %788 = vmatpush1.msra.mxu0 %v1797_v8  ;;  %859 = vmatpush1.msra.mxu1 %v1872_v21  ;;  %v3177_v8 = vld [vmem:[#allocation7_spill] sm:$0xff] }
 0x315   :  { %789 = vmatprep.subr.mxu0 %v1808_v10  ;;  %860 = vmatprep.subr.mxu1 %v1884_v23  ;;  %v3178_v10 = vld [vmem:[#allocation15_spill] sm:$0xff] }
 0x316   :  { %790 = vmatpush1.msra.mxu0 %v1820_v12  ;;  %861 = vmatpush1.msra.mxu1 %v1896_v25  ;;  %v3180_v12 = vld [vmem:[#allocation16_spill] sm:$0xff]  ;;  %v3189_v21 = vld [vmem:[#allocation3_spill] sm:$0xff] }
 0x317   :  { %791 = vmatprep.subr.mxu0 %v1837_v15  ;;  %862 = vmatprep.subr.mxu1 %v1908_v27  ;;  %v3183_v15 = vld [vmem:[#allocation11_spill] sm:$0xff] }
 0x318   :  { %792 = vmatpush1.msra.mxu0 %v1849_v17  ;;  %863 = vmatpush1.msra.mxu1 %v1920_v29  ;;  %v3185_v17 = vld [vmem:[#allocation13_spill] sm:$0xff] }
 0x319   :  { %793 = vmatprep.subr.mxu0 %v1866_v20  ;;  %864 = vmatprep.subr.mxu1 %v1932_v31  ;;  %v2454_v20 = vld [vmem:[%s3048_s1 + $0x1e8] sm:$0xff] }
 0x31a   :  { %794 = vmatpush1.msra.mxu0 %v1878_v22  ;;  %865 = vmatpush1.msra.mxu1 %v1944_v33  ;;  %3188 = vst [vmem:[#allocation2_spill] sm:$0xff] %v2454_v20  ;;  %v1503_v22 = vld [vmem:[%s3049_s0 + $0x60] sm:$0xff]  ;;  %v1506_v33 = vld [vmem:[%s3049_s0 + $0x78] sm:$0xff] }
 0x31b   :  { %795 = vmatprep.subr.mxu0 %v1890_v24  ;;  %866 = vmatprep.subr.mxu1 %v1956_v35  ;;  %v1504_v24 = vld [vmem:[%s3049_s0 + $0x68] sm:$0xff] }
 0x31c   :  { %796 = vmatpush1.msra.mxu0 %v1902_v26  ;;  %867 = vmatpush1.msra.mxu1 %v1968_v37 }
 0x31d   :  { %797 = vmatprep.subr.mxu0 %v1914_v28  ;;  %868 = vmatprep.subr.mxu1 %v1980_v39 }
 0x31e   :  { %798 = vmatpush1.msra.mxu0 %v1926_v30  ;;  %869 = vmatpush1.msra.mxu1 %v1992_v41  ;;  %v1505_v30 = vld [vmem:[%s3049_s0 + $0x70] sm:$0xff] }
 0x31f   :  { %799 = vmatprep.subr.mxu0 %v1938_v32  ;;  %870 = vmatprep.subr.mxu1 %v2004_v43 }
 0x320   :  { %800 = vmatpush1.msra.mxu0 %v1950_v34  ;;  %871 = vmatpush1.msra.mxu1 %v2016_v45 }
 0x321   :  { %801 = vmatprep.subr.mxu0 %v1962_v36  ;;  %872 = vmatprep.subr.mxu1 %v2028_v47 }
 0x322   :  { %802 = vmatpush1.msra.mxu0 %v1974_v38  ;;  %873 = vmatpush1.msra.mxu1 %v2040_v49 }
 0x323   :  { %803 = vmatprep.subr.mxu0 %v1986_v40  ;;  %874 = vmatprep.subr.mxu1 %v2052_v51 }
 0x324   :  { %804 = vmatpush1.msra.mxu0 %v1998_v42  ;;  %875 = vmatpush1.msra.mxu1 %v2064_v53 }
 0x325   :  { %805 = vmatprep.subr.mxu0 %v3171_v1  ;;  %876 = vmatprep.subr.mxu1 %v3172_v2  ;;  %v2537_v1 = vld [vmem:[%s3048_s1 + $0x188] sm:$0xff] }
 0x326   :  { %806 = vmatpush1.msra.mxu0 %v3173_v4  ;;  %877 = vmatpush1.msra.mxu1 %v3174_v5  ;;  %v2543_v4 = vld [vmem:[%s3048_s1 + $0x198] sm:$0xff] }
 0x327   :  { %807 = vmatprep.subr.mxu0 %v3175_v6  ;;  %878 = vmatprep.subr.mxu1 %v3176_v7  ;;  %v2549_v6 = vld [vmem:[%s3048_s1 + $0x180] sm:$0xff] }
 0x328   :  { %808 = vmatpush1.msra.mxu0 %v3177_v8  ;;  %879 = vmatpush1.msra.mxu1 %v3178_v10  ;;  %v2555_v8 = vld [vmem:[%s3048_s1 + $0x190] sm:$0xff] }
 0x329   :  { %809 = vmatprep.subr.mxu0 %v3179_v11  ;;  %880 = vmatprep.subr.mxu1 %v3180_v12  ;;  %v2561_v11 = vld [vmem:[%s3048_s1 + $0x168] sm:$0xff] }
 0x32a   :  { %810 = vmatpush1.msra.mxu0 %v3181_v13  ;;  %881 = vmatpush1.msra.mxu1 %v3182_v14  ;;  %v2567_v13 = vld [vmem:[%s3048_s1 + $0x178] sm:$0xff] }
 0x32b   :  { %811 = vmatprep.subr.mxu0 %v3183_v15  ;;  %882 = vmatprep.subr.mxu1 %v3184_v16 }
 0x32c   :  { %812 = vmatpush1.msra.mxu0 %v3185_v17  ;;  %845 = vmatprep.mubr.f32.mxu0 %v3186_v18 }
 0x32d   :  { %883 = vmatpush1.msra.mxu1 %v3187_v19  ;;  %916 = vmatprep.mubr.f32.mxu1 %v3186_v18 }
 0x32e   :  { %956 = vmatprep.subr.mxu0 %v2454_v20  ;;  %1027 = vmatprep.subr.mxu1 %v3189_v21  ;;  %v2573_v21 = vld [vmem:[%s3048_s1 + $0x160] sm:$0xff] }
 0x3cd   :  { %v672_v23 = vpop.f32.mrf.mxu0  ;;  %v743_v31 = vpop.f32.mrf.mxu1 }
 0x3ce   :  { %v748_v25 = vadd.f32 %v1503_v22, %v672_v23  ;;  %v750_v32 = vadd.f32 %v1505_v30, %v743_v31  ;;  %v2579_v22 = vld [vmem:[%s3048_s1 + $0x170] sm:$0xff]  ;;  %v2585_v23 = vld [vmem:[%s3048_s1 + $0x148] sm:$0xff] }
 0x3cf   :  { %v674_v26 = vpop.f32.mrf.mxu0  ;;  %v745_v34 = vpop.f32.mrf.mxu1  ;;  %v2627_v30 = vld [vmem:[%s3048_s1 + $0x130] sm:$0xff]  ;;  %v2633_v31 = vld [vmem:[%s3048_s1 + $0x108] sm:$0xff] }
 0x3d0   :  { %v1507_v27 = vmul.f32 -1.442695, %v748_v25  ;;  %v749_v28 = vadd.f32 %v1504_v24, %v674_v26  ;;  %v1509_v35 = vmul.f32 -1.442695, %v750_v32  ;;  %v751_v37 = vadd.f32 %v1506_v33, %v745_v34  ;;  %v2591_v24 = vld [vmem:[%s3048_s1 + $0x158] sm:$0xff]  ;;  %v2597_v25 = vld [vmem:[%s3048_s1 + $0x140] sm:$0xff] }
 0x3d1   :  { %v2603_v26 = vld [vmem:[%s3048_s1 + $0x150] sm:$0xff]  ;;  %v2639_v32 = vld [vmem:[%s3048_s1 + $0x118] sm:$0xff]  ;;  %v2645_v33 = vld [vmem:[%s3048_s1 + $0x100] sm:$0xff] }
 0x3d2   :  { %1587 = vpow2.f32 %v1507_v27  ;;  %v1508_v29 = vmul.f32 -1.442695, %v749_v28  ;;  %v2609_v27 = vld [vmem:[%s3048_s1 + $0x128] sm:$0xff]  ;;  %v2615_v28 = vld [vmem:[%s3048_s1 + $0x138] sm:$0xff]  ;;  %v2651_v34 = vld [vmem:[%s3048_s1 + $0x110] sm:$0xff] }
 0x3d4   :  { %1589 = vpow2.f32 %v1508_v29  ;;  %v2621_v29 = vld [vmem:[%s3048_s1 + $0x120] sm:$0xff] }
 0x3d5   :  { %1591 = vpow2.f32 %v1509_v35  ;;  %v2657_v35 = vld [vmem:[%s3048_s1 + $0xe8] sm:$0xff] }
 0x3df   :  { %v1588_v36 = vpop.eup %1587 }
 0x3e0   :  { %v761_v38 = vadd.f32 1.0, %v1588_v36  ;;  %v2663_v36 = vld [vmem:[%s3048_s1 + $0xf8] sm:$0xff] }
 0x3e1   :  { %v1590_v39 = vpop.eup %1589 }
 0x3e2   :  { %1593 = vrcp.f32 %v761_v38  ;;  %v762_v40 = vadd.f32 1.0, %v1590_v39  ;;  %v1592_v41 = vpop.eup %1591  ;;  %v2675_v38 = vld [vmem:[%s3048_s1 + $0xf0] sm:$0xff]  ;;  %v2681_v39 = vld [vmem:[%s3048_s1 + $0xc8] sm:$0xff] }
 0x3e3   :  { %1595 = vtanh.f32 %v751_v37  ;;  %v763_v46 = vadd.f32 1.0, %v1592_v41  ;;  %v2669_v37 = vld [vmem:[%s3048_s1 + $0xe0] sm:$0xff] }
 0x3e4   :  { %1597 = vrcp.f32 %v762_v40  ;;  %v2687_v40 = vld [vmem:[%s3048_s1 + $0xd8] sm:$0xff]  ;;  %v2693_v41 = vld [vmem:[%s3048_s1 + $0xc0] sm:$0xff] }
 0x3e5   :  { %1599 = vrcp.f32 %v763_v46 }
 0x3ef   :  { %v1594_v42 = vpop.eup %1593 }
 0x3f0   :  { %v1596_v43 = vpop.eup %1595 }
 0x3f1   :  { %v1598_v44 = vpop.eup %1597  ;;  %v772_v54 = vmul.f32 %v1596_v43, %v1594_v42  ;;  %v2700_v42 = vld [vmem:[%s3048_s1 + $0xa8] sm:$0xff]  ;;  %v2707_v43 = vld [vmem:[%s3048_s1 + $0xa0] sm:$0xff] }
 0x3f2   :  { %v771_v63 = vmul.f32 %v1598_v44, %v2384_v55  ;;  %v1600_v59 = vpop.eup %1599  ;;  %v2483_v55 = vld [vmem:[%s3048_s1 + $0x1f0] sm:$0xff] }
 0x3f4   :  { %v2471_v9 = vadd.f32 %v772_v54, %v771_v63  ;;  %v1512_v63 = vld [vmem:[%s3049_s0 + $0x90] sm:$0xff] }
 0x3f6   :  { %1601 = vtanh.f32 %v2471_v9 }
 0x403   :  { %v1602_v57 = vpop.eup %1601 }
 0x404   :  { %v775_v50 = vmul.f32 %v1602_v57, %v1600_v59  ;;  %v1513_v57 = vld [vmem:[%s3049_s0 + $0x98] sm:$0xff] }
 0x406   :  { %846 = vmatmul.mubr.f32.vlgmr.msra.gmra.mxu0 %v775_v50  ;;  %917 = vmatmul.mubr.f32.vlgmr.msra.gmra.mxu1 %v775_v50 }
 0x407   :  { %957 = vmatpush1.msra.mxu0 %v2477_v0  ;;  %1028 = vmatpush1.msra.mxu1 %v2483_v55 }
 0x408   :  { %958 = vmatprep.subr.mxu0 %v2489_v48  ;;  %1029 = vmatprep.subr.mxu1 %v2495_v52 }
 0x409   :  { %959 = vmatpush1.msra.mxu0 %v2501_v60  ;;  %1030 = vmatpush1.msra.mxu1 %v2507_v61 }
 0x40a   :  { %960 = vmatprep.subr.mxu0 %v2513_v3  ;;  %1031 = vmatprep.subr.mxu1 %v2519_v56 }
 0x40b   :  { %961 = vmatpush1.msra.mxu0 %v2525_v62  ;;  %1032 = vmatpush1.msra.mxu1 %v2531_v58 }
 0x40c   :  { %962 = vmatprep.subr.mxu0 %v2537_v1  ;;  %1033 = vmatprep.subr.mxu1 %v2543_v4 }
 0x40d   :  { %963 = vmatpush1.msra.mxu0 %v2549_v6  ;;  %1034 = vmatpush1.msra.mxu1 %v2555_v8 }
 0x40e   :  { %964 = vmatprep.subr.mxu0 %v2561_v11  ;;  %1035 = vmatprep.subr.mxu1 %v2567_v13 }
 0x40f   :  { %965 = vmatpush1.msra.mxu0 %v2573_v21  ;;  %1036 = vmatpush1.msra.mxu1 %v2579_v22 }
 0x410   :  { %966 = vmatprep.subr.mxu0 %v2585_v23  ;;  %1037 = vmatprep.subr.mxu1 %v2591_v24 }
 0x411   :  { %967 = vmatpush1.msra.mxu0 %v2597_v25  ;;  %1038 = vmatpush1.msra.mxu1 %v2603_v26 }
 0x412   :  { %968 = vmatprep.subr.mxu0 %v2609_v27  ;;  %1039 = vmatprep.subr.mxu1 %v2615_v28 }
 0x413   :  { %969 = vmatpush1.msra.mxu0 %v2621_v29  ;;  %1040 = vmatpush1.msra.mxu1 %v2627_v30 }
 0x414   :  { %970 = vmatprep.subr.mxu0 %v2633_v31  ;;  %1041 = vmatprep.subr.mxu1 %v2639_v32 }
 0x415   :  { %971 = vmatpush1.msra.mxu0 %v2645_v33  ;;  %1042 = vmatpush1.msra.mxu1 %v2651_v34 }
 0x416   :  { %972 = vmatprep.subr.mxu0 %v2657_v35  ;;  %1043 = vmatprep.subr.mxu1 %v2663_v36 }
 0x417   :  { %973 = vmatpush1.msra.mxu0 %v2669_v37  ;;  %1044 = vmatpush1.msra.mxu1 %v2675_v38 }
 0x418   :  { %974 = vmatprep.subr.mxu0 %v2681_v39  ;;  %1045 = vmatprep.subr.mxu1 %v2687_v40 }
 0x419   :  { %975 = vmatpush1.msra.mxu0 %v2693_v41  ;;  %1046 = vmatpush1.msra.mxu1 %v2016_v45  ;;  %v2714_v45 = vld [vmem:[%s3048_s1 + $0x88] sm:$0xff] }
 0x41a   :  { %976 = vmatprep.subr.mxu0 %v2700_v42  ;;  %1047 = vmatprep.subr.mxu1 %v2028_v47  ;;  %v2721_v47 = vld [vmem:[%s3048_s1 + $0x80] sm:$0xff] }
 0x41b   :  { %977 = vmatpush1.msra.mxu0 %v2707_v43  ;;  %1048 = vmatpush1.msra.mxu1 %v2040_v49  ;;  %v2728_v49 = vld [vmem:[%s3048_s1 + $0x68] sm:$0xff] }
 0x41c   :  { %978 = vmatprep.subr.mxu0 %v2714_v45  ;;  %1049 = vmatprep.subr.mxu1 %v2052_v51  ;;  %3190 = vst [vmem:[#allocation4_spill] sm:$0xff] %v2728_v49  ;;  %v2735_v51 = vld [vmem:[%s3048_s1 + $0x60] sm:$0xff] }
 0x41d   :  { %979 = vmatpush1.msra.mxu0 %v2721_v47  ;;  %1050 = vmatpush1.msra.mxu1 %v2064_v53  ;;  %3191 = vst [vmem:[#allocation10_spill] sm:$0xff] %v2735_v51  ;;  %v2742_v53 = vld [vmem:[%s3048_s1 + $0x48] sm:$0xff] }
 0x41e   :  { %980 = vmatprep.subr.mxu0 %v2728_v49  ;;  %1051 = vmatprep.subr.mxu1 %v3172_v2  ;;  %3192 = vst [vmem:[#allocation5_spill] sm:$0xff] %v2742_v53  ;;  %v2749_v2 = vld [vmem:[%s3048_s1 + $0x40] sm:$0xff] }
 0x41f   :  { %981 = vmatpush1.msra.mxu0 %v2735_v51  ;;  %1052 = vmatpush1.msra.mxu1 %v3174_v5  ;;  %3193 = vst [vmem:[#allocation12_spill] sm:$0xff] %v2749_v2  ;;  %v2756_v5 = vld [vmem:[%s3048_s1 + $0x28] sm:$0xff] }
 0x420   :  { %982 = vmatprep.subr.mxu0 %v2742_v53  ;;  %1053 = vmatprep.subr.mxu1 %v3176_v7  ;;  %3194 = vst [vmem:[#allocation6_spill] sm:$0xff] %v2756_v5  ;;  %v2763_v7 = vld [vmem:[%s3048_s1 + $0x20] sm:$0xff] }
 0x421   :  { %983 = vmatpush1.msra.mxu0 %v2749_v2  ;;  %1054 = vmatpush1.msra.mxu1 %v3178_v10  ;;  %3195 = vst [vmem:[#allocation14_spill] sm:$0xff] %v2763_v7  ;;  %v2777_v10 = vld [vmem:[%s3048_s1 + $0x1f8] sm:$0xff] }
 0x422   :  { %984 = vmatprep.subr.mxu0 %v2756_v5  ;;  %1055 = vmatprep.subr.mxu1 %v3180_v12  ;;  %3196 = vst [vmem:[#allocation7_spill] sm:$0xff] %v2777_v10  ;;  %v1510_v12 = vld [vmem:[%s3049_s0 + $0x80] sm:$0xff] }
 0x423   :  { %985 = vmatpush1.msra.mxu0 %v2763_v7  ;;  %1056 = vmatpush1.msra.mxu1 %v3182_v14 }
 0x424   :  { %986 = vmatprep.subr.mxu0 %v3183_v15  ;;  %1057 = vmatprep.subr.mxu1 %v3184_v16  ;;  %v1511_v15 = vld [vmem:[%s3049_s0 + $0x88] sm:$0xff] }
 0x425   :  { %987 = vmatpush1.msra.mxu0 %v3185_v17  ;;  %1020 = vmatprep.mubr.f32.mxu0 %v3186_v18 }
 0x426   :  { %1058 = vmatpush1.msra.mxu1 %v3187_v19  ;;  %1091 = vmatprep.mubr.f32.mxu1 %v3186_v18 }
 0x427   :  { %1131 = vmatprep.subr.mxu0 %v2454_v20  ;;  %1202 = vmatprep.subr.mxu1 %v2777_v10 }
 0x4c6   :  { %v847_v14 = vpop.f32.mrf.mxu0  ;;  %v918_v54 = vpop.f32.mrf.mxu1 }
 0x4c7   :  { %v923_v16 = vadd.f32 %v1510_v12, %v847_v14  ;;  %v925_v59 = vadd.f32 %v1512_v63, %v918_v54 }
 0x4c8   :  { %v849_v17 = vpop.f32.mrf.mxu0  ;;  %v920_v50 = vpop.f32.mrf.mxu1 }
 0x4c9   :  { %v1514_v19 = vmul.f32 -1.442695, %v923_v16  ;;  %v924_v44 = vadd.f32 %v1511_v15, %v849_v17  ;;  %v1516_v10 = vmul.f32 -1.442695, %v925_v59  ;;  %v926_v12 = vadd.f32 %v1513_v57, %v920_v50  ;;  %v2850_v57 = vld [vmem:[%s3048_s1 + $0xb0] sm:$0xff]  ;;  %v2857_v50 = vld [vmem:[%s3048_s1 + $0x98] sm:$0xff] }
 0x4cb   :  { %1603 = vpow2.f32 %v1514_v19  ;;  %v1515_v46 = vmul.f32 -1.442695, %v924_v44 }
 0x4cd   :  { %1605 = vpow2.f32 %v1515_v46 }
 0x4ce   :  { %1607 = vpow2.f32 %v1516_v10 }
 0x4d8   :  { %v1604_v20 = vpop.eup %1603 }
 0x4d9   :  { %v936_v14 = vadd.f32 1.0, %v1604_v20 }
 0x4da   :  { %v1606_v16 = vpop.eup %1605 }
 0x4db   :  { %1609 = vrcp.f32 %v936_v14  ;;  %v937_v15 = vadd.f32 1.0, %v1606_v16  ;;  %v1608_v17 = vpop.eup %1607  ;;  %v2871_v14 = vld [vmem:[%s3048_s1 + $0x78] sm:$0xff]  ;;  %v2878_v16 = vld [vmem:[%s3048_s1 + $0x70] sm:$0xff] }
 0x4dc   :  { %1611 = vtanh.f32 %v926_v12  ;;  %v938_v63 = vadd.f32 1.0, %v1608_v17  ;;  %v2864_v12 = vld [vmem:[%s3048_s1 + $0x90] sm:$0xff]  ;;  %3197 = vst [vmem:[#allocation15_spill] sm:$0xff] %v2871_v14  ;;  %3198 = vst [vmem:[#allocation8_spill] sm:$0xff] %v2878_v16 }
 0x4dd   :  { %1613 = vrcp.f32 %v937_v15  ;;  %v2885_v15 = vld [vmem:[%s3048_s1 + $0x58] sm:$0xff]  ;;  %v2892_v17 = vld [vmem:[%s3048_s1 + $0x50] sm:$0xff] }
 0x4de   :  { %1615 = vrcp.f32 %v938_v63  ;;  %3199 = vst [vmem:[#allocation16_spill] sm:$0xff] %v2885_v15  ;;  %3200 = vst [vmem:[#allocation9_spill] sm:$0xff] %v2892_v17  ;;  %v2912_v63 = vld [vmem:[%s3048_s1 + $0x8] sm:$0xff] }
 0x4df   :  { %3204 = vst [vmem:[#allocation18_spill] sm:$0xff] %v2912_v63 }
 0x4e8   :  { %v1610_v19 = vpop.eup %1609 }
 0x4e9   :  { %v1612_v44 = vpop.eup %1611 }
 0x4ea   :  { %v1614_v46 = vpop.eup %1613  ;;  %v947_v18 = vmul.f32 %v1612_v44, %v1610_v19  ;;  %v2899_v19 = vld [vmem:[%s3048_s1 + $0x38] sm:$0xff]  ;;  %v3202_v44 = vld [vmem:[#allocation14_spill] sm:$0xff] }
 0x4eb   :  { %v946_v54 = vmul.f32 %v1614_v46, %v2471_v9  ;;  %v1616_v20 = vpop.eup %1615  ;;  %v2843_v9 = vld [vmem:[%s3048_s1 + $0xb8] sm:$0xff]  ;;  %3201 = vst [vmem:[#allocation17_spill] sm:$0xff] %v2899_v19  ;;  %v2906_v46 = vld [vmem:[%s3048_s1 + $0x30] sm:$0xff] }
 0x4ec   :  { %3203 = vst [vmem:[#allocation11_spill] sm:$0xff] %v2906_v46 }
 0x4ed   :  { %v2793_v7 = vadd.f32 %v947_v18, %v946_v54  ;;  %v2836_v18 = vld [vmem:[%s3048_s1 + $0xd0] sm:$0xff]  ;;  %v2918_v54 = vld [vmem:[%s3048_s1 + $0x18] sm:$0xff] }
 0x4ee   :  { %3205 = vst [vmem:[#allocation13_spill] sm:$0xff] %v2918_v54 }
 0x4ef   :  { %1617 = vtanh.f32 %v2793_v7 }
 0x4fc   :  { %v1618_v59 = vpop.eup %1617 }
 0x4fd   :  { %v950_v10 = vmul.f32 %v1618_v59, %v1616_v20  ;;  %v2924_v20 = vld [vmem:[%s3048_s1] sm:$0xff]  ;;  %v3207_v59 = vmov 0.0  }
 0x4fe   :  { %3206 = vst [vmem:[#allocation19_spill] sm:$0xff] %v2924_v20 }
 0x4ff   :  { %1021 = vmatmul.mubr.f32.vlgmr.msra.gmra.mxu0 %v950_v10  ;;  %1092 = vmatmul.mubr.f32.vlgmr.msra.gmra.mxu1 %v950_v10  ;;  %v2931_v10 = vld [vmem:[%s3048_s1 + $0x10] sm:$0xff] }
 0x500   :  { %1132 = vmatpush1.msra.mxu0 %v2477_v0  ;;  %1203 = vmatpush1.msra.mxu1 %v2483_v55  ;;  %3208 = vst [vmem:[#allocation3_spill] sm:$0xff] %v2931_v10 }
 0x501   :  { %1133 = vmatprep.subr.mxu0 %v2489_v48  ;;  %1204 = vmatprep.subr.mxu1 %v2495_v52 }
 0x502   :  { %1134 = vmatpush1.msra.mxu0 %v2501_v60  ;;  %1205 = vmatpush1.msra.mxu1 %v2507_v61 }
 0x503   :  { %1135 = vmatprep.subr.mxu0 %v2513_v3  ;;  %1206 = vmatprep.subr.mxu1 %v2519_v56 }
 0x504   :  { %1136 = vmatpush1.msra.mxu0 %v2525_v62  ;;  %1207 = vmatpush1.msra.mxu1 %v2531_v58 }
 0x505   :  { %1137 = vmatprep.subr.mxu0 %v2537_v1  ;;  %1208 = vmatprep.subr.mxu1 %v2543_v4 }
 0x506   :  { %1138 = vmatpush1.msra.mxu0 %v2549_v6  ;;  %1209 = vmatpush1.msra.mxu1 %v2555_v8 }
 0x507   :  { %1139 = vmatprep.subr.mxu0 %v2561_v11  ;;  %1210 = vmatprep.subr.mxu1 %v2567_v13 }
 0x508   :  { %1140 = vmatpush1.msra.mxu0 %v2573_v21  ;;  %1211 = vmatpush1.msra.mxu1 %v2579_v22 }
 0x509   :  { %1141 = vmatprep.subr.mxu0 %v2585_v23  ;;  %1212 = vmatprep.subr.mxu1 %v2591_v24 }
 0x50a   :  { %1142 = vmatpush1.msra.mxu0 %v2597_v25  ;;  %1213 = vmatpush1.msra.mxu1 %v2603_v26 }
 0x50b   :  { %1143 = vmatprep.subr.mxu0 %v2609_v27  ;;  %1214 = vmatprep.subr.mxu1 %v2615_v28 }
 0x50c   :  { %1144 = vmatpush1.msra.mxu0 %v2621_v29  ;;  %1215 = vmatpush1.msra.mxu1 %v2627_v30 }
 0x50d   :  { %1145 = vmatprep.subr.mxu0 %v2633_v31  ;;  %1216 = vmatprep.subr.mxu1 %v2639_v32 }
 0x50e   :  { %1146 = vmatpush1.msra.mxu0 %v2645_v33  ;;  %1217 = vmatpush1.msra.mxu1 %v2651_v34 }
 0x50f   :  { %1147 = vmatprep.subr.mxu0 %v2657_v35  ;;  %1218 = vmatprep.subr.mxu1 %v2663_v36 }
 0x510   :  { %1148 = vmatpush1.msra.mxu0 %v2669_v37  ;;  %1219 = vmatpush1.msra.mxu1 %v2675_v38 }
 0x511   :  { %1149 = vmatprep.subr.mxu0 %v2681_v39  ;;  %1220 = vmatprep.subr.mxu1 %v2687_v40 }
 0x512   :  { %1150 = vmatpush1.msra.mxu0 %v2693_v41  ;;  %1221 = vmatpush1.msra.mxu1 %v2836_v18 }
 0x513   :  { %1151 = vmatprep.subr.mxu0 %v2700_v42  ;;  %1222 = vmatprep.subr.mxu1 %v2843_v9 }
 0x514   :  { %1152 = vmatpush1.msra.mxu0 %v2707_v43  ;;  %1223 = vmatpush1.msra.mxu1 %v2850_v57 }
 0x515   :  { %1153 = vmatprep.subr.mxu0 %v2714_v45  ;;  %1224 = vmatprep.subr.mxu1 %v2857_v50 }
 0x516   :  { %1154 = vmatpush1.msra.mxu0 %v2721_v47  ;;  %1225 = vmatpush1.msra.mxu1 %v2864_v12 }
 0x517   :  { %1155 = vmatprep.subr.mxu0 %v2728_v49  ;;  %1226 = vmatprep.subr.mxu1 %v2871_v14 }
 0x518   :  { %1156 = vmatpush1.msra.mxu0 %v2735_v51  ;;  %1227 = vmatpush1.msra.mxu1 %v2878_v16 }
 0x519   :  { %1157 = vmatprep.subr.mxu0 %v2742_v53  ;;  %1228 = vmatprep.subr.mxu1 %v2885_v15  ;;  %v1520_v15 = vld [vmem:[%s3049_s0 + $0xb8] sm:$0xff] }
 0x51a   :  { %1158 = vmatpush1.msra.mxu0 %v2749_v2  ;;  %1229 = vmatpush1.msra.mxu1 %v2892_v17 }
 0x51b   :  { %1159 = vmatprep.subr.mxu0 %v2756_v5  ;;  %1230 = vmatprep.subr.mxu1 %v2899_v19 }
 0x51c   :  { %1160 = vmatpush1.msra.mxu0 %v3202_v44  ;;  %1231 = vmatpush1.msra.mxu1 %v2906_v46  ;;  %v1517_v46 = vld [vmem:[%s3049_s0 + $0xa0] sm:$0xff]  ;;  %v1518_v44 = vld [vmem:[%s3049_s0 + $0xa8] sm:$0xff] }
 0x51d   :  { %1161 = vmatprep.subr.mxu0 %v2912_v63  ;;  %1232 = vmatprep.subr.mxu1 %v2918_v54  ;;  %v3209_v63 = vld [vmem:[#allocation2_spill] sm:$0xff]  ;;  %v3210_v54 = vld [vmem:[#allocation7_spill] sm:$0xff] }
 0x51e   :  { %1162 = vmatpush1.msra.mxu0 %v2924_v20  ;;  %1195 = vmatprep.mubr.f32.mxu0 %v3207_v59 }
 0x51f   :  { %1233 = vmatpush1.msra.mxu1 %v2931_v10  ;;  %1266 = vmatprep.mubr.f32.mxu1 %v3207_v59 }
 0x520   :  { %1306 = vmatprep.subr.mxu0 %v3209_v63  ;;  %1377 = vmatprep.subr.mxu1 %v3210_v54  ;;  %v1519_v63 = vld [vmem:[%s3049_s0 + $0xb0] sm:$0xff] }
 0x5bf   :  { %v1022_v20 = vpop.f32.mrf.mxu0  ;;  %v1093_v54 = vpop.f32.mrf.mxu1 }
 0x5c0   :  { %v1098_v19 = vadd.f32 %v1517_v46, %v1022_v20  ;;  %v1100_v59 = vadd.f32 %v1519_v63, %v1093_v54 }
 0x5c1   :  { %v1024_v5 = vpop.f32.mrf.mxu0  ;;  %v1095_v53 = vpop.f32.mrf.mxu1 }
 0x5c2   :  { %v1521_v17 = vmul.f32 -1.442695, %v1098_v19  ;;  %v1099_v2 = vadd.f32 %v1518_v44, %v1024_v5  ;;  %v1523_v16 = vmul.f32 -1.442695, %v1100_v59  ;;  %v1101_v46 = vadd.f32 %v1520_v15, %v1095_v53  ;;  %v1532_v59 = vld [vmem:[%s3049_s0 + $0xe8] sm:$0xff] }
 0x5c4   :  { %1619 = vpow2.f32 %v1521_v17  ;;  %v1522_v10 = vmul.f32 -1.442695, %v1099_v2 }
 0x5c6   :  { %1621 = vpow2.f32 %v1522_v10 }
 0x5c7   :  { %1623 = vpow2.f32 %v1523_v16 }
 0x5d1   :  { %v1620_v51 = vpop.eup %1619 }
 0x5d2   :  { %v1111_v20 = vadd.f32 1.0, %v1620_v51 }
 0x5d3   :  { %v1622_v19 = vpop.eup %1621 }
 0x5d4   :  { %1625 = vrcp.f32 %v1111_v20  ;;  %v1112_v2 = vadd.f32 1.0, %v1622_v19  ;;  %v1624_v5 = vpop.eup %1623 }
 0x5d5   :  { %1627 = vtanh.f32 %v1101_v46  ;;  %v1113_v63 = vadd.f32 1.0, %v1624_v5  ;;  %v1533_v5 = vld [vmem:[%s3049_s0 + $0xf0] sm:$0xff] }
 0x5d6   :  { %1629 = vrcp.f32 %v1112_v2 }
 0x5d7   :  { %1631 = vrcp.f32 %v1113_v63 }
 0x5e1   :  { %v1626_v17 = vpop.eup %1625 }
 0x5e2   :  { %v1628_v44 = vpop.eup %1627 }
 0x5e3   :  { %v1630_v10 = vpop.eup %1629  ;;  %v1122_v14 = vmul.f32 %v1628_v44, %v1626_v17 }
 0x5e4   :  { %v1121_v54 = vmul.f32 %v1630_v10, %v2793_v7  ;;  %v1632_v51 = vpop.eup %1631  ;;  %v1534_v10 = vld [vmem:[%s3049_s0 + $0xf8] sm:$0xff] }
 0x5e6   :  { %v2950_v49 = vadd.f32 %v1122_v14, %v1121_v54  ;;  %v1531_v14 = vld [vmem:[%s3049_s0 + $0xe0] sm:$0xff] }
 0x5e8   :  { %1633 = vtanh.f32 %v2950_v49 }
 0x5f5   :  { %v1634_v53 = vpop.eup %1633 }
 0x5f6   :  { %v1125_v16 = vmul.f32 %v1634_v53, %v1632_v51 }
 0x5f8   :  { %1196 = vmatmul.mubr.f32.vlgmr.msra.gmra.mxu0 %v1125_v16  ;;  %1267 = vmatmul.mubr.f32.vlgmr.msra.gmra.mxu1 %v1125_v16 }
 0x5f9   :  { %1307 = vmatpush1.msra.mxu0 %v2477_v0  ;;  %1378 = vmatpush1.msra.mxu1 %v2483_v55  ;;  %v3211_v0 = vld [vmem:[#allocation4_spill] sm:$0xff]  ;;  %v3212_v55 = vld [vmem:[#allocation15_spill] sm:$0xff] }
 0x5fa   :  { %1308 = vmatprep.subr.mxu0 %v2489_v48  ;;  %1379 = vmatprep.subr.mxu1 %v2495_v52  ;;  %v3213_v48 = vld [vmem:[#allocation10_spill] sm:$0xff]  ;;  %v3214_v52 = vld [vmem:[#allocation8_spill] sm:$0xff] }
 0x5fb   :  { %1309 = vmatpush1.msra.mxu0 %v2501_v60  ;;  %1380 = vmatpush1.msra.mxu1 %v2507_v61  ;;  %v3215_v60 = vld [vmem:[#allocation5_spill] sm:$0xff]  ;;  %v3216_v61 = vld [vmem:[#allocation16_spill] sm:$0xff] }
 0x5fc   :  { %1310 = vmatprep.subr.mxu0 %v2513_v3  ;;  %1381 = vmatprep.subr.mxu1 %v2519_v56  ;;  %v3217_v3 = vld [vmem:[#allocation12_spill] sm:$0xff]  ;;  %v3218_v56 = vld [vmem:[#allocation9_spill] sm:$0xff] }
 0x5fd   :  { %1311 = vmatpush1.msra.mxu0 %v2525_v62  ;;  %1382 = vmatpush1.msra.mxu1 %v2531_v58  ;;  %v3219_v62 = vld [vmem:[#allocation6_spill] sm:$0xff]  ;;  %v3220_v58 = vld [vmem:[#allocation17_spill] sm:$0xff] }
 0x5fe   :  { %1312 = vmatprep.subr.mxu0 %v2537_v1  ;;  %1383 = vmatprep.subr.mxu1 %v2543_v4  ;;  %v3221_v1 = vld [vmem:[#allocation14_spill] sm:$0xff]  ;;  %v3222_v4 = vld [vmem:[#allocation11_spill] sm:$0xff] }
 0x5ff   :  { %1313 = vmatpush1.msra.mxu0 %v2549_v6  ;;  %1384 = vmatpush1.msra.mxu1 %v2555_v8  ;;  %v3223_v6 = vld [vmem:[#allocation18_spill] sm:$0xff]  ;;  %v3224_v8 = vld [vmem:[#allocation13_spill] sm:$0xff] }
 0x600   :  { %1314 = vmatprep.subr.mxu0 %v2561_v11  ;;  %1385 = vmatprep.subr.mxu1 %v2567_v13  ;;  %v3225_v11 = vld [vmem:[#allocation19_spill] sm:$0xff]  ;;  %v3226_v13 = vmov 0.0  }
 0x601   :  { %1315 = vmatpush1.msra.mxu0 %v2573_v21  ;;  %1386 = vmatpush1.msra.mxu1 %v2579_v22  ;;  %v3227_v21 = vld [vmem:[#allocation3_spill] sm:$0xff]  ;;  %v1524_v22 = vld [vmem:[%s3049_s0 + $0xc0] sm:$0xff] }
 0x602   :  { %1316 = vmatprep.subr.mxu0 %v2585_v23  ;;  %1387 = vmatprep.subr.mxu1 %v2591_v24  ;;  %v1525_v24 = vld [vmem:[%s3049_s0 + $0xc8] sm:$0xff] }
 0x603   :  { %1317 = vmatpush1.msra.mxu0 %v2597_v25  ;;  %1388 = vmatpush1.msra.mxu1 %v2603_v26 }
 0x604   :  { %1318 = vmatprep.subr.mxu0 %v2609_v27  ;;  %1389 = vmatprep.subr.mxu1 %v2615_v28 }
 0x605   :  { %1319 = vmatpush1.msra.mxu0 %v2621_v29  ;;  %1390 = vmatpush1.msra.mxu1 %v2627_v30  ;;  %v1526_v30 = vld [vmem:[%s3049_s0 + $0xd0] sm:$0xff] }
 0x606   :  { %1320 = vmatprep.subr.mxu0 %v2633_v31  ;;  %1391 = vmatprep.subr.mxu1 %v2639_v32 }
 0x607   :  { %1321 = vmatpush1.msra.mxu0 %v2645_v33  ;;  %1392 = vmatpush1.msra.mxu1 %v2651_v34  ;;  %v1527_v33 = vld [vmem:[%s3049_s0 + $0xd8] sm:$0xff] }
 0x608   :  { %1322 = vmatprep.subr.mxu0 %v2657_v35  ;;  %1393 = vmatprep.subr.mxu1 %v2663_v36 }
 0x609   :  { %1323 = vmatpush1.msra.mxu0 %v2669_v37  ;;  %1394 = vmatpush1.msra.mxu1 %v2675_v38 }
 0x60a   :  { %1324 = vmatprep.subr.mxu0 %v2681_v39  ;;  %1395 = vmatprep.subr.mxu1 %v2687_v40 }
 0x60b   :  { %1325 = vmatpush1.msra.mxu0 %v2693_v41  ;;  %1396 = vmatpush1.msra.mxu1 %v2836_v18 }
 0x60c   :  { %1326 = vmatprep.subr.mxu0 %v2700_v42  ;;  %1397 = vmatprep.subr.mxu1 %v2843_v9 }
 0x60d   :  { %1327 = vmatpush1.msra.mxu0 %v2707_v43  ;;  %1398 = vmatpush1.msra.mxu1 %v2850_v57 }
 0x60e   :  { %1328 = vmatprep.subr.mxu0 %v2714_v45  ;;  %1399 = vmatprep.subr.mxu1 %v2857_v50 }
 0x60f   :  { %1329 = vmatpush1.msra.mxu0 %v2721_v47  ;;  %1400 = vmatpush1.msra.mxu1 %v2864_v12 }
 0x610   :  { %1330 = vmatprep.subr.mxu0 %v3211_v0  ;;  %1401 = vmatprep.subr.mxu1 %v3212_v55 }
 0x611   :  { %1331 = vmatpush1.msra.mxu0 %v3213_v48  ;;  %1402 = vmatpush1.msra.mxu1 %v3214_v52 }
 0x612   :  { %1332 = vmatprep.subr.mxu0 %v3215_v60  ;;  %1403 = vmatprep.subr.mxu1 %v3216_v61 }
 0x613   :  { %1333 = vmatpush1.msra.mxu0 %v3217_v3  ;;  %1404 = vmatpush1.msra.mxu1 %v3218_v56 }
 0x614   :  { %1334 = vmatprep.subr.mxu0 %v3219_v62  ;;  %1405 = vmatprep.subr.mxu1 %v3220_v58 }
 0x615   :  { %1335 = vmatpush1.msra.mxu0 %v3221_v1  ;;  %1406 = vmatpush1.msra.mxu1 %v3222_v4 }
 0x616   :  { %1336 = vmatprep.subr.mxu0 %v3223_v6  ;;  %1407 = vmatprep.subr.mxu1 %v3224_v8 }
 0x617   :  { %1337 = vmatpush1.msra.mxu0 %v3225_v11  ;;  %1370 = vmatprep.mubr.f32.mxu0 %v3226_v13 }
 0x618   :  { %1408 = vmatpush1.msra.mxu1 %v3227_v21  ;;  %1441 = vmatprep.mubr.f32.mxu1 %v3226_v13 }
 0x6b8   :  { %v1197_v23 = vpop.f32.mrf.mxu0  ;;  %v1268_v31 = vpop.f32.mrf.mxu1 }
 0x6b9   :  { %v1273_v25 = vadd.f32 %v1524_v22, %v1197_v23  ;;  %v1275_v32 = vadd.f32 %v1526_v30, %v1268_v31 }
 0x6ba   :  { %v1199_v26 = vpop.f32.mrf.mxu0  ;;  %v1270_v34 = vpop.f32.mrf.mxu1 }
 0x6bb   :  { %v1528_v27 = vmul.f32 -1.442695, %v1273_v25  ;;  %v1274_v28 = vadd.f32 %v1525_v24, %v1199_v26  ;;  %v1530_v35 = vmul.f32 -1.442695, %v1275_v32  ;;  %v1276_v37 = vadd.f32 %v1527_v33, %v1270_v34 }
 0x6bd   :  { %1635 = vpow2.f32 %v1528_v27  ;;  %v1529_v29 = vmul.f32 -1.442695, %v1274_v28 }
 0x6bf   :  { %1637 = vpow2.f32 %v1529_v29 }
 0x6c0   :  { %1639 = vpow2.f32 %v1530_v35 }
 0x6ca   :  { %v1636_v36 = vpop.eup %1635 }
 0x6cb   :  { %v1286_v38 = vadd.f32 1.0, %v1636_v36 }
 0x6cc   :  { %v1638_v39 = vpop.eup %1637 }
 0x6cd   :  { %1641 = vrcp.f32 %v1286_v38  ;;  %v1287_v40 = vadd.f32 1.0, %v1638_v39  ;;  %v1640_v41 = vpop.eup %1639 }
 0x6ce   :  { %1643 = vtanh.f32 %v1276_v37  ;;  %v1288_v47 = vadd.f32 1.0, %v1640_v41 }
 0x6cf   :  { %1645 = vrcp.f32 %v1287_v40 }
 0x6d0   :  { %1647 = vrcp.f32 %v1288_v47 }
 0x6da   :  { %v1642_v42 = vpop.eup %1641 }
 0x6db   :  { %v1644_v43 = vpop.eup %1643 }
 0x6dc   :  { %v1646_v45 = vpop.eup %1645  ;;  %v1297_v18 = vmul.f32 %v1644_v43, %v1642_v42 }
 0x6dd   :  { %v1296_v7 = vmul.f32 %v1646_v45, %v2950_v49  ;;  %v1648_v57 = vpop.eup %1647 }
 0x6df   :  { %v1298_v9 = vadd.f32 %v1297_v18, %v1296_v7 }
 0x6e1   :  { %1649 = vtanh.f32 %v1298_v9 }
 0x6ee   :  { %v1650_v50 = vpop.eup %1649 }
 0x6ef   :  { %v1300_v12 = vmul.f32 %v1650_v50, %v1648_v57 }
 0x6f1   :  { %1371 = vmatmul.mubr.f32.vlgmr.msra.gmra.mxu0 %v1300_v12  ;;  %1442 = vmatmul.mubr.f32.vlgmr.msra.gmra.mxu1 %v1300_v12 }
 0x7b1   :  { %v1372_v15 = vpop.f32.mrf.mxu0  ;;  %v1443_v17 = vpop.f32.mrf.mxu1 }
 0x7b2   :  { %v1448_v46 = vadd.f32 %v1531_v14, %v1372_v15  ;;  %v1450_v44 = vadd.f32 %v1533_v5, %v1443_v17 }
 0x7b3   :  { %v1374_v49 = vpop.f32.mrf.mxu0  ;;  %v1445_v63 = vpop.f32.mrf.mxu1 }
 0x7b4   :  { %v1535_v20 = vmul.f32 -1.442695, %v1448_v46  ;;  %v1449_v19 = vadd.f32 %v1532_v59, %v1374_v49  ;;  %v1537_v54 = vmul.f32 -1.442695, %v1450_v44  ;;  %v1451_v53 = vadd.f32 %v1534_v10, %v1445_v63 }
 0x7b6   :  { %1651 = vpow2.f32 %v1535_v20  ;;  %v1536_v2 = vmul.f32 -1.442695, %v1449_v19 }
 0x7b8   :  { %1653 = vpow2.f32 %v1536_v2 }
 0x7b9   :  { %1655 = vpow2.f32 %v1537_v54 }
 0x7c3   :  { %v1652_v51 = vpop.eup %1651 }
 0x7c4   :  { %v1461_v16 = vadd.f32 1.0, %v1652_v51 }
 0x7c5   :  { %v1654_v0 = vpop.eup %1653 }
 0x7c6   :  { %1657 = vrcp.f32 %v1461_v16  ;;  %v1462_v55 = vadd.f32 1.0, %v1654_v0  ;;  %v1656_v48 = vpop.eup %1655 }
 0x7c7   :  { %1659 = vtanh.f32 %v1451_v53  ;;  %v1463_v3 = vadd.f32 1.0, %v1656_v48 }
 0x7c8   :  { %1661 = vrcp.f32 %v1462_v55 }
 0x7c9   :  { %1663 = vrcp.f32 %v1463_v3 }
 0x7d3   :  { %v1658_v52 = vpop.eup %1657 }
 0x7d4   :  { %v1660_v60 = vpop.eup %1659 }
 0x7d5   :  { %v1662_v61 = vpop.eup %1661  ;;  %v1472_v62 = vmul.f32 %v1660_v60, %v1658_v52 }
 0x7d6   :  { %v1471_v56 = vmul.f32 %v1662_v61, %v1298_v9  ;;  %v1664_v1 = vpop.eup %1663 }
 0x7d8   :  { %v1473_v58 = vadd.f32 %v1472_v62, %v1471_v56 }
 0x7da   :  { %1665 = vtanh.f32 %v1473_v58  ;;  %1477 = vst [vmem:[%s3050_s3] sm:$0xff] %v1473_v58 }
 0x7e7   :  { %v1666_v4 = vpop.eup %1665 }
 0x7e8   :  { %v1475_v6 = vmul.f32 %v1666_v4, %v1664_v1 }
 0x7ea   :  { %1476 = vst [vmem:[%s3051_s2] sm:$0xff] %v1475_v6 }

// kernel: seq2seq_forward.8
= control target key start
LH: loop header
LB: loop body
LE: loop exit
PB: predicated region body
PF: predicated region fallthrough
CT: control target
= control target key end

     0   :  { %v3530_v3 = vmov 0.0   ;;  %s3525_s3 = inlined_call_operand.vmem [shape: f32[128,512], index: 3, kind: input, shape index: {}]   ;;  %s3526_s1 = inlined_call_operand.vmem [shape: f32[8,128], index: 1, kind: input, shape index: {}]   ;;  %s3527_s0 = inlined_call_operand.vmem [shape: f32[8,8,512], index: 0, kind: input, shape index: {}]   ;;  %s3528_s2 = inlined_call_operand.vmem [shape: f32[8,128], index: 2, kind: input, shape index: {}]   ;;  %s3529_s4 = inlined_call_operand.vmem [shape: f32[8,8,128], index: 4, kind: output, shape index: {}]  }
   0x1   :  { %v2166_v0 = vld [vmem:[%s3525_s3 + $0x1e8] sm:$0xff]  ;;  %v2171_v1 = vld [vmem:[%s3525_s3 + $0x1e0] sm:$0xff]  ;;  %151 = vmatprep.mubr.f32.mxu0 %v3530_v3  ;;  %222 = vmatprep.mubr.f32.mxu1 %v3530_v3  ;;  %v2213_v9 = vld [vmem:[%s3525_s3 + $0x1f8] sm:$0xff] }
   0x2   :  { %3595 = vst [vmem:[#allocation2_spill] sm:$0xff] %v2166_v0  ;;  %v2176_v2 = vld [vmem:[%s3525_s3 + $0x1c8] sm:$0xff]  ;;  %87 = vmatprep.subr.mxu0 %v2166_v0  ;;  %v2184_v4 = vld [vmem:[%s3525_s3 + $0x1c0] sm:$0xff]  ;;  %3596 = vst [vmem:[#allocation3_spill] sm:$0xff] %v2213_v9  ;;  %158 = vmatprep.subr.mxu1 %v2213_v9 }
   0x3   :  { %88 = vmatpush1.msra.mxu0 %v2171_v1  ;;  %v2190_v5 = vld [vmem:[%s3525_s3 + $0x1a8] sm:$0xff]  ;;  %v2196_v6 = vld [vmem:[%s3525_s3 + $0x1a0] sm:$0xff]  ;;  %v2225_v11 = vld [vmem:[%s3525_s3 + $0x1f0] sm:$0xff] }
   0x4   :  { %89 = vmatprep.subr.mxu0 %v2176_v2  ;;  %v2202_v7 = vld [vmem:[%s3525_s3 + $0x188] sm:$0xff]  ;;  %v2208_v8 = vld [vmem:[%s3525_s3 + $0x180] sm:$0xff]  ;;  %159 = vmatpush1.msra.mxu1 %v2225_v11  ;;  %v2237_v13 = vld [vmem:[%s3525_s3 + $0x1d8] sm:$0xff] }
   0x5   :  { %90 = vmatpush1.msra.mxu0 %v2184_v4  ;;  %v2219_v10 = vld [vmem:[%s3525_s3 + $0x168] sm:$0xff]  ;;  %v2231_v12 = vld [vmem:[%s3525_s3 + $0x160] sm:$0xff]  ;;  %v2242_v14 = vld [vmem:[%s3525_s3 + $0x1d0] sm:$0xff]  ;;  %160 = vmatprep.subr.mxu1 %v2237_v13 }
   0x6   :  { %91 = vmatprep.subr.mxu0 %v2190_v5  ;;  %v2248_v15 = vld [vmem:[%s3525_s3 + $0x148] sm:$0xff]  ;;  %v2254_v16 = vld [vmem:[%s3525_s3 + $0x1b8] sm:$0xff]  ;;  %v2260_v17 = vld [vmem:[%s3525_s3 + $0x140] sm:$0xff]  ;;  %161 = vmatpush1.msra.mxu1 %v2242_v14 }
   0x7   :  { %92 = vmatpush1.msra.mxu0 %v2196_v6  ;;  %v2266_v18 = vld [vmem:[%s3525_s3 + $0x1b0] sm:$0xff]  ;;  %v2271_v19 = vld [vmem:[%s3525_s3 + $0x198] sm:$0xff]  ;;  %v2277_v20 = vld [vmem:[%s3525_s3 + $0x128] sm:$0xff]  ;;  %162 = vmatprep.subr.mxu1 %v2254_v16 }
   0x8   :  { %93 = vmatprep.subr.mxu0 %v2202_v7  ;;  %v2283_v21 = vld [vmem:[%s3525_s3 + $0x190] sm:$0xff]  ;;  %v2289_v22 = vld [vmem:[%s3525_s3 + $0x120] sm:$0xff]  ;;  %163 = vmatpush1.msra.mxu1 %v2266_v18  ;;  %v2295_v23 = vld [vmem:[%s3525_s3 + $0x178] sm:$0xff] }
   0x9   :  { %94 = vmatpush1.msra.mxu0 %v2208_v8  ;;  %v2301_v24 = vld [vmem:[%s3525_s3 + $0x108] sm:$0xff]  ;;  %164 = vmatprep.subr.mxu1 %v2271_v19  ;;  %v2307_v25 = vld [vmem:[%s3525_s3 + $0x170] sm:$0xff]  ;;  %v2313_v26 = vld [vmem:[%s3525_s3 + $0x100] sm:$0xff] }
   0xa   :  { %95 = vmatprep.subr.mxu0 %v2219_v10  ;;  %165 = vmatpush1.msra.mxu1 %v2283_v21  ;;  %v2319_v27 = vld [vmem:[%s3525_s3 + $0x158] sm:$0xff]  ;;  %v2325_v28 = vld [vmem:[%s3525_s3 + $0xe8] sm:$0xff]  ;;  %v2331_v29 = vld [vmem:[%s3525_s3 + $0x150] sm:$0xff] }
   0xb   :  { %96 = vmatpush1.msra.mxu0 %v2231_v12  ;;  %166 = vmatprep.subr.mxu1 %v2295_v23  ;;  %v2337_v30 = vld [vmem:[%s3525_s3 + $0xe0] sm:$0xff]  ;;  %v2343_v31 = vld [vmem:[%s3525_s3 + $0x138] sm:$0xff]  ;;  %v2349_v32 = vld [vmem:[%s3525_s3 + $0xc8] sm:$0xff] }
   0xc   :  { %97 = vmatprep.subr.mxu0 %v2248_v15  ;;  %167 = vmatpush1.msra.mxu1 %v2307_v25  ;;  %v2355_v33 = vld [vmem:[%s3525_s3 + $0x130] sm:$0xff]  ;;  %v2361_v34 = vld [vmem:[%s3525_s3 + $0xc0] sm:$0xff]  ;;  %v2367_v35 = vld [vmem:[%s3525_s3 + $0x118] sm:$0xff] }
   0xd   :  { %98 = vmatpush1.msra.mxu0 %v2260_v17  ;;  %168 = vmatprep.subr.mxu1 %v2319_v27  ;;  %v2373_v36 = vld [vmem:[%s3525_s3 + $0xa8] sm:$0xff]  ;;  %v2379_v37 = vld [vmem:[%s3525_s3 + $0x110] sm:$0xff]  ;;  %v2385_v38 = vld [vmem:[%s3525_s3 + $0xa0] sm:$0xff] }
   0xe   :  { %99 = vmatprep.subr.mxu0 %v2277_v20  ;;  %169 = vmatpush1.msra.mxu1 %v2331_v29  ;;  %v2391_v39 = vld [vmem:[%s3525_s3 + $0xf8] sm:$0xff]  ;;  %v2397_v40 = vld [vmem:[%s3525_s3 + $0x88] sm:$0xff]  ;;  %v2403_v41 = vld [vmem:[%s3525_s3 + $0xf0] sm:$0xff] }
   0xf   :  { %100 = vmatpush1.msra.mxu0 %v2289_v22  ;;  %170 = vmatprep.subr.mxu1 %v2343_v31  ;;  %v2409_v42 = vld [vmem:[%s3525_s3 + $0x80] sm:$0xff]  ;;  %v2415_v43 = vld [vmem:[%s3525_s3 + $0xd8] sm:$0xff]  ;;  %v2421_v44 = vld [vmem:[%s3525_s3 + $0x68] sm:$0xff] }
  0x10   :  { %101 = vmatprep.subr.mxu0 %v2301_v24  ;;  %171 = vmatpush1.msra.mxu1 %v2355_v33  ;;  %v2427_v45 = vld [vmem:[%s3525_s3 + $0xd0] sm:$0xff]  ;;  %v2433_v46 = vld [vmem:[%s3525_s3 + $0x60] sm:$0xff]  ;;  %v2439_v47 = vld [vmem:[%s3525_s3 + $0xb8] sm:$0xff] }
  0x11   :  { %102 = vmatpush1.msra.mxu0 %v2313_v26  ;;  %172 = vmatprep.subr.mxu1 %v2367_v35  ;;  %3597 = vst [vmem:[#allocation4_spill] sm:$0xff] %v2433_v46  ;;  %v2445_v48 = vld [vmem:[%s3525_s3 + $0x48] sm:$0xff]  ;;  %v2451_v49 = vld [vmem:[%s3525_s3 + $0xb0] sm:$0xff]  ;;  %v2457_v50 = vld [vmem:[%s3525_s3 + $0x40] sm:$0xff] }
  0x12   :  { %103 = vmatprep.subr.mxu0 %v2325_v28  ;;  %173 = vmatpush1.msra.mxu1 %v2379_v37  ;;  %3598 = vst [vmem:[#allocation5_spill] sm:$0xff] %v2445_v48  ;;  %3599 = vst [vmem:[#allocation6_spill] sm:$0xff] %v2457_v50  ;;  %v2463_v51 = vld [vmem:[%s3525_s3 + $0x98] sm:$0xff]  ;;  %v2469_v52 = vld [vmem:[%s3525_s3 + $0x28] sm:$0xff] }
  0x13   :  { %104 = vmatpush1.msra.mxu0 %v2337_v30  ;;  %174 = vmatprep.subr.mxu1 %v2391_v39  ;;  %3600 = vst [vmem:[#allocation7_spill] sm:$0xff] %v2469_v52  ;;  %v2475_v53 = vld [vmem:[%s3525_s3 + $0x90] sm:$0xff]  ;;  %v2481_v54 = vld [vmem:[%s3525_s3 + $0x20] sm:$0xff]  ;;  %v2487_v55 = vld [vmem:[%s3525_s3 + $0x78] sm:$0xff] }
  0x14   :  { %105 = vmatprep.subr.mxu0 %v2349_v32  ;;  %175 = vmatpush1.msra.mxu1 %v2403_v41  ;;  %3601 = vst [vmem:[#allocation8_spill] sm:$0xff] %v2481_v54  ;;  %v2493_v56 = vld [vmem:[%s3525_s3 + $0x8] sm:$0xff]  ;;  %v2499_v57 = vld [vmem:[%s3525_s3 + $0x70] sm:$0xff]  ;;  %v2505_v58 = vld [vmem:[%s3525_s3] sm:$0xff] }
  0x15   :  { %106 = vmatpush1.msra.mxu0 %v2361_v34  ;;  %176 = vmatprep.subr.mxu1 %v2415_v43  ;;  %3602 = vst [vmem:[#allocation9_spill] sm:$0xff] %v2493_v56  ;;  %3603 = vst [vmem:[#allocation10_spill] sm:$0xff] %v2499_v57  ;;  %v2511_v59 = vld [vmem:[%s3525_s3 + $0x58] sm:$0xff]  ;;  %v17_v60 = vld [vmem:[%s3526_s1] sm:$0xff] }
  0x16   :  { %107 = vmatprep.subr.mxu0 %v2373_v36  ;;  %177 = vmatpush1.msra.mxu1 %v2427_v45  ;;  %3604 = vst [vmem:[#allocation11_spill] sm:$0xff] %v2505_v58  ;;  %3605 = vst [vmem:[#allocation12_spill] sm:$0xff] %v2511_v59  ;;  %v2521_v61 = vld [vmem:[%s3525_s3 + $0x50] sm:$0xff]  ;;  %v2528_v62 = vld [vmem:[%s3525_s3 + $0x38] sm:$0xff] }
  0x17   :  { %108 = vmatpush1.msra.mxu0 %v2385_v38  ;;  %178 = vmatprep.subr.mxu1 %v2439_v47  ;;  %3606 = vst [vmem:[#allocation13_spill] sm:$0xff] %v2521_v61  ;;  %3607 = vst [vmem:[#allocation14_spill] sm:$0xff] %v2528_v62  ;;  %v2535_v63 = vld [vmem:[%s3525_s3 + $0x30] sm:$0xff]  ;;  %v2541_v3 = vld [vmem:[%s3525_s3 + $0x18] sm:$0xff] }
  0x18   :  { %109 = vmatprep.subr.mxu0 %v2397_v40  ;;  %179 = vmatpush1.msra.mxu1 %v2451_v49  ;;  %3608 = vst [vmem:[#allocation15_spill] sm:$0xff] %v2535_v63  ;;  %3609 = vst [vmem:[#allocation16_spill] sm:$0xff] %v2541_v3 }
  0x19   :  { %110 = vmatpush1.msra.mxu0 %v2409_v42  ;;  %180 = vmatprep.subr.mxu1 %v2463_v51 }
  0x1a   :  { %111 = vmatprep.subr.mxu0 %v2421_v44  ;;  %181 = vmatpush1.msra.mxu1 %v2475_v53 }
  0x1b   :  { %112 = vmatpush1.msra.mxu0 %v2433_v46  ;;  %182 = vmatprep.subr.mxu1 %v2487_v55 }
  0x1c   :  { %113 = vmatprep.subr.mxu0 %v2445_v48  ;;  %183 = vmatpush1.msra.mxu1 %v2499_v57 }
  0x1d   :  { %114 = vmatpush1.msra.mxu0 %v2457_v50  ;;  %184 = vmatprep.subr.mxu1 %v2511_v59 }
  0x1e   :  { %115 = vmatprep.subr.mxu0 %v2469_v52  ;;  %185 = vmatpush1.msra.mxu1 %v2521_v61 }
  0x1f   :  { %116 = vmatpush1.msra.mxu0 %v2481_v54  ;;  %186 = vmatprep.subr.mxu1 %v2528_v62 }
  0x20   :  { %117 = vmatprep.subr.mxu0 %v2493_v56  ;;  %187 = vmatpush1.msra.mxu1 %v2535_v63 }
  0x21   :  { %118 = vmatpush1.msra.mxu0 %v2505_v58  ;;  %v2547_v58 = vld [vmem:[%s3525_s3 + $0x10] sm:$0xff]  ;;  %188 = vmatprep.subr.mxu1 %v2541_v3 }
  0x22   :  { %152 = vmatmul.mubr.f32.vlgmr.msra.gmra.mxu0 %v17_v60  ;;  %3610 = vst [vmem:[#allocation17_spill] sm:$0xff] %v2547_v58  ;;  %327 = vmatprep.subr.mxu0 %v2166_v0 }
  0x23   :  { %328 = vmatpush1.msra.mxu0 %v2171_v1  ;;  %189 = vmatpush1.msra.mxu1 %v2547_v58 }
  0x24   :  { %329 = vmatprep.subr.mxu0 %v2176_v2  ;;  %223 = vmatmul.mubr.f32.vlgmr.msra.gmra.mxu1 %v17_v60  ;;  %v3611_v60 = vld [vmem:[#allocation11_spill] sm:$0xff] }
  0x25   :  { %330 = vmatpush1.msra.mxu0 %v2184_v4  ;;  %398 = vmatprep.subr.mxu1 %v2213_v9 }
  0x26   :  { %399 = vmatpush1.msra.mxu1 %v2225_v11  ;;  %331 = vmatprep.subr.mxu0 %v2190_v5 }
  0x27   :  { %400 = vmatprep.subr.mxu1 %v2237_v13  ;;  %332 = vmatpush1.msra.mxu0 %v2196_v6 }
  0x28   :  { %401 = vmatpush1.msra.mxu1 %v2242_v14  ;;  %333 = vmatprep.subr.mxu0 %v2202_v7 }
  0x29   :  { %402 = vmatprep.subr.mxu1 %v2254_v16  ;;  %334 = vmatpush1.msra.mxu0 %v2208_v8 }
  0x2a   :  { %403 = vmatpush1.msra.mxu1 %v2266_v18  ;;  %335 = vmatprep.subr.mxu0 %v2219_v10 }
  0x2b   :  { %404 = vmatprep.subr.mxu1 %v2271_v19  ;;  %336 = vmatpush1.msra.mxu0 %v2231_v12 }
  0x2c   :  { %405 = vmatpush1.msra.mxu1 %v2283_v21  ;;  %337 = vmatprep.subr.mxu0 %v2248_v15 }
  0x2d   :  { %406 = vmatprep.subr.mxu1 %v2295_v23  ;;  %338 = vmatpush1.msra.mxu0 %v2260_v17 }
  0x2e   :  { %407 = vmatpush1.msra.mxu1 %v2307_v25  ;;  %339 = vmatprep.subr.mxu0 %v2277_v20 }
  0x2f   :  { %408 = vmatprep.subr.mxu1 %v2319_v27  ;;  %340 = vmatpush1.msra.mxu0 %v2289_v22 }
  0x30   :  { %409 = vmatpush1.msra.mxu1 %v2331_v29  ;;  %341 = vmatprep.subr.mxu0 %v2301_v24 }
  0x31   :  { %410 = vmatprep.subr.mxu1 %v2343_v31  ;;  %342 = vmatpush1.msra.mxu0 %v2313_v26 }
  0x32   :  { %411 = vmatpush1.msra.mxu1 %v2355_v33  ;;  %343 = vmatprep.subr.mxu0 %v2325_v28 }
  0x33   :  { %412 = vmatprep.subr.mxu1 %v2367_v35  ;;  %344 = vmatpush1.msra.mxu0 %v2337_v30 }
  0x34   :  { %413 = vmatpush1.msra.mxu1 %v2379_v37  ;;  %345 = vmatprep.subr.mxu0 %v2349_v32 }
  0x35   :  { %414 = vmatprep.subr.mxu1 %v2391_v39  ;;  %346 = vmatpush1.msra.mxu0 %v2361_v34 }
  0x36   :  { %415 = vmatpush1.msra.mxu1 %v2403_v41  ;;  %347 = vmatprep.subr.mxu0 %v2373_v36 }
  0x37   :  { %416 = vmatprep.subr.mxu1 %v2415_v43  ;;  %348 = vmatpush1.msra.mxu0 %v2385_v38 }
  0x38   :  { %417 = vmatpush1.msra.mxu1 %v2427_v45  ;;  %349 = vmatprep.subr.mxu0 %v2397_v40 }
  0x39   :  { %418 = vmatprep.subr.mxu1 %v2439_v47  ;;  %350 = vmatpush1.msra.mxu0 %v2409_v42 }
  0x3a   :  { %419 = vmatpush1.msra.mxu1 %v2451_v49  ;;  %351 = vmatprep.subr.mxu0 %v2421_v44 }
  0x3b   :  { %420 = vmatprep.subr.mxu1 %v2463_v51  ;;  %352 = vmatpush1.msra.mxu0 %v2433_v46 }
  0x3c   :  { %421 = vmatpush1.msra.mxu1 %v2475_v53  ;;  %353 = vmatprep.subr.mxu0 %v2445_v48  ;;  %v3612_v48 = vmov 0.0  }
  0x3d   :  { %422 = vmatprep.subr.mxu1 %v2487_v55  ;;  %354 = vmatpush1.msra.mxu0 %v2457_v50 }
  0x3e   :  { %423 = vmatpush1.msra.mxu1 %v2499_v57  ;;  %355 = vmatprep.subr.mxu0 %v2469_v52 }
  0x3f   :  { %424 = vmatprep.subr.mxu1 %v2511_v59  ;;  %356 = vmatpush1.msra.mxu0 %v2481_v54 }
  0x40   :  { %425 = vmatpush1.msra.mxu1 %v2521_v61  ;;  %357 = vmatprep.subr.mxu0 %v2493_v56  ;;  %v19_v56 = vld [vmem:[%s3527_s0] sm:$0xff]  ;;  %v22_v61 = vld [vmem:[%s3527_s0 + $0x18] sm:$0xff] }
  0x41   :  { %426 = vmatprep.subr.mxu1 %v2528_v62  ;;  %358 = vmatpush1.msra.mxu0 %v3611_v60  ;;  %v20_v60 = vld [vmem:[%s3527_s0 + $0x8] sm:$0xff] }
  0x42   :  { %427 = vmatpush1.msra.mxu1 %v2535_v63  ;;  %391 = vmatprep.mubr.f32.mxu0 %v3612_v48 }
  0x43   :  { %428 = vmatprep.subr.mxu1 %v2541_v3  ;;  %462 = vmatprep.mubr.f32.mxu1 %v3612_v48 }
  0x44   :  { %429 = vmatpush1.msra.mxu1 %v2547_v58  ;;  %568 = vmatprep.subr.mxu0 %v2166_v0 }
  0x45   :  { %639 = vmatprep.subr.mxu1 %v2213_v9  ;;  %v21_v9 = vld [vmem:[%s3527_s0 + $0x10] sm:$0xff] }
  0xe2   :  { %v153_v54 = vpop.f32.mrf.mxu0 }
  0xe3   :  { %v229_v63 = vadd.f32 %v153_v54, %v19_v56 }
  0xe4   :  { %v155_v62 = vpop.f32.mrf.mxu0  ;;  %v224_v0 = vpop.f32.mrf.mxu1 }
  0xe5   :  { %v1949_v3 = vmul.f32 -1.442695, %v229_v63  ;;  %v230_v52 = vadd.f32 %v155_v62, %v20_v60  ;;  %v231_v58 = vadd.f32 %v224_v0, %v21_v9  ;;  %v18_v0 = vld [vmem:[%s3528_s2] sm:$0xff] }
  0xe6   :  { %v226_v50 = vpop.f32.mrf.mxu1 }
  0xe7   :  { %2009 = vpow2.f32 %v1949_v3  ;;  %v1950_v48 = vmul.f32 -1.442695, %v230_v52  ;;  %v1951_v59 = vmul.f32 -1.442695, %v231_v58  ;;  %v232_v57 = vadd.f32 %v226_v50, %v22_v61 }
  0xe9   :  { %2011 = vpow2.f32 %v1950_v48 }
  0xea   :  { %2013 = vpow2.f32 %v1951_v59 }
  0xeb   :  { %2015 = vtanh.f32 %v232_v57 }
  0xf4   :  { %v2010_v54 = vpop.eup %2009 }
  0xf5   :  { %v242_v56 = vadd.f32 1.0, %v2010_v54  ;;  %v3629_v54 = vld [vmem:[#allocation3_spill] sm:$0xff] }
  0xf6   :  { %v2012_v62 = vpop.eup %2011 }
  0xf7   :  { %2017 = vrcp.f32 %v242_v56  ;;  %v243_v3 = vadd.f32 1.0, %v2012_v62  ;;  %v2014_v48 = vpop.eup %2013  ;;  %v1952_v56 = vld [vmem:[%s3527_s0 + $0x20] sm:$0xff] }
  0xf8   :  { %v2016_v52 = vpop.eup %2015  ;;  %v244_v60 = vadd.f32 1.0, %v2014_v48 }
  0xf9   :  { %2019 = vrcp.f32 %v243_v3  ;;  %v1953_v3 = vld [vmem:[%s3527_s0 + $0x28] sm:$0xff] }
  0xfa   :  { %2021 = vrcp.f32 %v244_v60  ;;  %v1954_v60 = vld [vmem:[%s3527_s0 + $0x30] sm:$0xff] }
 0x104   :  { %v2018_v63 = vpop.eup %2017 }
 0x105   :  { %v253_v58 = vmul.f32 %v2018_v63, %v2016_v52 }
 0x106   :  { %v2020_v9 = vpop.eup %2019 }
 0x107   :  { %v252_v46 = vmul.f32 %v2020_v9, %v18_v0  ;;  %v2022_v57 = vpop.eup %2021 }
 0x109   :  { %v2635_v50 = vadd.f32 %v253_v58, %v252_v46  ;;  %v3628_v46 = vld [vmem:[#allocation2_spill] sm:$0xff] }
 0x10b   :  { %2023 = vtanh.f32 %v2635_v50 }
 0x118   :  { %v2024_v59 = vpop.eup %2023 }
 0x119   :  { %v256_v61 = vmul.f32 %v2024_v59, %v2022_v57  ;;  %v1955_v59 = vld [vmem:[%s3527_s0 + $0x38] sm:$0xff] }
 0x11b   :  { %257 = vst [vmem:[%s3529_s4] sm:$0xff] %v256_v61  ;;  %392 = vmatmul.mubr.f32.vlgmr.msra.gmra.mxu0 %v256_v61  ;;  %463 = vmatmul.mubr.f32.vlgmr.msra.gmra.mxu1 %v256_v61 }
 0x11c   :  { %569 = vmatpush1.msra.mxu0 %v2171_v1  ;;  %640 = vmatpush1.msra.mxu1 %v2225_v11 }
 0x11d   :  { %570 = vmatprep.subr.mxu0 %v2176_v2  ;;  %641 = vmatprep.subr.mxu1 %v2237_v13 }
 0x11e   :  { %571 = vmatpush1.msra.mxu0 %v2184_v4  ;;  %642 = vmatpush1.msra.mxu1 %v2242_v14 }
 0x11f   :  { %572 = vmatprep.subr.mxu0 %v2190_v5  ;;  %643 = vmatprep.subr.mxu1 %v2254_v16 }
 0x120   :  { %573 = vmatpush1.msra.mxu0 %v2196_v6  ;;  %644 = vmatpush1.msra.mxu1 %v2266_v18 }
 0x121   :  { %574 = vmatprep.subr.mxu0 %v2202_v7  ;;  %645 = vmatprep.subr.mxu1 %v2271_v19 }
 0x122   :  { %575 = vmatpush1.msra.mxu0 %v2208_v8  ;;  %646 = vmatpush1.msra.mxu1 %v2283_v21 }
 0x123   :  { %576 = vmatprep.subr.mxu0 %v2219_v10  ;;  %647 = vmatprep.subr.mxu1 %v2295_v23 }
 0x124   :  { %577 = vmatpush1.msra.mxu0 %v2231_v12  ;;  %648 = vmatpush1.msra.mxu1 %v2307_v25 }
 0x125   :  { %578 = vmatprep.subr.mxu0 %v2248_v15  ;;  %649 = vmatprep.subr.mxu1 %v2319_v27  ;;  %v3613_v15 = vld [vmem:[#allocation4_spill] sm:$0xff] }
 0x126   :  { %579 = vmatpush1.msra.mxu0 %v2260_v17  ;;  %650 = vmatpush1.msra.mxu1 %v2331_v29  ;;  %v3614_v17 = vld [vmem:[#allocation10_spill] sm:$0xff] }
 0x127   :  { %580 = vmatprep.subr.mxu0 %v2277_v20  ;;  %651 = vmatprep.subr.mxu1 %v2343_v31  ;;  %v3615_v20 = vld [vmem:[#allocation5_spill] sm:$0xff] }
 0x128   :  { %581 = vmatpush1.msra.mxu0 %v2289_v22  ;;  %652 = vmatpush1.msra.mxu1 %v2355_v33  ;;  %v3616_v22 = vld [vmem:[#allocation12_spill] sm:$0xff] }
 0x129   :  { %582 = vmatprep.subr.mxu0 %v2301_v24  ;;  %653 = vmatprep.subr.mxu1 %v2367_v35  ;;  %v3617_v24 = vld [vmem:[#allocation6_spill] sm:$0xff] }
 0x12a   :  { %583 = vmatpush1.msra.mxu0 %v2313_v26  ;;  %654 = vmatpush1.msra.mxu1 %v2379_v37  ;;  %v3618_v26 = vld [vmem:[#allocation13_spill] sm:$0xff] }
 0x12b   :  { %584 = vmatprep.subr.mxu0 %v2325_v28  ;;  %655 = vmatprep.subr.mxu1 %v2391_v39  ;;  %v3619_v28 = vld [vmem:[#allocation7_spill] sm:$0xff] }
 0x12c   :  { %585 = vmatpush1.msra.mxu0 %v2337_v30  ;;  %656 = vmatpush1.msra.mxu1 %v2403_v41  ;;  %v3620_v30 = vld [vmem:[#allocation14_spill] sm:$0xff] }
 0x12d   :  { %586 = vmatprep.subr.mxu0 %v2349_v32  ;;  %657 = vmatprep.subr.mxu1 %v2415_v43  ;;  %v3621_v32 = vld [vmem:[#allocation8_spill] sm:$0xff] }
 0x12e   :  { %587 = vmatpush1.msra.mxu0 %v2361_v34  ;;  %658 = vmatpush1.msra.mxu1 %v2427_v45  ;;  %v3622_v34 = vld [vmem:[#allocation15_spill] sm:$0xff] }
 0x12f   :  { %588 = vmatprep.subr.mxu0 %v2373_v36  ;;  %659 = vmatprep.subr.mxu1 %v2439_v47  ;;  %v3623_v36 = vld [vmem:[#allocation9_spill] sm:$0xff] }
 0x130   :  { %589 = vmatpush1.msra.mxu0 %v2385_v38  ;;  %660 = vmatpush1.msra.mxu1 %v2451_v49  ;;  %v3624_v38 = vld [vmem:[#allocation16_spill] sm:$0xff] }
 0x131   :  { %590 = vmatprep.subr.mxu0 %v2397_v40  ;;  %661 = vmatprep.subr.mxu1 %v2463_v51  ;;  %v3625_v40 = vld [vmem:[#allocation11_spill] sm:$0xff] }
 0x132   :  { %591 = vmatpush1.msra.mxu0 %v2409_v42  ;;  %662 = vmatpush1.msra.mxu1 %v2475_v53  ;;  %v3626_v42 = vmov 0.0  }
 0x133   :  { %592 = vmatprep.subr.mxu0 %v2421_v44  ;;  %663 = vmatprep.subr.mxu1 %v2487_v55  ;;  %v3627_v44 = vld [vmem:[#allocation17_spill] sm:$0xff] }
 0x134   :  { %593 = vmatpush1.msra.mxu0 %v3613_v15  ;;  %664 = vmatpush1.msra.mxu1 %v3614_v17 }
 0x135   :  { %594 = vmatprep.subr.mxu0 %v3615_v20  ;;  %665 = vmatprep.subr.mxu1 %v3616_v22 }
 0x136   :  { %595 = vmatpush1.msra.mxu0 %v3617_v24  ;;  %666 = vmatpush1.msra.mxu1 %v3618_v26 }
 0x137   :  { %596 = vmatprep.subr.mxu0 %v3619_v28  ;;  %667 = vmatprep.subr.mxu1 %v3620_v30 }
 0x138   :  { %597 = vmatpush1.msra.mxu0 %v3621_v32  ;;  %668 = vmatpush1.msra.mxu1 %v3622_v34 }
 0x139   :  { %598 = vmatprep.subr.mxu0 %v3623_v36  ;;  %669 = vmatprep.subr.mxu1 %v3624_v38 }
 0x13a   :  { %599 = vmatpush1.msra.mxu0 %v3625_v40  ;;  %632 = vmatprep.mubr.f32.mxu0 %v3626_v42 }
 0x13b   :  { %670 = vmatpush1.msra.mxu1 %v3627_v44  ;;  %703 = vmatprep.mubr.f32.mxu1 %v3626_v42 }
 0x13c   :  { %809 = vmatprep.subr.mxu0 %v3628_v46  ;;  %880 = vmatprep.subr.mxu1 %v3629_v54 }
 0x1db   :  { %v393_v62 = vpop.f32.mrf.mxu0  ;;  %v464_v58 = vpop.f32.mrf.mxu1 }
 0x1dc   :  { %v469_v48 = vadd.f32 %v1952_v56, %v393_v62  ;;  %v471_v57 = vadd.f32 %v1954_v60, %v464_v58 }
 0x1dd   :  { %v395_v52 = vpop.f32.mrf.mxu0  ;;  %v466_v61 = vpop.f32.mrf.mxu1 }
 0x1de   :  { %v1956_v63 = vmul.f32 -1.442695, %v469_v48  ;;  %v470_v0 = vadd.f32 %v1953_v3, %v395_v52  ;;  %v1958_v15 = vmul.f32 -1.442695, %v471_v57  ;;  %v472_v24 = vadd.f32 %v1955_v59, %v466_v61 }
 0x1e0   :  { %2025 = vpow2.f32 %v1956_v63  ;;  %v1957_v9 = vmul.f32 -1.442695, %v470_v0 }
 0x1e2   :  { %2027 = vpow2.f32 %v1957_v9 }
 0x1e3   :  { %2029 = vpow2.f32 %v1958_v15 }
 0x1ed   :  { %v2026_v20 = vpop.eup %2025 }
 0x1ee   :  { %v482_v28 = vadd.f32 1.0, %v2026_v20 }
 0x1ef   :  { %v2028_v32 = vpop.eup %2027 }
 0x1f0   :  { %2031 = vrcp.f32 %v482_v28  ;;  %v483_v36 = vadd.f32 1.0, %v2028_v32  ;;  %v2030_v40 = vpop.eup %2029 }
 0x1f1   :  { %2033 = vtanh.f32 %v472_v24  ;;  %v484_v62 = vadd.f32 1.0, %v2030_v40  ;;  %v2924_v40 = vld [vmem:[%s3525_s3 + $0x1e8] sm:$0xff] }
 0x1f2   :  { %2035 = vrcp.f32 %v483_v36  ;;  %3638 = vst [vmem:[#allocation8_spill] sm:$0xff] %v2924_v40 }
 0x1f3   :  { %2037 = vrcp.f32 %v484_v62  ;;  %v2948_v62 = vld [vmem:[%s3525_s3 + $0x1c8] sm:$0xff] }
 0x1fd   :  { %v2032_v46 = vpop.eup %2031 }
 0x1fe   :  { %v2034_v54 = vpop.eup %2033 }
 0x1ff   :  { %v2036_v56 = vpop.eup %2035  ;;  %v493_v48 = vmul.f32 %v2034_v54, %v2032_v46  ;;  %v2929_v46 = vld [vmem:[%s3525_s3 + $0x1f8] sm:$0xff]  ;;  %v2936_v54 = vld [vmem:[%s3525_s3 + $0x1e0] sm:$0xff] }
 0x200   :  { %v492_v3 = vmul.f32 %v2036_v56, %v2635_v50  ;;  %v2038_v63 = vpop.eup %2037  ;;  %v1963_v50 = vld [vmem:[%s3527_s0 + $0x58] sm:$0xff]  ;;  %3639 = vst [vmem:[#allocation15_spill] sm:$0xff] %v2929_v46  ;;  %v2941_v56 = vld [vmem:[%s3525_s3 + $0x1f0] sm:$0xff] }
 0x202   :  { %v2720_v52 = vadd.f32 %v493_v48, %v492_v3  ;;  %v2953_v3 = vld [vmem:[%s3525_s3 + $0x1d8] sm:$0xff]  ;;  %v2960_v48 = vld [vmem:[%s3525_s3 + $0x1c0] sm:$0xff] }
 0x204   :  { %2039 = vtanh.f32 %v2720_v52 }
 0x211   :  { %v2040_v0 = vpop.eup %2039 }
 0x212   :  { %v496_v9 = vmul.f32 %v2040_v0, %v2038_v63  ;;  %v2972_v63 = vld [vmem:[%s3525_s3 + $0x1a8] sm:$0xff]  ;;  %v2977_v0 = vld [vmem:[%s3525_s3 + $0x1b8] sm:$0xff] }
 0x214   :  { %1959 = vst [vmem:[%s3529_s4 + $0x8] sm:$0xff] %v496_v9  ;;  %633 = vmatmul.mubr.f32.vlgmr.msra.gmra.mxu0 %v496_v9  ;;  %704 = vmatmul.mubr.f32.vlgmr.msra.gmra.mxu1 %v496_v9  ;;  %v2984_v9 = vld [vmem:[%s3525_s3 + $0x1a0] sm:$0xff] }
 0x215   :  { %810 = vmatpush1.msra.mxu0 %v2171_v1  ;;  %881 = vmatpush1.msra.mxu1 %v2225_v11  ;;  %v2771_v1 = vld [vmem:[%s3525_s3 + $0x148] sm:$0xff] }
 0x216   :  { %811 = vmatprep.subr.mxu0 %v2176_v2  ;;  %882 = vmatprep.subr.mxu1 %v2237_v13  ;;  %v2777_v2 = vld [vmem:[%s3525_s3 + $0x140] sm:$0xff]  ;;  %v2817_v11 = vld [vmem:[%s3525_s3 + $0xc8] sm:$0xff] }
 0x217   :  { %812 = vmatpush1.msra.mxu0 %v2184_v4  ;;  %883 = vmatpush1.msra.mxu1 %v2242_v14  ;;  %v2783_v4 = vld [vmem:[%s3525_s3 + $0x128] sm:$0xff]  ;;  %v2835_v14 = vld [vmem:[%s3525_s3 + $0xa0] sm:$0xff] }
 0x218   :  { %813 = vmatprep.subr.mxu0 %v2190_v5  ;;  %884 = vmatprep.subr.mxu1 %v2254_v16  ;;  %v2789_v5 = vld [vmem:[%s3525_s3 + $0x120] sm:$0xff]  ;;  %v2829_v13 = vld [vmem:[%s3525_s3 + $0xa8] sm:$0xff] }
 0x219   :  { %814 = vmatpush1.msra.mxu0 %v2196_v6  ;;  %885 = vmatpush1.msra.mxu1 %v2266_v18  ;;  %v2795_v6 = vld [vmem:[%s3525_s3 + $0x108] sm:$0xff]  ;;  %v2847_v18 = vld [vmem:[%s3525_s3 + $0x80] sm:$0xff] }
 0x21a   :  { %815 = vmatprep.subr.mxu0 %v2202_v7  ;;  %886 = vmatprep.subr.mxu1 %v2271_v19  ;;  %v2800_v7 = vld [vmem:[%s3525_s3 + $0x100] sm:$0xff]  ;;  %v2841_v16 = vld [vmem:[%s3525_s3 + $0x88] sm:$0xff] }
 0x21b   :  { %816 = vmatpush1.msra.mxu0 %v2208_v8  ;;  %887 = vmatpush1.msra.mxu1 %v2283_v21  ;;  %v2805_v8 = vld [vmem:[%s3525_s3 + $0xe8] sm:$0xff]  ;;  %v2859_v21 = vld [vmem:[%s3525_s3 + $0x60] sm:$0xff] }
 0x21c   :  { %817 = vmatprep.subr.mxu0 %v2219_v10  ;;  %888 = vmatprep.subr.mxu1 %v2295_v23  ;;  %v2811_v10 = vld [vmem:[%s3525_s3 + $0xe0] sm:$0xff]  ;;  %v2853_v19 = vld [vmem:[%s3525_s3 + $0x68] sm:$0xff]  ;;  %3631 = vst [vmem:[#allocation10_spill] sm:$0xff] %v2859_v21 }
 0x21d   :  { %818 = vmatpush1.msra.mxu0 %v2231_v12  ;;  %889 = vmatpush1.msra.mxu1 %v2307_v25  ;;  %v2823_v12 = vld [vmem:[%s3525_s3 + $0xc0] sm:$0xff]  ;;  %3630 = vst [vmem:[#allocation4_spill] sm:$0xff] %v2853_v19  ;;  %v2865_v23 = vld [vmem:[%s3525_s3 + $0x48] sm:$0xff] }
 0x21e   :  { %890 = vmatprep.subr.mxu1 %v2319_v27  ;;  %873 = vmatprep.mubr.f32.mxu0 %v3626_v42  ;;  %3632 = vst [vmem:[#allocation5_spill] sm:$0xff] %v2865_v23  ;;  %v2871_v25 = vld [vmem:[%s3525_s3 + $0x40] sm:$0xff]  ;;  %v2877_v27 = vld [vmem:[%s3525_s3 + $0x28] sm:$0xff] }
 0x21f   :  { %891 = vmatpush1.msra.mxu1 %v2331_v29  ;;  %944 = vmatprep.mubr.f32.mxu1 %v3626_v42  ;;  %3633 = vst [vmem:[#allocation12_spill] sm:$0xff] %v2871_v25  ;;  %3634 = vst [vmem:[#allocation6_spill] sm:$0xff] %v2877_v27  ;;  %v2883_v29 = vld [vmem:[%s3525_s3 + $0x20] sm:$0xff] }
 0x220   :  { %892 = vmatprep.subr.mxu1 %v2343_v31  ;;  %819 = vmatprep.subr.mxu0 %v2771_v1  ;;  %3635 = vst [vmem:[#allocation13_spill] sm:$0xff] %v2883_v29  ;;  %v2889_v31 = vld [vmem:[%s3525_s3 + $0x8] sm:$0xff] }
 0x221   :  { %893 = vmatpush1.msra.mxu1 %v2355_v33  ;;  %820 = vmatpush1.msra.mxu0 %v2777_v2  ;;  %3636 = vst [vmem:[#allocation7_spill] sm:$0xff] %v2889_v31  ;;  %v2895_v33 = vld [vmem:[%s3525_s3] sm:$0xff] }
 0x222   :  { %894 = vmatprep.subr.mxu1 %v2367_v35  ;;  %821 = vmatprep.subr.mxu0 %v2783_v4  ;;  %3637 = vst [vmem:[#allocation14_spill] sm:$0xff] %v2895_v33  ;;  %v1960_v35 = vld [vmem:[%s3527_s0 + $0x40] sm:$0xff] }
 0x223   :  { %895 = vmatpush1.msra.mxu1 %v2379_v37  ;;  %822 = vmatpush1.msra.mxu0 %v2789_v5 }
 0x224   :  { %896 = vmatprep.subr.mxu1 %v2391_v39  ;;  %823 = vmatprep.subr.mxu0 %v2795_v6  ;;  %v1961_v39 = vld [vmem:[%s3527_s0 + $0x48] sm:$0xff] }
 0x225   :  { %897 = vmatpush1.msra.mxu1 %v2403_v41  ;;  %824 = vmatpush1.msra.mxu0 %v2800_v7 }
 0x226   :  { %898 = vmatprep.subr.mxu1 %v2415_v43  ;;  %825 = vmatprep.subr.mxu0 %v2805_v8 }
 0x227   :  { %899 = vmatpush1.msra.mxu1 %v2427_v45  ;;  %826 = vmatpush1.msra.mxu0 %v2811_v10 }
 0x228   :  { %900 = vmatprep.subr.mxu1 %v2439_v47  ;;  %827 = vmatprep.subr.mxu0 %v2817_v11 }
 0x229   :  { %901 = vmatpush1.msra.mxu1 %v2451_v49  ;;  %828 = vmatpush1.msra.mxu0 %v2823_v12 }
 0x22a   :  { %902 = vmatprep.subr.mxu1 %v2463_v51  ;;  %829 = vmatprep.subr.mxu0 %v2829_v13  ;;  %v1962_v51 = vld [vmem:[%s3527_s0 + $0x50] sm:$0xff] }
 0x22b   :  { %903 = vmatpush1.msra.mxu1 %v2475_v53  ;;  %830 = vmatpush1.msra.mxu0 %v2835_v14 }
 0x22c   :  { %904 = vmatprep.subr.mxu1 %v2487_v55  ;;  %831 = vmatprep.subr.mxu0 %v2841_v16 }
 0x22d   :  { %905 = vmatpush1.msra.mxu1 %v3614_v17  ;;  %832 = vmatpush1.msra.mxu0 %v2847_v18 }
 0x22e   :  { %906 = vmatprep.subr.mxu1 %v3616_v22  ;;  %833 = vmatprep.subr.mxu0 %v2853_v19 }
 0x22f   :  { %907 = vmatpush1.msra.mxu1 %v3618_v26  ;;  %834 = vmatpush1.msra.mxu0 %v2859_v21 }
 0x230   :  { %908 = vmatprep.subr.mxu1 %v3620_v30  ;;  %835 = vmatprep.subr.mxu0 %v2865_v23 }
 0x231   :  { %909 = vmatpush1.msra.mxu1 %v3622_v34  ;;  %836 = vmatpush1.msra.mxu0 %v2871_v25 }
 0x232   :  { %910 = vmatprep.subr.mxu1 %v3624_v38  ;;  %837 = vmatprep.subr.mxu0 %v2877_v27 }
 0x233   :  { %911 = vmatpush1.msra.mxu1 %v3627_v44  ;;  %838 = vmatpush1.msra.mxu0 %v2883_v29 }
 0x234   :  { %839 = vmatprep.subr.mxu0 %v2889_v31  ;;  %1121 = vmatprep.subr.mxu1 %v2929_v46 }
 0x235   :  { %840 = vmatpush1.msra.mxu0 %v2895_v33 }
 0x236   :  { %1050 = vmatprep.subr.mxu0 %v2924_v40 }
 0x2d4   :  { %v634_v37 = vpop.f32.mrf.mxu0  ;;  %v705_v53 = vpop.f32.mrf.mxu1 }
 0x2d5   :  { %v710_v41 = vadd.f32 %v1960_v35, %v634_v37  ;;  %v712_v55 = vadd.f32 %v1962_v51, %v705_v53  ;;  %v2989_v35 = vld [vmem:[%s3525_s3 + $0x1b0] sm:$0xff]  ;;  %v2996_v37 = vld [vmem:[%s3525_s3 + $0x188] sm:$0xff]  ;;  %v3044_v53 = vld [vmem:[%s3525_s3 + $0x158] sm:$0xff] }
 0x2d6   :  { %v636_v43 = vpop.f32.mrf.mxu0  ;;  %v707_v17 = vpop.f32.mrf.mxu1  ;;  %v3037_v51 = vld [vmem:[%s3525_s3 + $0x170] sm:$0xff] }
 0x2d7   :  { %v1964_v45 = vmul.f32 -1.442695, %v710_v41  ;;  %v711_v47 = vadd.f32 %v1961_v39, %v636_v43  ;;  %v1966_v22 = vmul.f32 -1.442695, %v712_v55  ;;  %v713_v30 = vadd.f32 %v1963_v50, %v707_v17  ;;  %v3001_v39 = vld [vmem:[%s3525_s3 + $0x198] sm:$0xff]  ;;  %v3008_v41 = vld [vmem:[%s3525_s3 + $0x180] sm:$0xff] }
 0x2d8   :  { %v3013_v43 = vld [vmem:[%s3525_s3 + $0x190] sm:$0xff]  ;;  %v3058_v50 = vld [vmem:[%s3525_s3 + $0x138] sm:$0xff] }
 0x2d9   :  { %2041 = vpow2.f32 %v1964_v45  ;;  %v1965_v49 = vmul.f32 -1.442695, %v711_v47  ;;  %v3020_v45 = vld [vmem:[%s3525_s3 + $0x168] sm:$0xff]  ;;  %v3025_v47 = vld [vmem:[%s3525_s3 + $0x178] sm:$0xff]  ;;  %v3051_v55 = vld [vmem:[%s3525_s3 + $0x150] sm:$0xff] }
 0x2da   :  { %v3065_v17 = vld [vmem:[%s3525_s3 + $0x130] sm:$0xff] }
 0x2db   :  { %2043 = vpow2.f32 %v1965_v49  ;;  %v3032_v49 = vld [vmem:[%s3525_s3 + $0x160] sm:$0xff] }
 0x2dc   :  { %2045 = vpow2.f32 %v1966_v22  ;;  %v3072_v22 = vld [vmem:[%s3525_s3 + $0x118] sm:$0xff] }
 0x2e6   :  { %v2042_v26 = vpop.eup %2041 }
 0x2e7   :  { %v723_v34 = vadd.f32 1.0, %v2042_v26  ;;  %v3077_v26 = vld [vmem:[%s3525_s3 + $0x110] sm:$0xff] }
 0x2e8   :  { %v2044_v38 = vpop.eup %2043 }
 0x2e9   :  { %2047 = vrcp.f32 %v723_v34  ;;  %v724_v44 = vadd.f32 1.0, %v2044_v38  ;;  %v2046_v60 = vpop.eup %2045  ;;  %v3089_v34 = vld [vmem:[%s3525_s3 + $0xf0] sm:$0xff]  ;;  %v3096_v38 = vld [vmem:[%s3525_s3 + $0xd8] sm:$0xff] }
 0x2ea   :  { %2049 = vtanh.f32 %v713_v30  ;;  %v725_v61 = vadd.f32 1.0, %v2046_v60  ;;  %v3082_v30 = vld [vmem:[%s3525_s3 + $0xf8] sm:$0xff] }
 0x2eb   :  { %2051 = vrcp.f32 %v724_v44  ;;  %v3103_v44 = vld [vmem:[%s3525_s3 + $0xd0] sm:$0xff]  ;;  %v3110_v60 = vld [vmem:[%s3525_s3 + $0xb8] sm:$0xff] }
 0x2ec   :  { %2053 = vrcp.f32 %v725_v61  ;;  %v3138_v61 = vld [vmem:[%s3525_s3 + $0x78] sm:$0xff] }
 0x2ed   :  { %3640 = vst [vmem:[#allocation9_spill] sm:$0xff] %v3138_v61 }
 0x2f6   :  { %v2048_v58 = vpop.eup %2047 }
 0x2f7   :  { %v2050_v57 = vpop.eup %2049 }
 0x2f8   :  { %v2052_v59 = vpop.eup %2051  ;;  %v734_v20 = vmul.f32 %v2050_v57, %v2048_v58  ;;  %v3117_v58 = vld [vmem:[%s3525_s3 + $0xb0] sm:$0xff]  ;;  %v3124_v57 = vld [vmem:[%s3525_s3 + $0x98] sm:$0xff] }
 0x2f9   :  { %v733_v15 = vmul.f32 %v2052_v59, %v2720_v52  ;;  %v2054_v28 = vpop.eup %2053  ;;  %v2965_v52 = vld [vmem:[%s3525_s3 + $0x1d0] sm:$0xff] }
 0x2fa   :  { %v3131_v59 = vld [vmem:[%s3525_s3 + $0x90] sm:$0xff] }
 0x2fb   :  { %v2913_v24 = vadd.f32 %v734_v20, %v733_v15  ;;  %v3145_v15 = vld [vmem:[%s3525_s3 + $0x70] sm:$0xff]  ;;  %v3152_v20 = vld [vmem:[%s3525_s3 + $0x58] sm:$0xff] }
 0x2fc   :  { %3641 = vst [vmem:[#allocation16_spill] sm:$0xff] %v3145_v15  ;;  %3642 = vst [vmem:[#allocation11_spill] sm:$0xff] %v3152_v20 }
 0x2fd   :  { %2055 = vtanh.f32 %v2913_v24 }
 0x30a   :  { %v2056_v32 = vpop.eup %2055 }
 0x30b   :  { %v737_v36 = vmul.f32 %v2056_v32, %v2054_v28  ;;  %v3159_v28 = vld [vmem:[%s3525_s3 + $0x50] sm:$0xff]  ;;  %v3166_v32 = vld [vmem:[%s3525_s3 + $0x38] sm:$0xff] }
 0x30c   :  { %3643 = vst [vmem:[#allocation17_spill] sm:$0xff] %v3159_v28  ;;  %3644 = vst [vmem:[#allocation2_spill] sm:$0xff] %v3166_v32 }
 0x30d   :  { %1967 = vst [vmem:[%s3529_s4 + $0x10] sm:$0xff] %v737_v36  ;;  %874 = vmatmul.mubr.f32.vlgmr.msra.gmra.mxu0 %v737_v36  ;;  %945 = vmatmul.mubr.f32.vlgmr.msra.gmra.mxu1 %v737_v36  ;;  %v3173_v36 = vld [vmem:[%s3525_s3 + $0x30] sm:$0xff] }
 0x30e   :  { %1114 = vmatprep.mubr.f32.mxu0 %v3626_v42  ;;  %1185 = vmatprep.mubr.f32.mxu1 %v3626_v42  ;;  %3645 = vst [vmem:[#allocation3_spill] sm:$0xff] %v3173_v36  ;;  %v3180_v42 = vld [vmem:[%s3525_s3 + $0x18] sm:$0xff] }
 0x30f   :  { %1051 = vmatpush1.msra.mxu0 %v2936_v54  ;;  %1122 = vmatpush1.msra.mxu1 %v2941_v56  ;;  %3646 = vst [vmem:[#allocation18_spill] sm:$0xff] %v3180_v42 }
 0x310   :  { %1052 = vmatprep.subr.mxu0 %v2948_v62  ;;  %1123 = vmatprep.subr.mxu1 %v2953_v3 }
 0x311   :  { %1053 = vmatpush1.msra.mxu0 %v2960_v48  ;;  %1124 = vmatpush1.msra.mxu1 %v2965_v52 }
 0x312   :  { %1054 = vmatprep.subr.mxu0 %v2972_v63  ;;  %1125 = vmatprep.subr.mxu1 %v2977_v0 }
 0x313   :  { %1055 = vmatpush1.msra.mxu0 %v2984_v9  ;;  %1126 = vmatpush1.msra.mxu1 %v2989_v35 }
 0x314   :  { %1056 = vmatprep.subr.mxu0 %v2996_v37  ;;  %1127 = vmatprep.subr.mxu1 %v3001_v39 }
 0x315   :  { %1057 = vmatpush1.msra.mxu0 %v3008_v41  ;;  %1128 = vmatpush1.msra.mxu1 %v3013_v43 }
 0x316   :  { %1058 = vmatprep.subr.mxu0 %v3020_v45  ;;  %1129 = vmatprep.subr.mxu1 %v3025_v47 }
 0x317   :  { %1059 = vmatpush1.msra.mxu0 %v3032_v49  ;;  %1130 = vmatpush1.msra.mxu1 %v3037_v51 }
 0x318   :  { %1060 = vmatprep.subr.mxu0 %v2771_v1  ;;  %1131 = vmatprep.subr.mxu1 %v3044_v53 }
 0x319   :  { %1061 = vmatpush1.msra.mxu0 %v2777_v2  ;;  %1132 = vmatpush1.msra.mxu1 %v3051_v55 }
 0x31a   :  { %1062 = vmatprep.subr.mxu0 %v2783_v4  ;;  %1133 = vmatprep.subr.mxu1 %v3058_v50 }
 0x31b   :  { %1063 = vmatpush1.msra.mxu0 %v2789_v5  ;;  %1134 = vmatpush1.msra.mxu1 %v3065_v17 }
 0x31c   :  { %1064 = vmatprep.subr.mxu0 %v2795_v6  ;;  %1135 = vmatprep.subr.mxu1 %v3072_v22 }
 0x31d   :  { %1065 = vmatpush1.msra.mxu0 %v2800_v7  ;;  %1136 = vmatpush1.msra.mxu1 %v3077_v26 }
 0x31e   :  { %1066 = vmatprep.subr.mxu0 %v2805_v8  ;;  %1137 = vmatprep.subr.mxu1 %v3082_v30 }
 0x31f   :  { %1067 = vmatpush1.msra.mxu0 %v2811_v10  ;;  %1138 = vmatpush1.msra.mxu1 %v3089_v34 }
 0x320   :  { %1068 = vmatprep.subr.mxu0 %v2817_v11  ;;  %1139 = vmatprep.subr.mxu1 %v3096_v38 }
 0x321   :  { %1069 = vmatpush1.msra.mxu0 %v2823_v12  ;;  %1140 = vmatpush1.msra.mxu1 %v3103_v44 }
 0x322   :  { %1070 = vmatprep.subr.mxu0 %v2829_v13  ;;  %1141 = vmatprep.subr.mxu1 %v3110_v60 }
 0x323   :  { %1071 = vmatpush1.msra.mxu0 %v2835_v14  ;;  %1142 = vmatpush1.msra.mxu1 %v3117_v58 }
 0x324   :  { %1072 = vmatprep.subr.mxu0 %v2841_v16  ;;  %1143 = vmatprep.subr.mxu1 %v3124_v57 }
 0x325   :  { %1073 = vmatpush1.msra.mxu0 %v2847_v18  ;;  %1144 = vmatpush1.msra.mxu1 %v3131_v59 }
 0x326   :  { %1074 = vmatprep.subr.mxu0 %v2853_v19  ;;  %1145 = vmatprep.subr.mxu1 %v3138_v61 }
 0x327   :  { %1075 = vmatpush1.msra.mxu0 %v2859_v21  ;;  %1146 = vmatpush1.msra.mxu1 %v3145_v15 }
 0x328   :  { %1076 = vmatprep.subr.mxu0 %v2865_v23  ;;  %1147 = vmatprep.subr.mxu1 %v3152_v20  ;;  %v3187_v20 = vld [vmem:[%s3525_s3 + $0x10] sm:$0xff] }
 0x329   :  { %1077 = vmatpush1.msra.mxu0 %v2871_v25  ;;  %1148 = vmatpush1.msra.mxu1 %v3159_v28  ;;  %3647 = vst [vmem:[#allocation19_spill] sm:$0xff] %v3187_v20  ;;  %v1971_v25 = vld [vmem:[%s3527_s0 + $0x78] sm:$0xff] }
 0x32a   :  { %1078 = vmatprep.subr.mxu0 %v2877_v27  ;;  %1149 = vmatprep.subr.mxu1 %v3166_v32  ;;  %v1968_v32 = vld [vmem:[%s3527_s0 + $0x60] sm:$0xff] }
 0x32b   :  { %1079 = vmatpush1.msra.mxu0 %v2883_v29  ;;  %1150 = vmatpush1.msra.mxu1 %v3173_v36  ;;  %v1969_v36 = vld [vmem:[%s3527_s0 + $0x68] sm:$0xff] }
 0x32c   :  { %1080 = vmatprep.subr.mxu0 %v2889_v31  ;;  %1151 = vmatprep.subr.mxu1 %v3180_v42 }
 0x32d   :  { %1081 = vmatpush1.msra.mxu0 %v2895_v33  ;;  %1152 = vmatpush1.msra.mxu1 %v3187_v20 }
 0x32e   :  { %1291 = vmatprep.subr.mxu0 %v2924_v40  ;;  %1362 = vmatprep.subr.mxu1 %v2929_v46  ;;  %v1970_v46 = vld [vmem:[%s3527_s0 + $0x70] sm:$0xff] }
 0x3cd   :  { %v875_v27 = vpop.f32.mrf.mxu0  ;;  %v946_v40 = vpop.f32.mrf.mxu1 }
 0x3ce   :  { %v951_v31 = vadd.f32 %v1968_v32, %v875_v27  ;;  %v953_v20 = vadd.f32 %v1970_v46, %v946_v40 }
 0x3cf   :  { %v877_v29 = vpop.f32.mrf.mxu0  ;;  %v948_v23 = vpop.f32.mrf.mxu1 }
 0x3d0   :  { %v1972_v42 = vmul.f32 -1.442695, %v951_v31  ;;  %v952_v28 = vadd.f32 %v1969_v36, %v877_v29  ;;  %v1974_v15 = vmul.f32 -1.442695, %v953_v20  ;;  %v954_v27 = vadd.f32 %v1971_v25, %v948_v23  ;;  %v3651_v20 = vld [vmem:[#allocation16_spill] sm:$0xff] }
 0x3d2   :  { %2057 = vpow2.f32 %v1972_v42  ;;  %v1973_v33 = vmul.f32 -1.442695, %v952_v28 }
 0x3d4   :  { %2059 = vpow2.f32 %v1973_v33 }
 0x3d5   :  { %2061 = vpow2.f32 %v1974_v15  ;;  %v3650_v15 = vld [vmem:[#allocation10_spill] sm:$0xff] }
 0x3df   :  { %v2058_v21 = vpop.eup %2057 }
 0x3e0   :  { %v964_v32 = vadd.f32 1.0, %v2058_v21 }
 0x3e1   :  { %v2060_v31 = vpop.eup %2059 }
 0x3e2   :  { %2063 = vrcp.f32 %v964_v32  ;;  %v965_v42 = vadd.f32 1.0, %v2060_v31  ;;  %v2062_v29 = vpop.eup %2061  ;;  %v3653_v32 = vld [vmem:[#allocation11_spill] sm:$0xff]  ;;  %v3654_v31 = vld [vmem:[#allocation12_spill] sm:$0xff] }
 0x3e3   :  { %2065 = vtanh.f32 %v954_v27  ;;  %v966_v40 = vadd.f32 1.0, %v2062_v29  ;;  %v3652_v27 = vld [vmem:[#allocation5_spill] sm:$0xff]  ;;  %v3656_v29 = vld [vmem:[#allocation6_spill] sm:$0xff] }
 0x3e4   :  { %2067 = vrcp.f32 %v965_v42  ;;  %v3655_v42 = vld [vmem:[#allocation17_spill] sm:$0xff] }
 0x3e5   :  { %2069 = vrcp.f32 %v966_v40  ;;  %v3660_v40 = vld [vmem:[#allocation7_spill] sm:$0xff] }
 0x3ef   :  { %v2064_v33 = vpop.eup %2063 }
 0x3f0   :  { %v2066_v28 = vpop.eup %2065 }
 0x3f1   :  { %v2068_v36 = vpop.eup %2067  ;;  %v975_v61 = vmul.f32 %v2066_v28, %v2064_v33  ;;  %v3657_v33 = vld [vmem:[#allocation2_spill] sm:$0xff]  ;;  %v3658_v28 = vld [vmem:[#allocation13_spill] sm:$0xff] }
 0x3f2   :  { %v974_v46 = vmul.f32 %v2068_v36, %v2913_v24  ;;  %v2070_v21 = vpop.eup %2069  ;;  %v3648_v24 = vld [vmem:[#allocation4_spill] sm:$0xff]  ;;  %v3659_v36 = vld [vmem:[#allocation3_spill] sm:$0xff] }
 0x3f4   :  { %v3210_v19 = vadd.f32 %v975_v61, %v974_v46  ;;  %v3649_v61 = vld [vmem:[#allocation9_spill] sm:$0xff]  ;;  %v3661_v46 = vld [vmem:[#allocation18_spill] sm:$0xff] }
 0x3f6   :  { %2071 = vtanh.f32 %v3210_v19 }
 0x403   :  { %v2072_v23 = vpop.eup %2071 }
 0x404   :  { %v978_v25 = vmul.f32 %v2072_v23, %v2070_v21  ;;  %v3662_v21 = vld [vmem:[#allocation14_spill] sm:$0xff]  ;;  %v3663_v23 = vmov 0.0  }
 0x406   :  { %1975 = vst [vmem:[%s3529_s4 + $0x18] sm:$0xff] %v978_v25  ;;  %1115 = vmatmul.mubr.f32.vlgmr.msra.gmra.mxu0 %v978_v25  ;;  %1186 = vmatmul.mubr.f32.vlgmr.msra.gmra.mxu1 %v978_v25  ;;  %v3664_v25 = vld [vmem:[#allocation19_spill] sm:$0xff] }
 0x407   :  { %1292 = vmatpush1.msra.mxu0 %v2936_v54  ;;  %1363 = vmatpush1.msra.mxu1 %v2941_v56 }
 0x408   :  { %1293 = vmatprep.subr.mxu0 %v2948_v62  ;;  %1364 = vmatprep.subr.mxu1 %v2953_v3 }
 0x409   :  { %1294 = vmatpush1.msra.mxu0 %v2960_v48  ;;  %1365 = vmatpush1.msra.mxu1 %v2965_v52 }
 0x40a   :  { %1295 = vmatprep.subr.mxu0 %v2972_v63  ;;  %1366 = vmatprep.subr.mxu1 %v2977_v0 }
 0x40b   :  { %1296 = vmatpush1.msra.mxu0 %v2984_v9  ;;  %1367 = vmatpush1.msra.mxu1 %v2989_v35 }
 0x40c   :  { %1297 = vmatprep.subr.mxu0 %v2996_v37  ;;  %1368 = vmatprep.subr.mxu1 %v3001_v39 }
 0x40d   :  { %1298 = vmatpush1.msra.mxu0 %v3008_v41  ;;  %1369 = vmatpush1.msra.mxu1 %v3013_v43 }
 0x40e   :  { %1299 = vmatprep.subr.mxu0 %v3020_v45  ;;  %1370 = vmatprep.subr.mxu1 %v3025_v47 }
 0x40f   :  { %1300 = vmatpush1.msra.mxu0 %v3032_v49  ;;  %1371 = vmatpush1.msra.mxu1 %v3037_v51 }
 0x410   :  { %1301 = vmatprep.subr.mxu0 %v2771_v1  ;;  %1372 = vmatprep.subr.mxu1 %v3044_v53 }
 0x411   :  { %1302 = vmatpush1.msra.mxu0 %v2777_v2  ;;  %1373 = vmatpush1.msra.mxu1 %v3051_v55 }
 0x412   :  { %1303 = vmatprep.subr.mxu0 %v2783_v4  ;;  %1374 = vmatprep.subr.mxu1 %v3058_v50 }
 0x413   :  { %1304 = vmatpush1.msra.mxu0 %v2789_v5  ;;  %1375 = vmatpush1.msra.mxu1 %v3065_v17 }
 0x414   :  { %1305 = vmatprep.subr.mxu0 %v2795_v6  ;;  %1376 = vmatprep.subr.mxu1 %v3072_v22 }
 0x415   :  { %1306 = vmatpush1.msra.mxu0 %v2800_v7  ;;  %1377 = vmatpush1.msra.mxu1 %v3077_v26 }
 0x416   :  { %1307 = vmatprep.subr.mxu0 %v2805_v8  ;;  %1378 = vmatprep.subr.mxu1 %v3082_v30 }
 0x417   :  { %1308 = vmatpush1.msra.mxu0 %v2811_v10  ;;  %1379 = vmatpush1.msra.mxu1 %v3089_v34 }
 0x418   :  { %1309 = vmatprep.subr.mxu0 %v2817_v11  ;;  %1380 = vmatprep.subr.mxu1 %v3096_v38 }
 0x419   :  { %1310 = vmatpush1.msra.mxu0 %v2823_v12  ;;  %1381 = vmatpush1.msra.mxu1 %v3103_v44 }
 0x41a   :  { %1311 = vmatprep.subr.mxu0 %v2829_v13  ;;  %1382 = vmatprep.subr.mxu1 %v3110_v60 }
 0x41b   :  { %1312 = vmatpush1.msra.mxu0 %v2835_v14  ;;  %1383 = vmatpush1.msra.mxu1 %v3117_v58 }
 0x41c   :  { %1313 = vmatprep.subr.mxu0 %v2841_v16  ;;  %1384 = vmatprep.subr.mxu1 %v3124_v57 }
 0x41d   :  { %1314 = vmatpush1.msra.mxu0 %v2847_v18  ;;  %1385 = vmatpush1.msra.mxu1 %v3131_v59 }
 0x41e   :  { %1315 = vmatprep.subr.mxu0 %v3648_v24  ;;  %1386 = vmatprep.subr.mxu1 %v3649_v61 }
 0x41f   :  { %1316 = vmatpush1.msra.mxu0 %v3650_v15  ;;  %1387 = vmatpush1.msra.mxu1 %v3651_v20 }
 0x420   :  { %1317 = vmatprep.subr.mxu0 %v3652_v27  ;;  %1388 = vmatprep.subr.mxu1 %v3653_v32  ;;  %v1979_v32 = vld [vmem:[%s3527_s0 + $0x98] sm:$0xff] }
 0x421   :  { %1318 = vmatpush1.msra.mxu0 %v3654_v31  ;;  %1389 = vmatpush1.msra.mxu1 %v3655_v42  ;;  %v3665_v42 = vld [vmem:[#allocation8_spill] sm:$0xff] }
 0x422   :  { %1319 = vmatprep.subr.mxu0 %v3656_v29  ;;  %1390 = vmatprep.subr.mxu1 %v3657_v33  ;;  %v3666_v29 = vld [vmem:[#allocation15_spill] sm:$0xff] }
 0x423   :  { %1320 = vmatpush1.msra.mxu0 %v3658_v28  ;;  %1391 = vmatpush1.msra.mxu1 %v3659_v36  ;;  %v1976_v36 = vld [vmem:[%s3527_s0 + $0x80] sm:$0xff] }
 0x424   :  { %1321 = vmatprep.subr.mxu0 %v3660_v40  ;;  %1392 = vmatprep.subr.mxu1 %v3661_v46  ;;  %v1977_v46 = vld [vmem:[%s3527_s0 + $0x88] sm:$0xff] }
 0x425   :  { %1322 = vmatpush1.msra.mxu0 %v3662_v21  ;;  %1355 = vmatprep.mubr.f32.mxu0 %v3663_v23 }
 0x426   :  { %1393 = vmatpush1.msra.mxu1 %v3664_v25  ;;  %1426 = vmatprep.mubr.f32.mxu1 %v3663_v23 }
 0x427   :  { %1532 = vmatprep.subr.mxu0 %v3665_v42  ;;  %1603 = vmatprep.subr.mxu1 %v3666_v29  ;;  %v1978_v29 = vld [vmem:[%s3527_s0 + $0x90] sm:$0xff] }
 0x4c6   :  { %v1116_v28 = vpop.f32.mrf.mxu0  ;;  %v1187_v42 = vpop.f32.mrf.mxu1 }
 0x4c7   :  { %v1192_v21 = vadd.f32 %v1976_v36, %v1116_v28  ;;  %v1194_v23 = vadd.f32 %v1978_v29, %v1187_v42 }
 0x4c8   :  { %v1118_v40 = vpop.f32.mrf.mxu0  ;;  %v1189_v27 = vpop.f32.mrf.mxu1 }
 0x4c9   :  { %v1980_v33 = vmul.f32 -1.442695, %v1192_v21  ;;  %v1193_v31 = vadd.f32 %v1977_v46, %v1118_v40  ;;  %v1982_v20 = vmul.f32 -1.442695, %v1194_v23  ;;  %v1195_v28 = vadd.f32 %v1979_v32, %v1189_v27  ;;  %v3683_v32 = vld [vmem:[#allocation19_spill] sm:$0xff]  ;;  %v3684_v23 = vld [vmem:[#allocation8_spill] sm:$0xff] }
 0x4cb   :  { %2073 = vpow2.f32 %v1980_v33  ;;  %v1981_v25 = vmul.f32 -1.442695, %v1193_v31 }
 0x4cd   :  { %2075 = vpow2.f32 %v1981_v25 }
 0x4ce   :  { %2077 = vpow2.f32 %v1982_v20 }
 0x4d8   :  { %v2074_v15 = vpop.eup %2073 }
 0x4d9   :  { %v1205_v36 = vadd.f32 1.0, %v2074_v15 }
 0x4da   :  { %v2076_v21 = vpop.eup %2075 }
 0x4db   :  { %2079 = vrcp.f32 %v1205_v36  ;;  %v1206_v31 = vadd.f32 1.0, %v2076_v21  ;;  %v2078_v33 = vpop.eup %2077  ;;  %v1984_v36 = vld [vmem:[%s3527_s0 + $0xa0] sm:$0xff] }
 0x4dc   :  { %2081 = vtanh.f32 %v1195_v28  ;;  %v1207_v42 = vadd.f32 1.0, %v2078_v33  ;;  %v3685_v28 = vld [vmem:[#allocation15_spill] sm:$0xff] }
 0x4dd   :  { %2083 = vrcp.f32 %v1206_v31  ;;  %v1985_v31 = vld [vmem:[%s3527_s0 + $0xa8] sm:$0xff] }
 0x4de   :  { %2085 = vrcp.f32 %v1207_v42 }
 0x4e8   :  { %v2080_v40 = vpop.eup %2079 }
 0x4e9   :  { %v2082_v46 = vpop.eup %2081 }
 0x4ea   :  { %v2084_v25 = vpop.eup %2083  ;;  %v1216_v61 = vmul.f32 %v2082_v46, %v2080_v40 }
 0x4eb   :  { %v1215_v29 = vmul.f32 %v2084_v25, %v3210_v19  ;;  %v2086_v15 = vpop.eup %2085  ;;  %v3681_v19 = vld [vmem:[#allocation14_spill] sm:$0xff] }
 0x4ed   :  { %v3295_v24 = vadd.f32 %v1216_v61, %v1215_v29  ;;  %v3682_v61 = vmov 0.0   ;;  %v1986_v29 = vld [vmem:[%s3527_s0 + $0xb0] sm:$0xff] }
 0x4ef   :  { %2087 = vtanh.f32 %v3295_v24 }
 0x4fc   :  { %v2088_v27 = vpop.eup %2087 }
 0x4fd   :  { %v1219_v20 = vmul.f32 %v2088_v27, %v2086_v15 }
 0x4ff   :  { %1983 = vst [vmem:[%s3529_s4 + $0x20] sm:$0xff] %v1219_v20  ;;  %1356 = vmatmul.mubr.f32.vlgmr.msra.gmra.mxu0 %v1219_v20  ;;  %1427 = vmatmul.mubr.f32.vlgmr.msra.gmra.mxu1 %v1219_v20  ;;  %v1987_v20 = vld [vmem:[%s3527_s0 + $0xb8] sm:$0xff] }
 0x500   :  { %1533 = vmatpush1.msra.mxu0 %v2936_v54  ;;  %1604 = vmatpush1.msra.mxu1 %v2941_v56 }
 0x501   :  { %1534 = vmatprep.subr.mxu0 %v2948_v62  ;;  %1605 = vmatprep.subr.mxu1 %v2953_v3 }
 0x502   :  { %1535 = vmatpush1.msra.mxu0 %v2960_v48  ;;  %1606 = vmatpush1.msra.mxu1 %v2965_v52 }
 0x503   :  { %1536 = vmatprep.subr.mxu0 %v2972_v63  ;;  %1607 = vmatprep.subr.mxu1 %v2977_v0 }
 0x504   :  { %1537 = vmatpush1.msra.mxu0 %v2984_v9  ;;  %1608 = vmatpush1.msra.mxu1 %v2989_v35 }
 0x505   :  { %1538 = vmatprep.subr.mxu0 %v2996_v37  ;;  %1609 = vmatprep.subr.mxu1 %v3001_v39 }
 0x506   :  { %1539 = vmatpush1.msra.mxu0 %v3008_v41  ;;  %1610 = vmatpush1.msra.mxu1 %v3013_v43 }
 0x507   :  { %1540 = vmatprep.subr.mxu0 %v3020_v45  ;;  %1611 = vmatprep.subr.mxu1 %v3025_v47 }
 0x508   :  { %1541 = vmatpush1.msra.mxu0 %v3032_v49  ;;  %1612 = vmatpush1.msra.mxu1 %v3037_v51 }
 0x509   :  { %1542 = vmatprep.subr.mxu0 %v2771_v1  ;;  %1613 = vmatprep.subr.mxu1 %v3044_v53  ;;  %v3667_v1 = vld [vmem:[#allocation4_spill] sm:$0xff] }
 0x50a   :  { %1543 = vmatpush1.msra.mxu0 %v2777_v2  ;;  %1614 = vmatpush1.msra.mxu1 %v3051_v55  ;;  %v3668_v2 = vld [vmem:[#allocation9_spill] sm:$0xff] }
 0x50b   :  { %1544 = vmatprep.subr.mxu0 %v2783_v4  ;;  %1615 = vmatprep.subr.mxu1 %v3058_v50  ;;  %v3669_v4 = vld [vmem:[#allocation10_spill] sm:$0xff] }
 0x50c   :  { %1545 = vmatpush1.msra.mxu0 %v2789_v5  ;;  %1616 = vmatpush1.msra.mxu1 %v3065_v17  ;;  %v3670_v5 = vld [vmem:[#allocation16_spill] sm:$0xff] }
 0x50d   :  { %1546 = vmatprep.subr.mxu0 %v2795_v6  ;;  %1617 = vmatprep.subr.mxu1 %v3072_v22  ;;  %v3671_v6 = vld [vmem:[#allocation5_spill] sm:$0xff] }
 0x50e   :  { %1547 = vmatpush1.msra.mxu0 %v2800_v7  ;;  %1618 = vmatpush1.msra.mxu1 %v3077_v26  ;;  %v3672_v7 = vld [vmem:[#allocation11_spill] sm:$0xff] }
 0x50f   :  { %1548 = vmatprep.subr.mxu0 %v2805_v8  ;;  %1619 = vmatprep.subr.mxu1 %v3082_v30  ;;  %v3673_v8 = vld [vmem:[#allocation12_spill] sm:$0xff] }
 0x510   :  { %1549 = vmatpush1.msra.mxu0 %v2811_v10  ;;  %1620 = vmatpush1.msra.mxu1 %v3089_v34  ;;  %v3674_v10 = vld [vmem:[#allocation17_spill] sm:$0xff] }
 0x511   :  { %1550 = vmatprep.subr.mxu0 %v2817_v11  ;;  %1621 = vmatprep.subr.mxu1 %v3096_v38  ;;  %v3675_v11 = vld [vmem:[#allocation6_spill] sm:$0xff] }
 0x512   :  { %1551 = vmatpush1.msra.mxu0 %v2823_v12  ;;  %1622 = vmatpush1.msra.mxu1 %v3103_v44  ;;  %v3676_v12 = vld [vmem:[#allocation2_spill] sm:$0xff] }
 0x513   :  { %1552 = vmatprep.subr.mxu0 %v2829_v13  ;;  %1623 = vmatprep.subr.mxu1 %v3110_v60  ;;  %v3677_v13 = vld [vmem:[#allocation13_spill] sm:$0xff] }
 0x514   :  { %1553 = vmatpush1.msra.mxu0 %v2835_v14  ;;  %1624 = vmatpush1.msra.mxu1 %v3117_v58  ;;  %v3678_v14 = vld [vmem:[#allocation3_spill] sm:$0xff] }
 0x515   :  { %1554 = vmatprep.subr.mxu0 %v2841_v16  ;;  %1625 = vmatprep.subr.mxu1 %v3124_v57  ;;  %v3679_v16 = vld [vmem:[#allocation7_spill] sm:$0xff] }
 0x516   :  { %1555 = vmatpush1.msra.mxu0 %v2847_v18  ;;  %1626 = vmatpush1.msra.mxu1 %v3131_v59  ;;  %v3680_v18 = vld [vmem:[#allocation18_spill] sm:$0xff] }
 0x517   :  { %1556 = vmatprep.subr.mxu0 %v3667_v1  ;;  %1627 = vmatprep.subr.mxu1 %v3668_v2 }
 0x518   :  { %1557 = vmatpush1.msra.mxu0 %v3669_v4  ;;  %1628 = vmatpush1.msra.mxu1 %v3670_v5 }
 0x519   :  { %1558 = vmatprep.subr.mxu0 %v3671_v6  ;;  %1629 = vmatprep.subr.mxu1 %v3672_v7 }
 0x51a   :  { %1559 = vmatpush1.msra.mxu0 %v3673_v8  ;;  %1630 = vmatpush1.msra.mxu1 %v3674_v10 }
 0x51b   :  { %1560 = vmatprep.subr.mxu0 %v3675_v11  ;;  %1631 = vmatprep.subr.mxu1 %v3676_v12 }
 0x51c   :  { %1561 = vmatpush1.msra.mxu0 %v3677_v13  ;;  %1632 = vmatpush1.msra.mxu1 %v3678_v14 }
 0x51d   :  { %1562 = vmatprep.subr.mxu0 %v3679_v16  ;;  %1633 = vmatprep.subr.mxu1 %v3680_v18 }
 0x51e   :  { %1563 = vmatpush1.msra.mxu0 %v3681_v19  ;;  %1596 = vmatprep.mubr.f32.mxu0 %v3682_v61 }
 0x51f   :  { %1634 = vmatpush1.msra.mxu1 %v3683_v32  ;;  %1667 = vmatprep.mubr.f32.mxu1 %v3682_v61 }
 0x520   :  { %1773 = vmatprep.subr.mxu0 %v3684_v23  ;;  %1844 = vmatprep.subr.mxu1 %v3685_v28 }
 0x5bf   :  { %v1357_v21 = vpop.f32.mrf.mxu0  ;;  %v1428_v15 = vpop.f32.mrf.mxu1 }
 0x5c0   :  { %v1433_v33 = vadd.f32 %v1984_v36, %v1357_v21  ;;  %v1435_v27 = vadd.f32 %v1986_v29, %v1428_v15 }
 0x5c1   :  { %v1359_v40 = vpop.f32.mrf.mxu0  ;;  %v1430_v1 = vpop.f32.mrf.mxu1 }
 0x5c2   :  { %v1988_v46 = vmul.f32 -1.442695, %v1433_v33  ;;  %v1434_v25 = vadd.f32 %v1985_v31, %v1359_v40  ;;  %v1990_v4 = vmul.f32 -1.442695, %v1435_v27  ;;  %v1436_v8 = vadd.f32 %v1987_v20, %v1430_v1 }
 0x5c4   :  { %2089 = vpow2.f32 %v1988_v46  ;;  %v1989_v42 = vmul.f32 -1.442695, %v1434_v25 }
 0x5c6   :  { %2091 = vpow2.f32 %v1989_v42 }
 0x5c7   :  { %2093 = vpow2.f32 %v1990_v4 }
 0x5d1   :  { %v2090_v6 = vpop.eup %2089 }
 0x5d2   :  { %v1446_v11 = vadd.f32 1.0, %v2090_v6 }
 0x5d3   :  { %v2092_v13 = vpop.eup %2091 }
 0x5d4   :  { %2095 = vrcp.f32 %v1446_v11  ;;  %v1447_v16 = vadd.f32 1.0, %v2092_v13  ;;  %v2094_v19 = vpop.eup %2093 }
 0x5d5   :  { %2097 = vtanh.f32 %v1436_v8  ;;  %v1448_v21 = vadd.f32 1.0, %v2094_v19 }
 0x5d6   :  { %2099 = vrcp.f32 %v1447_v16  ;;  %v2000_v16 = vld [vmem:[%s3527_s0 + $0xe0] sm:$0xff] }
 0x5d7   :  { %2101 = vrcp.f32 %v1448_v21 }
 0x5e1   :  { %v2096_v23 = vpop.eup %2095 }
 0x5e2   :  { %v2098_v28 = vpop.eup %2097 }
 0x5e3   :  { %v2100_v36 = vpop.eup %2099  ;;  %v1457_v33 = vmul.f32 %v2098_v28, %v2096_v23  ;;  %v2001_v23 = vld [vmem:[%s3527_s0 + $0xe8] sm:$0xff] }
 0x5e4   :  { %v1456_v31 = vmul.f32 %v2100_v36, %v3295_v24  ;;  %v2102_v46 = vpop.eup %2101 }
 0x5e6   :  { %v3380_v40 = vadd.f32 %v1457_v33, %v1456_v31 }
 0x5e8   :  { %2103 = vtanh.f32 %v3380_v40 }
 0x5f5   :  { %v2104_v25 = vpop.eup %2103 }
 0x5f6   :  { %v1460_v42 = vmul.f32 %v2104_v25, %v2102_v46 }
 0x5f8   :  { %1991 = vst [vmem:[%s3529_s4 + $0x28] sm:$0xff] %v1460_v42  ;;  %1597 = vmatmul.mubr.f32.vlgmr.msra.gmra.mxu0 %v1460_v42  ;;  %1668 = vmatmul.mubr.f32.vlgmr.msra.gmra.mxu1 %v1460_v42  ;;  %v2003_v42 = vld [vmem:[%s3527_s0 + $0xf8] sm:$0xff] }
 0x5f9   :  { %1774 = vmatpush1.msra.mxu0 %v2936_v54  ;;  %1845 = vmatpush1.msra.mxu1 %v2941_v56  ;;  %v1750_v54 = vld [vmem:[%s3525_s3 + $0x148] sm:$0xff]  ;;  %v1749_v56 = vld [vmem:[%s3525_s3 + $0x140] sm:$0xff] }
 0x5fa   :  { %1775 = vmatprep.subr.mxu0 %v2948_v62  ;;  %1846 = vmatprep.subr.mxu1 %v2953_v3  ;;  %v1746_v62 = vld [vmem:[%s3525_s3 + $0x128] sm:$0xff]  ;;  %v1745_v3 = vld [vmem:[%s3525_s3 + $0x120] sm:$0xff] }
 0x5fb   :  { %1776 = vmatpush1.msra.mxu0 %v2960_v48  ;;  %1847 = vmatpush1.msra.mxu1 %v2965_v52  ;;  %v1742_v48 = vld [vmem:[%s3525_s3 + $0x108] sm:$0xff]  ;;  %v1741_v52 = vld [vmem:[%s3525_s3 + $0x100] sm:$0xff] }
 0x5fc   :  { %1777 = vmatprep.subr.mxu0 %v2972_v63  ;;  %1848 = vmatprep.subr.mxu1 %v2977_v0  ;;  %v1738_v63 = vld [vmem:[%s3525_s3 + $0xe8] sm:$0xff]  ;;  %v1737_v0 = vld [vmem:[%s3525_s3 + $0xe0] sm:$0xff] }
 0x5fd   :  { %1778 = vmatpush1.msra.mxu0 %v2984_v9  ;;  %1849 = vmatpush1.msra.mxu1 %v2989_v35  ;;  %v1734_v9 = vld [vmem:[%s3525_s3 + $0xc8] sm:$0xff]  ;;  %v1733_v35 = vld [vmem:[%s3525_s3 + $0xc0] sm:$0xff] }
 0x5fe   :  { %1779 = vmatprep.subr.mxu0 %v2996_v37  ;;  %1850 = vmatprep.subr.mxu1 %v3001_v39  ;;  %v1730_v37 = vld [vmem:[%s3525_s3 + $0xa8] sm:$0xff]  ;;  %v1729_v39 = vld [vmem:[%s3525_s3 + $0xa0] sm:$0xff] }
 0x5ff   :  { %1780 = vmatpush1.msra.mxu0 %v3008_v41  ;;  %1851 = vmatpush1.msra.mxu1 %v3013_v43  ;;  %v1726_v41 = vld [vmem:[%s3525_s3 + $0x88] sm:$0xff]  ;;  %v1725_v43 = vld [vmem:[%s3525_s3 + $0x80] sm:$0xff] }
 0x600   :  { %1781 = vmatprep.subr.mxu0 %v3020_v45  ;;  %1852 = vmatprep.subr.mxu1 %v3025_v47  ;;  %v1722_v45 = vld [vmem:[%s3525_s3 + $0x68] sm:$0xff]  ;;  %v1721_v47 = vld [vmem:[%s3525_s3 + $0x60] sm:$0xff] }
 0x601   :  { %1782 = vmatpush1.msra.mxu0 %v3032_v49  ;;  %1853 = vmatpush1.msra.mxu1 %v3037_v51  ;;  %v1718_v49 = vld [vmem:[%s3525_s3 + $0x48] sm:$0xff]  ;;  %v1717_v51 = vld [vmem:[%s3525_s3 + $0x40] sm:$0xff] }
 0x602   :  { %1854 = vmatprep.subr.mxu1 %v3044_v53  ;;  %1837 = vmatprep.mubr.f32.mxu0 %v3682_v61  ;;  %v1714_v53 = vld [vmem:[%s3525_s3 + $0x28] sm:$0xff] }
 0x603   :  { %1855 = vmatpush1.msra.mxu1 %v3051_v55  ;;  %1908 = vmatprep.mubr.f32.mxu1 %v3682_v61  ;;  %v1713_v55 = vld [vmem:[%s3525_s3 + $0x20] sm:$0xff] }
 0x604   :  { %1856 = vmatprep.subr.mxu1 %v3058_v50  ;;  %1783 = vmatprep.subr.mxu0 %v1750_v54  ;;  %v1710_v50 = vld [vmem:[%s3525_s3 + $0x8] sm:$0xff] }
 0x605   :  { %1857 = vmatpush1.msra.mxu1 %v3065_v17  ;;  %1784 = vmatpush1.msra.mxu0 %v1749_v56  ;;  %v1709_v17 = vld [vmem:[%s3525_s3] sm:$0xff] }
 0x606   :  { %1858 = vmatprep.subr.mxu1 %v3072_v22  ;;  %1785 = vmatprep.subr.mxu0 %v1746_v62  ;;  %v1992_v22 = vld [vmem:[%s3527_s0 + $0xc0] sm:$0xff] }
 0x607   :  { %1859 = vmatpush1.msra.mxu1 %v3077_v26  ;;  %1786 = vmatpush1.msra.mxu0 %v1745_v3 }
 0x608   :  { %1860 = vmatprep.subr.mxu1 %v3082_v30  ;;  %1787 = vmatprep.subr.mxu0 %v1742_v48  ;;  %v1993_v30 = vld [vmem:[%s3527_s0 + $0xc8] sm:$0xff] }
 0x609   :  { %1861 = vmatpush1.msra.mxu1 %v3089_v34  ;;  %1788 = vmatpush1.msra.mxu0 %v1741_v52 }
 0x60a   :  { %1862 = vmatprep.subr.mxu1 %v3096_v38  ;;  %1789 = vmatprep.subr.mxu0 %v1738_v63 }
 0x60b   :  { %1863 = vmatpush1.msra.mxu1 %v3103_v44  ;;  %1790 = vmatpush1.msra.mxu0 %v1737_v0 }
 0x60c   :  { %1864 = vmatprep.subr.mxu1 %v3110_v60  ;;  %1791 = vmatprep.subr.mxu0 %v1734_v9 }
 0x60d   :  { %1865 = vmatpush1.msra.mxu1 %v3117_v58  ;;  %1792 = vmatpush1.msra.mxu0 %v1733_v35 }
 0x60e   :  { %1866 = vmatprep.subr.mxu1 %v3124_v57  ;;  %1793 = vmatprep.subr.mxu0 %v1730_v37  ;;  %v1994_v57 = vld [vmem:[%s3527_s0 + $0xd0] sm:$0xff] }
 0x60f   :  { %1867 = vmatpush1.msra.mxu1 %v3131_v59  ;;  %1794 = vmatpush1.msra.mxu0 %v1729_v39 }
 0x610   :  { %1868 = vmatprep.subr.mxu1 %v3668_v2  ;;  %1795 = vmatprep.subr.mxu0 %v1726_v41  ;;  %v1995_v2 = vld [vmem:[%s3527_s0 + $0xd8] sm:$0xff] }
 0x611   :  { %1869 = vmatpush1.msra.mxu1 %v3670_v5  ;;  %1796 = vmatpush1.msra.mxu0 %v1725_v43 }
 0x612   :  { %1870 = vmatprep.subr.mxu1 %v3672_v7  ;;  %1797 = vmatprep.subr.mxu0 %v1722_v45 }
 0x613   :  { %1871 = vmatpush1.msra.mxu1 %v3674_v10  ;;  %1798 = vmatpush1.msra.mxu0 %v1721_v47 }
 0x614   :  { %1872 = vmatprep.subr.mxu1 %v3676_v12  ;;  %1799 = vmatprep.subr.mxu0 %v1718_v49 }
 0x615   :  { %1873 = vmatpush1.msra.mxu1 %v3678_v14  ;;  %1800 = vmatpush1.msra.mxu0 %v1717_v51 }
 0x616   :  { %1874 = vmatprep.subr.mxu1 %v3680_v18  ;;  %1801 = vmatprep.subr.mxu0 %v1714_v53 }
 0x617   :  { %1875 = vmatpush1.msra.mxu1 %v3683_v32  ;;  %1802 = vmatpush1.msra.mxu0 %v1713_v55 }
 0x618   :  { %1803 = vmatprep.subr.mxu0 %v1710_v50 }
 0x619   :  { %1804 = vmatpush1.msra.mxu0 %v1709_v17 }
 0x6b8   :  { %v1598_v26 = vpop.f32.mrf.mxu0  ;;  %v1669_v59 = vpop.f32.mrf.mxu1 }
 0x6b9   :  { %v1674_v34 = vadd.f32 %v1992_v22, %v1598_v26  ;;  %v1676_v24 = vadd.f32 %v1994_v57, %v1669_v59 }
 0x6ba   :  { %v1600_v38 = vpop.f32.mrf.mxu0  ;;  %v1671_v5 = vpop.f32.mrf.mxu1 }
 0x6bb   :  { %v1996_v44 = vmul.f32 -1.442695, %v1674_v34  ;;  %v1675_v60 = vadd.f32 %v1993_v30, %v1600_v38  ;;  %v1998_v7 = vmul.f32 -1.442695, %v1676_v24  ;;  %v1677_v12 = vadd.f32 %v1995_v2, %v1671_v5 }
 0x6bd   :  { %2105 = vpow2.f32 %v1996_v44  ;;  %v1997_v58 = vmul.f32 -1.442695, %v1675_v60 }
 0x6bf   :  { %2107 = vpow2.f32 %v1997_v58 }
 0x6c0   :  { %2109 = vpow2.f32 %v1998_v7 }
 0x6ca   :  { %v2106_v10 = vpop.eup %2105 }
 0x6cb   :  { %v1687_v14 = vadd.f32 1.0, %v2106_v10 }
 0x6cc   :  { %v2108_v18 = vpop.eup %2107 }
 0x6cd   :  { %2111 = vrcp.f32 %v1687_v14  ;;  %v1688_v61 = vadd.f32 1.0, %v2108_v18  ;;  %v2110_v32 = vpop.eup %2109 }
 0x6ce   :  { %2113 = vtanh.f32 %v1677_v12  ;;  %v1689_v20 = vadd.f32 1.0, %v2110_v32 }
 0x6cf   :  { %2115 = vrcp.f32 %v1688_v61 }
 0x6d0   :  { %2117 = vrcp.f32 %v1689_v20 }
 0x6da   :  { %v2112_v29 = vpop.eup %2111 }
 0x6db   :  { %v2114_v15 = vpop.eup %2113 }
 0x6dc   :  { %v2116_v27 = vpop.eup %2115  ;;  %v1698_v4 = vmul.f32 %v2114_v15, %v2112_v29 }
 0x6dd   :  { %v1697_v1 = vmul.f32 %v2116_v27, %v3380_v40  ;;  %v2118_v8 = vpop.eup %2117  ;;  %v2002_v40 = vld [vmem:[%s3527_s0 + $0xf0] sm:$0xff] }
 0x6df   :  { %v1699_v6 = vadd.f32 %v1698_v4, %v1697_v1 }
 0x6e1   :  { %2119 = vtanh.f32 %v1699_v6 }
 0x6ee   :  { %v2120_v11 = vpop.eup %2119 }
 0x6ef   :  { %v1701_v13 = vmul.f32 %v2120_v11, %v2118_v8 }
 0x6f1   :  { %1999 = vst [vmem:[%s3529_s4 + $0x30] sm:$0xff] %v1701_v13  ;;  %1838 = vmatmul.mubr.f32.vlgmr.msra.gmra.mxu0 %v1701_v13  ;;  %1909 = vmatmul.mubr.f32.vlgmr.msra.gmra.mxu1 %v1701_v13 }
 0x7b1   :  { %v1839_v19 = vpop.f32.mrf.mxu0  ;;  %v1910_v46 = vpop.f32.mrf.mxu1 }
 0x7b2   :  { %v1915_v28 = vadd.f32 %v2000_v16, %v1839_v19  ;;  %v1917_v25 = vadd.f32 %v2002_v40, %v1910_v46 }
 0x7b3   :  { %v1841_v36 = vpop.f32.mrf.mxu0  ;;  %v1912_v54 = vpop.f32.mrf.mxu1 }
 0x7b4   :  { %v2004_v21 = vmul.f32 -1.442695, %v1915_v28  ;;  %v1916_v31 = vadd.f32 %v2001_v23, %v1841_v36  ;;  %v2006_v56 = vmul.f32 -1.442695, %v1917_v25  ;;  %v1918_v3 = vadd.f32 %v2003_v42, %v1912_v54 }
 0x7b6   :  { %2121 = vpow2.f32 %v2004_v21  ;;  %v2005_v33 = vmul.f32 -1.442695, %v1916_v31 }
 0x7b8   :  { %2123 = vpow2.f32 %v2005_v33 }
 0x7b9   :  { %2125 = vpow2.f32 %v2006_v56 }
 0x7c3   :  { %v2122_v62 = vpop.eup %2121 }
 0x7c4   :  { %v1928_v48 = vadd.f32 1.0, %v2122_v62 }
 0x7c5   :  { %v2124_v52 = vpop.eup %2123 }
 0x7c6   :  { %2127 = vrcp.f32 %v1928_v48  ;;  %v1929_v63 = vadd.f32 1.0, %v2124_v52  ;;  %v2126_v0 = vpop.eup %2125 }
 0x7c7   :  { %2129 = vtanh.f32 %v1918_v3  ;;  %v1930_v39 = vadd.f32 1.0, %v2126_v0 }
 0x7c8   :  { %2131 = vrcp.f32 %v1929_v63 }
 0x7c9   :  { %2133 = vrcp.f32 %v1930_v39 }
 0x7d3   :  { %v2128_v9 = vpop.eup %2127 }
 0x7d4   :  { %v2130_v35 = vpop.eup %2129 }
 0x7d5   :  { %v2132_v37 = vpop.eup %2131  ;;  %v1939_v43 = vmul.f32 %v2130_v35, %v2128_v9 }
 0x7d6   :  { %v1938_v41 = vmul.f32 %v2132_v37, %v1699_v6  ;;  %v2134_v47 = vpop.eup %2133 }
 0x7d8   :  { %v1940_v45 = vadd.f32 %v1939_v43, %v1938_v41 }
 0x7da   :  { %2135 = vtanh.f32 %v1940_v45 }
 0x7e7   :  { %v2136_v49 = vpop.eup %2135 }
 0x7e8   :  { %v1942_v51 = vmul.f32 %v2136_v49, %v2134_v47 }
 0x7ea   :  { %2007 = vst [vmem:[%s3529_s4 + $0x38] sm:$0xff] %v1942_v51 }

</bundles_post_ra>
